<compile_context>
chip_gen: v7x
topology: tpu7x:2x2x1
jax: 0.10.0
libtpu: 0.0.40
codegen_flags: <defaults>
</compile_context>

<pallas_src>
import functools

import jax
import jax.numpy as jnp
from jax.experimental import pallas as pl
from jax.experimental.pallas import tpu as pltpu

E, T, F, RANK = 16, 16, 8, 4          # links, time steps, flows, low-rank dim
_PREC = jax.lax.Precision.HIGHEST
_EPS = 1e-30                          # divide-by-zero guard (matches reference)
_PIV_EPS = 1e-20                      # Gauss-Jordan pivot floor (SPD pivots > 0)


# ----------------------------- small helpers --------------------------------
def _soft_threshold(x, thresh):
    # sign(x) * max(|x| - t, 0) expressed with two maxes (cheaper on the VPU).
    return jnp.maximum(x - thresh, 0.0) - jnp.maximum(-x - thresh, 0.0)


# ------------------------------- the kernel ----------------------------------
def _make_bsca_kernel(num_iters, rank):
    """Build a kernel running `num_iters` BSCA iterations with P/Q/A resident."""
    r = rank

    def kernel(params_ref, Y_ref, R_ref, Om_ref, P_ref, Q_ref, A_ref,
               P_out, Q_out, A_out):
        dot = functools.partial(jnp.dot, preferred_element_type=jnp.float32,
                                precision=_PREC)

        def dot_nt(a, b):
            # a @ b.T as an MXU NT matmul (no materialized transpose).
            return jax.lax.dot_general(
                a, b, (((1,), (1,)), ((), ())),
                preferred_element_type=jnp.float32, precision=_PREC)

        # One-hot (1, r) identity rows built from iota -> traced ops, not
        # captured constants (this was the previous compile failure).
        lane_ids = jax.lax.broadcasted_iota(jnp.int32, (1, r), 1)
        eye_rows = [(lane_ids == a).astype(jnp.float32) for a in range(r)]

        def gram_rows(M, X, lam):
            # rows[a][n, b] = sum_k M[n, k] * X[k, a] * X[k, b] + lam * [a == b]
            # Row-wise masked Gram: VPU column product + one small MXU matmul
            # per row block (no constant selection matrices, no concat).
            return [dot(M, X * X[:, a:a + 1]) + lam * eye_rows[a]
                    for a in range(r)]

        def ridge_solve(rows, rhs):
            """Row-batched (r x r) SPD solve, fully unrolled Gauss-Jordan."""
            rows = list(rows)
            cols = [rhs[:, a:a + 1] for a in range(r)]
            for k in range(r):
                piv = jnp.maximum(rows[k][:, k:k + 1], _PIV_EPS)  # SPD: piv > 0
                inv = pl.reciprocal(piv, approx=True)             # EUP slot
                inv = inv * (2.0 - piv * inv)                     # Newton -> ~f32
                rows[k] = rows[k] * inv
                cols[k] = cols[k] * inv
                for i in range(r):
                    if i == k:
                        continue
                    f = rows[i][:, k:k + 1]
                    rows[i] = rows[i] - f * rows[k]
                    cols[i] = cols[i] - f * cols[k]
            sol = cols[0] * eye_rows[0]
            for a in range(1, r):
                sol = sol + cols[a] * eye_rows[a]
            return sol

        Y, Rm, Om = Y_ref[...], R_ref[...], Om_ref[...]
        P, Q, A = P_ref[...], Q_ref[...], A_ref[...]

        # ---- iteration-invariant precompute (hoisted out of the unrolled loop)
        OmT = jnp.transpose(Om)                  # (T, E)
        RT = jnp.transpose(Rm)                   # (F, E)
        d = dot(RT * RT, Om)                     # (F, T) curvature diagonal
        d_pos = d > 0.0
        d_inv = 1.0 / jnp.maximum(d, _EPS)

        for it in range(num_iters):
            base = 7 * it
            lam1 = params_ref[base + 0]
            lam2 = params_ref[base + 1]
            mu = params_ref[base + 2]
            skip_p = params_ref[base + 3]     # 1.0 when skip_connections is off
            skip_q = params_ref[base + 4]
            skip_a = params_ref[base + 5]
            a_upd = params_ref[base + 6]      # 1.0 / 0.0 for A_update flag

            # err = Omega * (Y - R @ A)  (shared by the three block updates)
            err = Om * (Y - dot(Rm, A))                       # (E, T)

            # ---- P update: (Q^T diag(Om_e) Q + lam1 I) p_e = Q^T err_e
            rhsP = dot(err, Q)                                # (E, r)
            P_s = ridge_solve(gram_rows(Om, Q, lam1), rhsP)
            P = P + skip_p * (P_s - P)

            # ---- Q update: (P^T diag(Om_:,t) P + lam2 I) q_t = P^T err_:,t
            # TODO(synk): errT is one serial XLU transpose per iteration; it
            # folds away in the batched (lane-dense) layout.
            errT = jnp.transpose(err)                         # (T, E)
            rhsQ = dot(errT, P)                               # (T, r)
            Q_s = ridge_solve(gram_rows(OmT, P, lam2), rhsQ)
            Q = Q + skip_q * (Q_s - Q)

            # ---- A update: soft-threshold best response + exact line search
            # TODO(synk): soft_thresh_cont_grad only alters the backward pass
            # of the soft threshold in the original code; forward is identical.
            pqT = dot_nt(P, Q)                                # (E, T) = P @ Q.T
            err2 = err - Om * pqT                             # Om*(Y - PQ^T - RA)
            G = dot(RT, err2)                                 # (F, T)
            BA = jnp.where(d_pos,
                           _soft_threshold(A * d + G, mu) * d_inv,
                           0.0)
            dA = BA - A
            RdA = Om * dot(Rm, dA)                            # (E, T)
            num = (jnp.sum(err2 * RdA, keepdims=True)
                   - mu * jnp.sum(jnp.abs(BA) - jnp.abs(A), keepdims=True))
            den = jnp.sum(RdA * RdA, keepdims=True)
            gamma = jnp.where(den > 0.0,
                              jnp.clip(num / jnp.maximum(den, _EPS), 0.0, 1.0),
                              0.0)
            A_s = A + gamma * dA
            A_s = jnp.where(a_upd > 0.5, A_s, A)              # A_update flag
            A = A + skip_a * (A_s - A)

        P_out[...] = P
        Q_out[...] = Q
        A_out[...] = A

    return kernel


@functools.lru_cache(maxsize=None)
def _bsca_callable(num_iters, E_, T_, F_, r_):
    """Memoized pallas_call + jit: repeated forwards never retrace/recompile."""
    vmem = pl.BlockSpec(memory_space=pltpu.MemorySpace.VMEM)
    smem = pl.BlockSpec(memory_space=pltpu.MemorySpace.SMEM)
    call = pl.pallas_call(
        _make_bsca_kernel(num_iters, r_),
        out_shape=(
            jax.ShapeDtypeStruct((E_, r_), jnp.float32),
            jax.ShapeDtypeStruct((T_, r_), jnp.float32),
            jax.ShapeDtypeStruct((F_, T_), jnp.float32),
        ),
        in_specs=[smem, vmem, vmem, vmem, vmem, vmem, vmem],
        out_specs=(vmem, vmem, vmem),
        # P/Q/A can be updated in place when the caller jits and donates them
        # (chained unrolled layers); otherwise XLA inserts a copy.
        input_output_aliases={4: 0, 5: 1, 6: 2},
    )
    return jax.jit(call)


def bsca_unrolled_forward(layers, Y, R, Omega, P, Q, A, A_update=True):
    """Run len(layers) BSCA iterations fused into ONE (cached) pallas_call."""
    E_, T_ = Y.shape
    F_ = R.shape[1]
    r_ = P.shape[1]
    params = jnp.concatenate(
        [l.scalar_params(A_update) for l in layers], axis=0).astype(jnp.float32)
    fn = _bsca_callable(len(layers), E_, T_, F_, r_)
    return fn(params,
              Y.astype(jnp.float32), R.astype(jnp.float32),
              Omega.astype(jnp.float32), P.astype(jnp.float32),
              Q.astype(jnp.float32), A.astype(jnp.float32))


# ------------------------------- wrapper --------------------------------------
class BSCAUnrolledIterationPallas:
    """JAX/Pallas port of BSCAUnrolledIteration (deterministic init)."""

    def __init__(self, two_lambda=False, soft_thresh_cont_grad=False,
                 A_postproc=None, skip_connections=False, option=None,
                 relaxed=None, init_val=-5.0):
        # TODO(synk): A_postproc is an arbitrary external module hook; it is
        # stored but never called in the reference forward, so it is ignored.
        del A_postproc, soft_thresh_cont_grad, option, relaxed
        self.two_lambda = two_lambda
        self.skip_connections = skip_connections
        self.lam_log = jnp.float32(init_val)
        self.mu_log = jnp.float32(init_val)
        self.lam2_log = jnp.float32(init_val) if two_lambda else None
        if skip_connections:
            self.skip_P = jnp.float32(0.5)
            self.skip_Q = jnp.float32(0.5)
            self.skip_A = jnp.float32(0.5)
        self.lam_val = None
        self.mu_val = None

    def scalar_params(self, A_update=True):
        lam1 = jnp.exp(self.lam_log)
        lam2 = jnp.exp(self.lam2_log) if self.two_lambda else lam1
        mu = jnp.exp(self.mu_log)
        if self.skip_connections:
            sP = jax.nn.sigmoid(self.skip_P)
            sQ = jax.nn.sigmoid(self.skip_Q)
            sA = jax.nn.sigmoid(self.skip_A)
        else:
            sP = sQ = sA = jnp.float32(1.0)
        a_upd = jnp.float32(1.0 if A_update else 0.0)
        return jnp.stack([lam1, lam2, mu, sP, sQ, sA, a_upd]).astype(jnp.float32)

    def __call__(self, Y, R, Omega, P, Q, A, A_update=True):
        self.lam_val = jnp.exp(self.lam_log)
        self.mu_val = jnp.exp(self.mu_log)
        return bsca_unrolled_forward([self], Y, R, Omega, P, Q, A, A_update)


# --------------------------- pure-JAX reference -------------------------------
def bsca_reference(Y, R, Omega, P, Q, A, params):
    lam1, lam2, mu, sP, sQ, sA, a_upd = [params[i] for i in range(7)]
    r = P.shape[1]
    with jax.default_matmul_precision("highest"):
        eye = jnp.eye(r, dtype=jnp.float32)
        err = Omega * (Y - R @ A)
        gramP = jnp.einsum('et,ta,tb->eab', Omega, Q, Q) + lam1 * eye
        P_s = jnp.linalg.solve(gramP, (err @ Q)[..., None])[..., 0]
        P_new = P + sP * (P_s - P)
        gramQ = jnp.einsum('et,ea,eb->tab', Omega, P_new, P_new) + lam2 * eye
        Q_s = jnp.linalg.solve(gramQ, (err.T @ P_new)[..., None])[..., 0]
        Q_new = Q + sQ * (Q_s - Q)
        err2 = err - Omega * (P_new @ Q_new.T)
        G = R.T @ err2
        d = (R * R).T @ Omega
        BA = jnp.where(d > 0.0,
                       _soft_threshold(A * d + G, mu) / jnp.maximum(d, _EPS),
                       0.0)
        dA = BA - A
        RdA = Omega * (R @ dA)
        num = jnp.sum(err2 * RdA) - mu * (jnp.sum(jnp.abs(BA)) - jnp.sum(jnp.abs(A)))
        den = jnp.sum(RdA * RdA)
        gamma = jnp.where(den > 0.0,
                          jnp.clip(num / jnp.maximum(den, _EPS), 0.0, 1.0), 0.0)
        A_s = A + gamma * dA
        A_s = jnp.where(a_upd > 0.5, A_s, A)
        A_new = A + sA * (A_s - A)
    return P_new, Q_new, A_new


def _check(name, got, ref, tol=2e-3):
    if not jnp.allclose(got, ref, rtol=tol, atol=tol):
        raise AssertionError(
            f"{name} mismatch: max abs err = {float(jnp.max(jnp.abs(got - ref)))}")


# ------------------------------------ main ------------------------------------
if __name__ == "__main__":
    key = jax.random.PRNGKey(0)
    ks = jax.random.split(key, 6)
    Y = jax.random.normal(ks[0], (E, T), dtype=jnp.float32)
    R = jax.random.normal(ks[1], (E, F), dtype=jnp.float32)
    Omega = (jax.random.uniform(ks[2], (E, T)) < 0.85).astype(jnp.float32)
    P = jax.random.normal(ks[3], (E, RANK), dtype=jnp.float32)
    Q = jax.random.normal(ks[4], (T, RANK), dtype=jnp.float32)
    A = 0.1 * jax.random.normal(ks[5], (F, T), dtype=jnp.float32)

    # ---- single iteration (exact module semantics) ----
    module = BSCAUnrolledIterationPallas()     # defaults: two_lambda/skip off
    P1, Q1, A1 = module(Y, R, Omega, P, Q, A, A_update=True)
    jax.block_until_ready((P1, Q1, A1))
    Pr, Qr, Ar = bsca_reference(Y, R, Omega, P, Q, A, module.scalar_params(True))
    _check("P", P1, Pr)
    _check("Q", Q1, Qr)
    _check("A", A1, Ar)

    # second call hits the lru_cached compiled callable (no retrace/recompile)
    P1b, Q1b, A1b = module(Y, R, Omega, P, Q, A, A_update=True)
    jax.block_until_ready((P1b, Q1b, A1b))
    _check("P (cached call)", P1b, P1, tol=1e-6)

    # ---- three unrolled iterations fused into ONE pallas_call ----
    layers = [
        BSCAUnrolledIterationPallas(),
        BSCAUnrolledIterationPallas(two_lambda=True, init_val=-4.0),
        BSCAUnrolledIterationPallas(skip_connections=True, init_val=-3.0),
    ]
    P3, Q3, A3 = bsca_unrolled_forward(layers, Y, R, Omega, P, Q, A,
                                       A_update=True)
    jax.block_until_ready((P3, Q3, A3))
    Pc, Qc, Ac = P, Q, A
    for layer in layers:
        Pc, Qc, Ac = bsca_reference(Y, R, Omega, Pc, Qc, Ac,
                                    layer.scalar_params(True))
    _check("P3", P3, Pc, tol=5e-3)
    _check("Q3", Q3, Qc, tol=5e-3)
    _check("A3", A3, Ac, tol=5e-3)

    print("KERNEL_OK")
</pallas_src>

<mosaic_0001>
module attributes {stable_mosaic.version = 11 : i64} {
  func.func @kernel(%arg0: memref<7xf32, #tpu.memory_space<smem>>, %arg1: memref<16x16xf32, #tpu.memory_space<vmem>>, %arg2: memref<16x8xf32, #tpu.memory_space<vmem>>, %arg3: memref<16x16xf32, #tpu.memory_space<vmem>>, %arg4: memref<16x4xf32, #tpu.memory_space<vmem>>, %arg5: memref<16x4xf32, #tpu.memory_space<vmem>>, %arg6: memref<8x16xf32, #tpu.memory_space<vmem>>, %arg7: memref<16x4xf32, #tpu.memory_space<vmem>>, %arg8: memref<16x4xf32, #tpu.memory_space<vmem>>, %arg9: memref<8x16xf32, #tpu.memory_space<vmem>>) attributes {dimension_semantics = [], scalar_prefetch = 0 : i64, scratch_operands = 0 : i64, tpu.core_type = #tpu.core_type<tc>} {
    %0 = tpu.iota {dimensions = array<i32: 1>} : vector<1x4xi32>
    %c0_i32 = arith.constant 0 : i32
    %1 = vector.broadcast %c0_i32 : i32 to vector<1x4xi32>
    %2 = arith.cmpi eq, %0, %1 : vector<1x4xi32>
    %3 = arith.extui %2 : vector<1x4xi1> to vector<1x4xi32>
    %4 = arith.sitofp %3 : vector<1x4xi32> to vector<1x4xf32>
    %c1_i32 = arith.constant 1 : i32
    %5 = vector.broadcast %c1_i32 : i32 to vector<1x4xi32>
    %6 = arith.cmpi eq, %0, %5 : vector<1x4xi32>
    %7 = arith.extui %6 : vector<1x4xi1> to vector<1x4xi32>
    %8 = arith.sitofp %7 : vector<1x4xi32> to vector<1x4xf32>
    %c2_i32 = arith.constant 2 : i32
    %9 = vector.broadcast %c2_i32 : i32 to vector<1x4xi32>
    %10 = arith.cmpi eq, %0, %9 : vector<1x4xi32>
    %11 = arith.extui %10 : vector<1x4xi1> to vector<1x4xi32>
    %12 = arith.sitofp %11 : vector<1x4xi32> to vector<1x4xf32>
    %c3_i32 = arith.constant 3 : i32
    %13 = vector.broadcast %c3_i32 : i32 to vector<1x4xi32>
    %14 = arith.cmpi eq, %0, %13 : vector<1x4xi32>
    %15 = arith.extui %14 : vector<1x4xi1> to vector<1x4xi32>
    %16 = arith.sitofp %15 : vector<1x4xi32> to vector<1x4xf32>
    %c0 = arith.constant 0 : index
    %c0_0 = arith.constant 0 : index
    %17 = vector.load %arg1[%c0, %c0_0] : memref<16x16xf32, #tpu.memory_space<vmem>>, vector<16x16xf32>
    %c0_1 = arith.constant 0 : index
    %c0_2 = arith.constant 0 : index
    %18 = vector.load %arg2[%c0_1, %c0_2] : memref<16x8xf32, #tpu.memory_space<vmem>>, vector<16x8xf32>
    %c0_3 = arith.constant 0 : index
    %c0_4 = arith.constant 0 : index
    %19 = vector.load %arg3[%c0_3, %c0_4] : memref<16x16xf32, #tpu.memory_space<vmem>>, vector<16x16xf32>
    %c0_5 = arith.constant 0 : index
    %c0_6 = arith.constant 0 : index
    %20 = vector.load %arg4[%c0_5, %c0_6] : memref<16x4xf32, #tpu.memory_space<vmem>>, vector<16x4xf32>
    %c0_7 = arith.constant 0 : index
    %c0_8 = arith.constant 0 : index
    %21 = vector.load %arg5[%c0_7, %c0_8] : memref<16x4xf32, #tpu.memory_space<vmem>>, vector<16x4xf32>
    %c0_9 = arith.constant 0 : index
    %c0_10 = arith.constant 0 : index
    %22 = vector.load %arg6[%c0_9, %c0_10] : memref<8x16xf32, #tpu.memory_space<vmem>>, vector<8x16xf32>
    %23 = tpu.transpose %19, [1, 0] : vector<16x16xf32> -> vector<16x16xf32>
    %24 = tpu.transpose %18, [1, 0] : vector<16x8xf32> -> vector<8x16xf32>
    %25 = arith.mulf %24, %24 : vector<8x16xf32>
    %cst = arith.constant dense<0.000000e+00> : vector<8x16xf32>
    %26 = tpu.matmul %25, %19, %cst {dimension_numbers = #tpu.dot_dimension_numbers<[1], [0], [0], [1], [0, 0, 1, 1], [], []>, precision = #tpu.contract_precision<fp32>} : vector<8x16xf32>, vector<16x16xf32>, vector<8x16xf32> -> vector<8x16xf32>
    %cst_11 = arith.constant 0.000000e+00 : f32
    %27 = vector.broadcast %cst_11 : f32 to vector<8x16xf32>
    %28 = arith.cmpf ogt, %26, %27 : vector<8x16xf32>
    %cst_12 = arith.constant 1.000000e-30 : f32
    %29 = vector.broadcast %cst_12 : f32 to vector<8x16xf32>
    %30 = arith.maximumf %26, %29 : vector<8x16xf32>
    %cst_13 = arith.constant 1.000000e+00 : f32
    %31 = vector.broadcast %cst_13 : f32 to vector<8x16xf32>
    %32 = arith.divf %31, %30 : vector<8x16xf32>
    %c0_14 = arith.constant 0 : index
    %33 = memref.load %arg0[%c0_14] : memref<7xf32, #tpu.memory_space<smem>>
    %c1 = arith.constant 1 : index
    %34 = memref.load %arg0[%c1] : memref<7xf32, #tpu.memory_space<smem>>
    %c2 = arith.constant 2 : index
    %35 = memref.load %arg0[%c2] : memref<7xf32, #tpu.memory_space<smem>>
    %c3 = arith.constant 3 : index
    %36 = memref.load %arg0[%c3] : memref<7xf32, #tpu.memory_space<smem>>
    %c4 = arith.constant 4 : index
    %37 = memref.load %arg0[%c4] : memref<7xf32, #tpu.memory_space<smem>>
    %c5 = arith.constant 5 : index
    %38 = memref.load %arg0[%c5] : memref<7xf32, #tpu.memory_space<smem>>
    %c6 = arith.constant 6 : index
    %39 = memref.load %arg0[%c6] : memref<7xf32, #tpu.memory_space<smem>>
    %cst_15 = arith.constant dense<0.000000e+00> : vector<16x16xf32>
    %40 = tpu.matmul %18, %22, %cst_15 {dimension_numbers = #tpu.dot_dimension_numbers<[1], [0], [0], [1], [0, 0, 1, 1], [], []>, precision = #tpu.contract_precision<fp32>} : vector<16x8xf32>, vector<8x16xf32>, vector<16x16xf32> -> vector<16x16xf32>
    %41 = arith.subf %17, %40 : vector<16x16xf32>
    %42 = arith.mulf %19, %41 : vector<16x16xf32>
    %cst_16 = arith.constant dense<0.000000e+00> : vector<16x4xf32>
    %43 = tpu.matmul %42, %21, %cst_16 {dimension_numbers = #tpu.dot_dimension_numbers<[1], [0], [0], [1], [0, 0, 1, 1], [], []>, precision = #tpu.contract_precision<fp32>} : vector<16x16xf32>, vector<16x4xf32>, vector<16x4xf32> -> vector<16x4xf32>
    %44 = vector.extract_strided_slice %21 {offsets = [0, 0], sizes = [16, 1], strides = [1, 1]} : vector<16x4xf32> to vector<16x1xf32>
    %45 = vector.broadcast %44 : vector<16x1xf32> to vector<16x4xf32>
    %46 = arith.mulf %21, %45 : vector<16x4xf32>
    %cst_17 = arith.constant dense<0.000000e+00> : vector<16x4xf32>
    %47 = tpu.matmul %19, %46, %cst_17 {dimension_numbers = #tpu.dot_dimension_numbers<[1], [0], [0], [1], [0, 0, 1, 1], [], []>, precision = #tpu.contract_precision<fp32>} : vector<16x16xf32>, vector<16x4xf32>, vector<16x4xf32> -> vector<16x4xf32>
    %48 = vector.broadcast %33 : f32 to vector<1x4xf32>
    %49 = arith.mulf %48, %4 : vector<1x4xf32>
    %50 = vector.broadcast %49 : vector<1x4xf32> to vector<16x4xf32>
    %51 = arith.addf %47, %50 : vector<16x4xf32>
    %52 = vector.extract_strided_slice %21 {offsets = [0, 1], sizes = [16, 1], strides = [1, 1]} : vector<16x4xf32> to vector<16x1xf32>
    %53 = vector.broadcast %52 : vector<16x1xf32> to vector<16x4xf32>
    %54 = arith.mulf %21, %53 : vector<16x4xf32>
    %cst_18 = arith.constant dense<0.000000e+00> : vector<16x4xf32>
    %55 = tpu.matmul %19, %54, %cst_18 {dimension_numbers = #tpu.dot_dimension_numbers<[1], [0], [0], [1], [0, 0, 1, 1], [], []>, precision = #tpu.contract_precision<fp32>} : vector<16x16xf32>, vector<16x4xf32>, vector<16x4xf32> -> vector<16x4xf32>
    %56 = vector.broadcast %33 : f32 to vector<1x4xf32>
    %57 = arith.mulf %56, %8 : vector<1x4xf32>
    %58 = vector.broadcast %57 : vector<1x4xf32> to vector<16x4xf32>
    %59 = arith.addf %55, %58 : vector<16x4xf32>
    %60 = vector.extract_strided_slice %21 {offsets = [0, 2], sizes = [16, 1], strides = [1, 1]} : vector<16x4xf32> to vector<16x1xf32>
    %61 = vector.broadcast %60 : vector<16x1xf32> to vector<16x4xf32>
    %62 = arith.mulf %21, %61 : vector<16x4xf32>
    %cst_19 = arith.constant dense<0.000000e+00> : vector<16x4xf32>
    %63 = tpu.matmul %19, %62, %cst_19 {dimension_numbers = #tpu.dot_dimension_numbers<[1], [0], [0], [1], [0, 0, 1, 1], [], []>, precision = #tpu.contract_precision<fp32>} : vector<16x16xf32>, vector<16x4xf32>, vector<16x4xf32> -> vector<16x4xf32>
    %64 = vector.broadcast %33 : f32 to vector<1x4xf32>
    %65 = arith.mulf %64, %12 : vector<1x4xf32>
    %66 = vector.broadcast %65 : vector<1x4xf32> to vector<16x4xf32>
    %67 = arith.addf %63, %66 : vector<16x4xf32>
    %68 = vector.extract_strided_slice %21 {offsets = [0, 3], sizes = [16, 1], strides = [1, 1]} : vector<16x4xf32> to vector<16x1xf32>
    %69 = vector.broadcast %68 : vector<16x1xf32> to vector<16x4xf32>
    %70 = arith.mulf %21, %69 : vector<16x4xf32>
    %cst_20 = arith.constant dense<0.000000e+00> : vector<16x4xf32>
    %71 = tpu.matmul %19, %70, %cst_20 {dimension_numbers = #tpu.dot_dimension_numbers<[1], [0], [0], [1], [0, 0, 1, 1], [], []>, precision = #tpu.contract_precision<fp32>} : vector<16x16xf32>, vector<16x4xf32>, vector<16x4xf32> -> vector<16x4xf32>
    %72 = vector.broadcast %33 : f32 to vector<1x4xf32>
    %73 = arith.mulf %72, %16 : vector<1x4xf32>
    %74 = vector.broadcast %73 : vector<1x4xf32> to vector<16x4xf32>
    %75 = arith.addf %71, %74 : vector<16x4xf32>
    %76 = vector.extract_strided_slice %43 {offsets = [0, 0], sizes = [16, 1], strides = [1, 1]} : vector<16x4xf32> to vector<16x1xf32>
    %77 = vector.extract_strided_slice %43 {offsets = [0, 1], sizes = [16, 1], strides = [1, 1]} : vector<16x4xf32> to vector<16x1xf32>
    %78 = vector.extract_strided_slice %43 {offsets = [0, 2], sizes = [16, 1], strides = [1, 1]} : vector<16x4xf32> to vector<16x1xf32>
    %79 = vector.extract_strided_slice %43 {offsets = [0, 3], sizes = [16, 1], strides = [1, 1]} : vector<16x4xf32> to vector<16x1xf32>
    %80 = vector.extract_strided_slice %51 {offsets = [0, 0], sizes = [16, 1], strides = [1, 1]} : vector<16x4xf32> to vector<16x1xf32>
    %cst_21 = arith.constant 9.99999968E-21 : f32
    %81 = vector.broadcast %cst_21 : f32 to vector<16x1xf32>
    %82 = arith.maximumf %80, %81 : vector<16x1xf32>
    %83 = tpu.reciprocal %82 {approx = true} : vector<16x1xf32> -> vector<16x1xf32>
    %84 = arith.mulf %82, %83 : vector<16x1xf32>
    %cst_22 = arith.constant 2.000000e+00 : f32
    %85 = vector.broadcast %cst_22 : f32 to vector<16x1xf32>
    %86 = arith.subf %85, %84 : vector<16x1xf32>
    %87 = arith.mulf %83, %86 : vector<16x1xf32>
    %88 = vector.broadcast %87 : vector<16x1xf32> to vector<16x4xf32>
    %89 = arith.mulf %51, %88 : vector<16x4xf32>
    %90 = arith.mulf %76, %87 : vector<16x1xf32>
    %91 = vector.extract_strided_slice %59 {offsets = [0, 0], sizes = [16, 1], strides = [1, 1]} : vector<16x4xf32> to vector<16x1xf32>
    %92 = vector.broadcast %91 : vector<16x1xf32> to vector<16x4xf32>
    %93 = arith.mulf %92, %89 : vector<16x4xf32>
    %94 = arith.subf %59, %93 : vector<16x4xf32>
    %95 = arith.mulf %91, %90 : vector<16x1xf32>
    %96 = arith.subf %77, %95 : vector<16x1xf32>
    %97 = vector.extract_strided_slice %67 {offsets = [0, 0], sizes = [16, 1], strides = [1, 1]} : vector<16x4xf32> to vector<16x1xf32>
    %98 = vector.broadcast %97 : vector<16x1xf32> to vector<16x4xf32>
    %99 = arith.mulf %98, %89 : vector<16x4xf32>
    %100 = arith.subf %67, %99 : vector<16x4xf32>
    %101 = arith.mulf %97, %90 : vector<16x1xf32>
    %102 = arith.subf %78, %101 : vector<16x1xf32>
    %103 = vector.extract_strided_slice %75 {offsets = [0, 0], sizes = [16, 1], strides = [1, 1]} : vector<16x4xf32> to vector<16x1xf32>
    %104 = vector.broadcast %103 : vector<16x1xf32> to vector<16x4xf32>
    %105 = arith.mulf %104, %89 : vector<16x4xf32>
    %106 = arith.subf %75, %105 : vector<16x4xf32>
    %107 = arith.mulf %103, %90 : vector<16x1xf32>
    %108 = arith.subf %79, %107 : vector<16x1xf32>
    %109 = vector.extract_strided_slice %94 {offsets = [0, 1], sizes = [16, 1], strides = [1, 1]} : vector<16x4xf32> to vector<16x1xf32>
    %cst_23 = arith.constant 9.99999968E-21 : f32
    %110 = vector.broadcast %cst_23 : f32 to vector<16x1xf32>
    %111 = arith.maximumf %109, %110 : vector<16x1xf32>
    %112 = tpu.reciprocal %111 {approx = true} : vector<16x1xf32> -> vector<16x1xf32>
    %113 = arith.mulf %111, %112 : vector<16x1xf32>
    %cst_24 = arith.constant 2.000000e+00 : f32
    %114 = vector.broadcast %cst_24 : f32 to vector<16x1xf32>
    %115 = arith.subf %114, %113 : vector<16x1xf32>
    %116 = arith.mulf %112, %115 : vector<16x1xf32>
    %117 = vector.broadcast %116 : vector<16x1xf32> to vector<16x4xf32>
    %118 = arith.mulf %94, %117 : vector<16x4xf32>
    %119 = arith.mulf %96, %116 : vector<16x1xf32>
    %120 = vector.extract_strided_slice %89 {offsets = [0, 1], sizes = [16, 1], strides = [1, 1]} : vector<16x4xf32> to vector<16x1xf32>
    %121 = vector.broadcast %120 : vector<16x1xf32> to vector<16x4xf32>
    %122 = arith.mulf %121, %118 : vector<16x4xf32>
    %123 = arith.subf %89, %122 : vector<16x4xf32>
    %124 = arith.mulf %120, %119 : vector<16x1xf32>
    %125 = arith.subf %90, %124 : vector<16x1xf32>
    %126 = vector.extract_strided_slice %100 {offsets = [0, 1], sizes = [16, 1], strides = [1, 1]} : vector<16x4xf32> to vector<16x1xf32>
    %127 = vector.broadcast %126 : vector<16x1xf32> to vector<16x4xf32>
    %128 = arith.mulf %127, %118 : vector<16x4xf32>
    %129 = arith.subf %100, %128 : vector<16x4xf32>
    %130 = arith.mulf %126, %119 : vector<16x1xf32>
    %131 = arith.subf %102, %130 : vector<16x1xf32>
    %132 = vector.extract_strided_slice %106 {offsets = [0, 1], sizes = [16, 1], strides = [1, 1]} : vector<16x4xf32> to vector<16x1xf32>
    %133 = vector.broadcast %132 : vector<16x1xf32> to vector<16x4xf32>
    %134 = arith.mulf %133, %118 : vector<16x4xf32>
    %135 = arith.subf %106, %134 : vector<16x4xf32>
    %136 = arith.mulf %132, %119 : vector<16x1xf32>
    %137 = arith.subf %108, %136 : vector<16x1xf32>
    %138 = vector.extract_strided_slice %129 {offsets = [0, 2], sizes = [16, 1], strides = [1, 1]} : vector<16x4xf32> to vector<16x1xf32>
    %cst_25 = arith.constant 9.99999968E-21 : f32
    %139 = vector.broadcast %cst_25 : f32 to vector<16x1xf32>
    %140 = arith.maximumf %138, %139 : vector<16x1xf32>
    %141 = tpu.reciprocal %140 {approx = true} : vector<16x1xf32> -> vector<16x1xf32>
    %142 = arith.mulf %140, %141 : vector<16x1xf32>
    %cst_26 = arith.constant 2.000000e+00 : f32
    %143 = vector.broadcast %cst_26 : f32 to vector<16x1xf32>
    %144 = arith.subf %143, %142 : vector<16x1xf32>
    %145 = arith.mulf %141, %144 : vector<16x1xf32>
    %146 = vector.broadcast %145 : vector<16x1xf32> to vector<16x4xf32>
    %147 = arith.mulf %129, %146 : vector<16x4xf32>
    %148 = arith.mulf %131, %145 : vector<16x1xf32>
    %149 = vector.extract_strided_slice %123 {offsets = [0, 2], sizes = [16, 1], strides = [1, 1]} : vector<16x4xf32> to vector<16x1xf32>
    %150 = vector.broadcast %149 : vector<16x1xf32> to vector<16x4xf32>
    %151 = arith.mulf %150, %147 : vector<16x4xf32>
    %152 = arith.subf %123, %151 : vector<16x4xf32>
    %153 = arith.mulf %149, %148 : vector<16x1xf32>
    %154 = arith.subf %125, %153 : vector<16x1xf32>
    %155 = vector.extract_strided_slice %118 {offsets = [0, 2], sizes = [16, 1], strides = [1, 1]} : vector<16x4xf32> to vector<16x1xf32>
    %156 = vector.broadcast %155 : vector<16x1xf32> to vector<16x4xf32>
    %157 = arith.mulf %156, %147 : vector<16x4xf32>
    %158 = arith.subf %118, %157 : vector<16x4xf32>
    %159 = arith.mulf %155, %148 : vector<16x1xf32>
    %160 = arith.subf %119, %159 : vector<16x1xf32>
    %161 = vector.extract_strided_slice %135 {offsets = [0, 2], sizes = [16, 1], strides = [1, 1]} : vector<16x4xf32> to vector<16x1xf32>
    %162 = vector.broadcast %161 : vector<16x1xf32> to vector<16x4xf32>
    %163 = arith.mulf %162, %147 : vector<16x4xf32>
    %164 = arith.subf %135, %163 : vector<16x4xf32>
    %165 = arith.mulf %161, %148 : vector<16x1xf32>
    %166 = arith.subf %137, %165 : vector<16x1xf32>
    %167 = vector.extract_strided_slice %164 {offsets = [0, 3], sizes = [16, 1], strides = [1, 1]} : vector<16x4xf32> to vector<16x1xf32>
    %cst_27 = arith.constant 9.99999968E-21 : f32
    %168 = vector.broadcast %cst_27 : f32 to vector<16x1xf32>
    %169 = arith.maximumf %167, %168 : vector<16x1xf32>
    %170 = tpu.reciprocal %169 {approx = true} : vector<16x1xf32> -> vector<16x1xf32>
    %171 = arith.mulf %169, %170 : vector<16x1xf32>
    %cst_28 = arith.constant 2.000000e+00 : f32
    %172 = vector.broadcast %cst_28 : f32 to vector<16x1xf32>
    %173 = arith.subf %172, %171 : vector<16x1xf32>
    %174 = arith.mulf %170, %173 : vector<16x1xf32>
    %175 = arith.mulf %166, %174 : vector<16x1xf32>
    %176 = vector.extract_strided_slice %152 {offsets = [0, 3], sizes = [16, 1], strides = [1, 1]} : vector<16x4xf32> to vector<16x1xf32>
    %177 = arith.mulf %176, %175 : vector<16x1xf32>
    %178 = arith.subf %154, %177 : vector<16x1xf32>
    %179 = vector.extract_strided_slice %158 {offsets = [0, 3], sizes = [16, 1], strides = [1, 1]} : vector<16x4xf32> to vector<16x1xf32>
    %180 = arith.mulf %179, %175 : vector<16x1xf32>
    %181 = arith.subf %160, %180 : vector<16x1xf32>
    %182 = vector.extract_strided_slice %147 {offsets = [0, 3], sizes = [16, 1], strides = [1, 1]} : vector<16x4xf32> to vector<16x1xf32>
    %183 = arith.mulf %182, %175 : vector<16x1xf32>
    %184 = arith.subf %148, %183 : vector<16x1xf32>
    %185 = vector.broadcast %178 : vector<16x1xf32> to vector<16x4xf32>
    %186 = vector.broadcast %4 : vector<1x4xf32> to vector<16x4xf32>
    %187 = arith.mulf %185, %186 : vector<16x4xf32>
    %188 = vector.broadcast %181 : vector<16x1xf32> to vector<16x4xf32>
    %189 = vector.broadcast %8 : vector<1x4xf32> to vector<16x4xf32>
    %190 = arith.mulf %188, %189 : vector<16x4xf32>
    %191 = arith.addf %187, %190 : vector<16x4xf32>
    %192 = vector.broadcast %184 : vector<16x1xf32> to vector<16x4xf32>
    %193 = vector.broadcast %12 : vector<1x4xf32> to vector<16x4xf32>
    %194 = arith.mulf %192, %193 : vector<16x4xf32>
    %195 = arith.addf %191, %194 : vector<16x4xf32>
    %196 = vector.broadcast %175 : vector<16x1xf32> to vector<16x4xf32>
    %197 = vector.broadcast %16 : vector<1x4xf32> to vector<16x4xf32>
    %198 = arith.mulf %196, %197 : vector<16x4xf32>
    %199 = arith.addf %195, %198 : vector<16x4xf32>
    %200 = arith.subf %199, %20 : vector<16x4xf32>
    %201 = vector.broadcast %36 : f32 to vector<16x4xf32>
    %202 = arith.mulf %201, %200 : vector<16x4xf32>
    %203 = arith.addf %20, %202 : vector<16x4xf32>
    %204 = tpu.transpose %42, [1, 0] : vector<16x16xf32> -> vector<16x16xf32>
    %cst_29 = arith.constant dense<0.000000e+00> : vector<16x4xf32>
    %205 = tpu.matmul %204, %203, %cst_29 {dimension_numbers = #tpu.dot_dimension_numbers<[1], [0], [0], [1], [0, 0, 1, 1], [], []>, precision = #tpu.contract_precision<fp32>} : vector<16x16xf32>, vector<16x4xf32>, vector<16x4xf32> -> vector<16x4xf32>
    %206 = vector.extract_strided_slice %203 {offsets = [0, 0], sizes = [16, 1], strides = [1, 1]} : vector<16x4xf32> to vector<16x1xf32>
    %207 = vector.broadcast %206 : vector<16x1xf32> to vector<16x4xf32>
    %208 = arith.mulf %203, %207 : vector<16x4xf32>
    %cst_30 = arith.constant dense<0.000000e+00> : vector<16x4xf32>
    %209 = tpu.matmul %23, %208, %cst_30 {dimension_numbers = #tpu.dot_dimension_numbers<[1], [0], [0], [1], [0, 0, 1, 1], [], []>, precision = #tpu.contract_precision<fp32>} : vector<16x16xf32>, vector<16x4xf32>, vector<16x4xf32> -> vector<16x4xf32>
    %210 = vector.broadcast %34 : f32 to vector<1x4xf32>
    %211 = arith.mulf %210, %4 : vector<1x4xf32>
    %212 = vector.broadcast %211 : vector<1x4xf32> to vector<16x4xf32>
    %213 = arith.addf %209, %212 : vector<16x4xf32>
    %214 = vector.extract_strided_slice %203 {offsets = [0, 1], sizes = [16, 1], strides = [1, 1]} : vector<16x4xf32> to vector<16x1xf32>
    %215 = vector.broadcast %214 : vector<16x1xf32> to vector<16x4xf32>
    %216 = arith.mulf %203, %215 : vector<16x4xf32>
    %cst_31 = arith.constant dense<0.000000e+00> : vector<16x4xf32>
    %217 = tpu.matmul %23, %216, %cst_31 {dimension_numbers = #tpu.dot_dimension_numbers<[1], [0], [0], [1], [0, 0, 1, 1], [], []>, precision = #tpu.contract_precision<fp32>} : vector<16x16xf32>, vector<16x4xf32>, vector<16x4xf32> -> vector<16x4xf32>
    %218 = vector.broadcast %34 : f32 to vector<1x4xf32>
    %219 = arith.mulf %218, %8 : vector<1x4xf32>
    %220 = vector.broadcast %219 : vector<1x4xf32> to vector<16x4xf32>
    %221 = arith.addf %217, %220 : vector<16x4xf32>
    %222 = vector.extract_strided_slice %203 {offsets = [0, 2], sizes = [16, 1], strides = [1, 1]} : vector<16x4xf32> to vector<16x1xf32>
    %223 = vector.broadcast %222 : vector<16x1xf32> to vector<16x4xf32>
    %224 = arith.mulf %203, %223 : vector<16x4xf32>
    %cst_32 = arith.constant dense<0.000000e+00> : vector<16x4xf32>
    %225 = tpu.matmul %23, %224, %cst_32 {dimension_numbers = #tpu.dot_dimension_numbers<[1], [0], [0], [1], [0, 0, 1, 1], [], []>, precision = #tpu.contract_precision<fp32>} : vector<16x16xf32>, vector<16x4xf32>, vector<16x4xf32> -> vector<16x4xf32>
    %226 = vector.broadcast %34 : f32 to vector<1x4xf32>
    %227 = arith.mulf %226, %12 : vector<1x4xf32>
    %228 = vector.broadcast %227 : vector<1x4xf32> to vector<16x4xf32>
    %229 = arith.addf %225, %228 : vector<16x4xf32>
    %230 = vector.extract_strided_slice %203 {offsets = [0, 3], sizes = [16, 1], strides = [1, 1]} : vector<16x4xf32> to vector<16x1xf32>
    %231 = vector.broadcast %230 : vector<16x1xf32> to vector<16x4xf32>
    %232 = arith.mulf %203, %231 : vector<16x4xf32>
    %cst_33 = arith.constant dense<0.000000e+00> : vector<16x4xf32>
    %233 = tpu.matmul %23, %232, %cst_33 {dimension_numbers = #tpu.dot_dimension_numbers<[1], [0], [0], [1], [0, 0, 1, 1], [], []>, precision = #tpu.contract_precision<fp32>} : vector<16x16xf32>, vector<16x4xf32>, vector<16x4xf32> -> vector<16x4xf32>
    %234 = vector.broadcast %34 : f32 to vector<1x4xf32>
    %235 = arith.mulf %234, %16 : vector<1x4xf32>
    %236 = vector.broadcast %235 : vector<1x4xf32> to vector<16x4xf32>
    %237 = arith.addf %233, %236 : vector<16x4xf32>
    %238 = vector.extract_strided_slice %205 {offsets = [0, 0], sizes = [16, 1], strides = [1, 1]} : vector<16x4xf32> to vector<16x1xf32>
    %239 = vector.extract_strided_slice %205 {offsets = [0, 1], sizes = [16, 1], strides = [1, 1]} : vector<16x4xf32> to vector<16x1xf32>
    %240 = vector.extract_strided_slice %205 {offsets = [0, 2], sizes = [16, 1], strides = [1, 1]} : vector<16x4xf32> to vector<16x1xf32>
    %241 = vector.extract_strided_slice %205 {offsets = [0, 3], sizes = [16, 1], strides = [1, 1]} : vector<16x4xf32> to vector<16x1xf32>
    %242 = vector.extract_strided_slice %213 {offsets = [0, 0], sizes = [16, 1], strides = [1, 1]} : vector<16x4xf32> to vector<16x1xf32>
    %cst_34 = arith.constant 9.99999968E-21 : f32
    %243 = vector.broadcast %cst_34 : f32 to vector<16x1xf32>
    %244 = arith.maximumf %242, %243 : vector<16x1xf32>
    %245 = tpu.reciprocal %244 {approx = true} : vector<16x1xf32> -> vector<16x1xf32>
    %246 = arith.mulf %244, %245 : vector<16x1xf32>
    %cst_35 = arith.constant 2.000000e+00 : f32
    %247 = vector.broadcast %cst_35 : f32 to vector<16x1xf32>
    %248 = arith.subf %247, %246 : vector<16x1xf32>
    %249 = arith.mulf %245, %248 : vector<16x1xf32>
    %250 = vector.broadcast %249 : vector<16x1xf32> to vector<16x4xf32>
    %251 = arith.mulf %213, %250 : vector<16x4xf32>
    %252 = arith.mulf %238, %249 : vector<16x1xf32>
    %253 = vector.extract_strided_slice %221 {offsets = [0, 0], sizes = [16, 1], strides = [1, 1]} : vector<16x4xf32> to vector<16x1xf32>
    %254 = vector.broadcast %253 : vector<16x1xf32> to vector<16x4xf32>
    %255 = arith.mulf %254, %251 : vector<16x4xf32>
    %256 = arith.subf %221, %255 : vector<16x4xf32>
    %257 = arith.mulf %253, %252 : vector<16x1xf32>
    %258 = arith.subf %239, %257 : vector<16x1xf32>
    %259 = vector.extract_strided_slice %229 {offsets = [0, 0], sizes = [16, 1], strides = [1, 1]} : vector<16x4xf32> to vector<16x1xf32>
    %260 = vector.broadcast %259 : vector<16x1xf32> to vector<16x4xf32>
    %261 = arith.mulf %260, %251 : vector<16x4xf32>
    %262 = arith.subf %229, %261 : vector<16x4xf32>
    %263 = arith.mulf %259, %252 : vector<16x1xf32>
    %264 = arith.subf %240, %263 : vector<16x1xf32>
    %265 = vector.extract_strided_slice %237 {offsets = [0, 0], sizes = [16, 1], strides = [1, 1]} : vector<16x4xf32> to vector<16x1xf32>
    %266 = vector.broadcast %265 : vector<16x1xf32> to vector<16x4xf32>
    %267 = arith.mulf %266, %251 : vector<16x4xf32>
    %268 = arith.subf %237, %267 : vector<16x4xf32>
    %269 = arith.mulf %265, %252 : vector<16x1xf32>
    %270 = arith.subf %241, %269 : vector<16x1xf32>
    %271 = vector.extract_strided_slice %256 {offsets = [0, 1], sizes = [16, 1], strides = [1, 1]} : vector<16x4xf32> to vector<16x1xf32>
    %cst_36 = arith.constant 9.99999968E-21 : f32
    %272 = vector.broadcast %cst_36 : f32 to vector<16x1xf32>
    %273 = arith.maximumf %271, %272 : vector<16x1xf32>
    %274 = tpu.reciprocal %273 {approx = true} : vector<16x1xf32> -> vector<16x1xf32>
    %275 = arith.mulf %273, %274 : vector<16x1xf32>
    %cst_37 = arith.constant 2.000000e+00 : f32
    %276 = vector.broadcast %cst_37 : f32 to vector<16x1xf32>
    %277 = arith.subf %276, %275 : vector<16x1xf32>
    %278 = arith.mulf %274, %277 : vector<16x1xf32>
    %279 = vector.broadcast %278 : vector<16x1xf32> to vector<16x4xf32>
    %280 = arith.mulf %256, %279 : vector<16x4xf32>
    %281 = arith.mulf %258, %278 : vector<16x1xf32>
    %282 = vector.extract_strided_slice %251 {offsets = [0, 1], sizes = [16, 1], strides = [1, 1]} : vector<16x4xf32> to vector<16x1xf32>
    %283 = vector.broadcast %282 : vector<16x1xf32> to vector<16x4xf32>
    %284 = arith.mulf %283, %280 : vector<16x4xf32>
    %285 = arith.subf %251, %284 : vector<16x4xf32>
    %286 = arith.mulf %282, %281 : vector<16x1xf32>
    %287 = arith.subf %252, %286 : vector<16x1xf32>
    %288 = vector.extract_strided_slice %262 {offsets = [0, 1], sizes = [16, 1], strides = [1, 1]} : vector<16x4xf32> to vector<16x1xf32>
    %289 = vector.broadcast %288 : vector<16x1xf32> to vector<16x4xf32>
    %290 = arith.mulf %289, %280 : vector<16x4xf32>
    %291 = arith.subf %262, %290 : vector<16x4xf32>
    %292 = arith.mulf %288, %281 : vector<16x1xf32>
    %293 = arith.subf %264, %292 : vector<16x1xf32>
    %294 = vector.extract_strided_slice %268 {offsets = [0, 1], sizes = [16, 1], strides = [1, 1]} : vector<16x4xf32> to vector<16x1xf32>
    %295 = vector.broadcast %294 : vector<16x1xf32> to vector<16x4xf32>
    %296 = arith.mulf %295, %280 : vector<16x4xf32>
    %297 = arith.subf %268, %296 : vector<16x4xf32>
    %298 = arith.mulf %294, %281 : vector<16x1xf32>
    %299 = arith.subf %270, %298 : vector<16x1xf32>
    %300 = vector.extract_strided_slice %291 {offsets = [0, 2], sizes = [16, 1], strides = [1, 1]} : vector<16x4xf32> to vector<16x1xf32>
    %cst_38 = arith.constant 9.99999968E-21 : f32
    %301 = vector.broadcast %cst_38 : f32 to vector<16x1xf32>
    %302 = arith.maximumf %300, %301 : vector<16x1xf32>
    %303 = tpu.reciprocal %302 {approx = true} : vector<16x1xf32> -> vector<16x1xf32>
    %304 = arith.mulf %302, %303 : vector<16x1xf32>
    %cst_39 = arith.constant 2.000000e+00 : f32
    %305 = vector.broadcast %cst_39 : f32 to vector<16x1xf32>
    %306 = arith.subf %305, %304 : vector<16x1xf32>
    %307 = arith.mulf %303, %306 : vector<16x1xf32>
    %308 = vector.broadcast %307 : vector<16x1xf32> to vector<16x4xf32>
    %309 = arith.mulf %291, %308 : vector<16x4xf32>
    %310 = arith.mulf %293, %307 : vector<16x1xf32>
    %311 = vector.extract_strided_slice %285 {offsets = [0, 2], sizes = [16, 1], strides = [1, 1]} : vector<16x4xf32> to vector<16x1xf32>
    %312 = vector.broadcast %311 : vector<16x1xf32> to vector<16x4xf32>
    %313 = arith.mulf %312, %309 : vector<16x4xf32>
    %314 = arith.subf %285, %313 : vector<16x4xf32>
    %315 = arith.mulf %311, %310 : vector<16x1xf32>
    %316 = arith.subf %287, %315 : vector<16x1xf32>
    %317 = vector.extract_strided_slice %280 {offsets = [0, 2], sizes = [16, 1], strides = [1, 1]} : vector<16x4xf32> to vector<16x1xf32>
    %318 = vector.broadcast %317 : vector<16x1xf32> to vector<16x4xf32>
    %319 = arith.mulf %318, %309 : vector<16x4xf32>
    %320 = arith.subf %280, %319 : vector<16x4xf32>
    %321 = arith.mulf %317, %310 : vector<16x1xf32>
    %322 = arith.subf %281, %321 : vector<16x1xf32>
    %323 = vector.extract_strided_slice %297 {offsets = [0, 2], sizes = [16, 1], strides = [1, 1]} : vector<16x4xf32> to vector<16x1xf32>
    %324 = vector.broadcast %323 : vector<16x1xf32> to vector<16x4xf32>
    %325 = arith.mulf %324, %309 : vector<16x4xf32>
    %326 = arith.subf %297, %325 : vector<16x4xf32>
    %327 = arith.mulf %323, %310 : vector<16x1xf32>
    %328 = arith.subf %299, %327 : vector<16x1xf32>
    %329 = vector.extract_strided_slice %326 {offsets = [0, 3], sizes = [16, 1], strides = [1, 1]} : vector<16x4xf32> to vector<16x1xf32>
    %cst_40 = arith.constant 9.99999968E-21 : f32
    %330 = vector.broadcast %cst_40 : f32 to vector<16x1xf32>
    %331 = arith.maximumf %329, %330 : vector<16x1xf32>
    %332 = tpu.reciprocal %331 {approx = true} : vector<16x1xf32> -> vector<16x1xf32>
    %333 = arith.mulf %331, %332 : vector<16x1xf32>
    %cst_41 = arith.constant 2.000000e+00 : f32
    %334 = vector.broadcast %cst_41 : f32 to vector<16x1xf32>
    %335 = arith.subf %334, %333 : vector<16x1xf32>
    %336 = arith.mulf %332, %335 : vector<16x1xf32>
    %337 = arith.mulf %328, %336 : vector<16x1xf32>
    %338 = vector.extract_strided_slice %314 {offsets = [0, 3], sizes = [16, 1], strides = [1, 1]} : vector<16x4xf32> to vector<16x1xf32>
    %339 = arith.mulf %338, %337 : vector<16x1xf32>
    %340 = arith.subf %316, %339 : vector<16x1xf32>
    %341 = vector.extract_strided_slice %320 {offsets = [0, 3], sizes = [16, 1], strides = [1, 1]} : vector<16x4xf32> to vector<16x1xf32>
    %342 = arith.mulf %341, %337 : vector<16x1xf32>
    %343 = arith.subf %322, %342 : vector<16x1xf32>
    %344 = vector.extract_strided_slice %309 {offsets = [0, 3], sizes = [16, 1], strides = [1, 1]} : vector<16x4xf32> to vector<16x1xf32>
    %345 = arith.mulf %344, %337 : vector<16x1xf32>
    %346 = arith.subf %310, %345 : vector<16x1xf32>
    %347 = vector.broadcast %340 : vector<16x1xf32> to vector<16x4xf32>
    %348 = vector.broadcast %4 : vector<1x4xf32> to vector<16x4xf32>
    %349 = arith.mulf %347, %348 : vector<16x4xf32>
    %350 = vector.broadcast %343 : vector<16x1xf32> to vector<16x4xf32>
    %351 = vector.broadcast %8 : vector<1x4xf32> to vector<16x4xf32>
    %352 = arith.mulf %350, %351 : vector<16x4xf32>
    %353 = arith.addf %349, %352 : vector<16x4xf32>
    %354 = vector.broadcast %346 : vector<16x1xf32> to vector<16x4xf32>
    %355 = vector.broadcast %12 : vector<1x4xf32> to vector<16x4xf32>
    %356 = arith.mulf %354, %355 : vector<16x4xf32>
    %357 = arith.addf %353, %356 : vector<16x4xf32>
    %358 = vector.broadcast %337 : vector<16x1xf32> to vector<16x4xf32>
    %359 = vector.broadcast %16 : vector<1x4xf32> to vector<16x4xf32>
    %360 = arith.mulf %358, %359 : vector<16x4xf32>
    %361 = arith.addf %357, %360 : vector<16x4xf32>
    %362 = arith.subf %361, %21 : vector<16x4xf32>
    %363 = vector.broadcast %37 : f32 to vector<16x4xf32>
    %364 = arith.mulf %363, %362 : vector<16x4xf32>
    %365 = arith.addf %21, %364 : vector<16x4xf32>
    %cst_42 = arith.constant dense<0.000000e+00> : vector<16x16xf32>
    %366 = tpu.matmul %203, %365, %cst_42 {dimension_numbers = #tpu.dot_dimension_numbers<[1], [1], [0], [0], [0, 0, 1, 0], [], []>, precision = #tpu.contract_precision<fp32>} : vector<16x4xf32>, vector<16x4xf32>, vector<16x16xf32> -> vector<16x16xf32>
    %367 = arith.mulf %19, %366 : vector<16x16xf32>
    %368 = arith.subf %42, %367 : vector<16x16xf32>
    %cst_43 = arith.constant dense<0.000000e+00> : vector<8x16xf32>
    %369 = tpu.matmul %24, %368, %cst_43 {dimension_numbers = #tpu.dot_dimension_numbers<[1], [0], [0], [1], [0, 0, 1, 1], [], []>, precision = #tpu.contract_precision<fp32>} : vector<8x16xf32>, vector<16x16xf32>, vector<8x16xf32> -> vector<8x16xf32>
    %370 = arith.mulf %22, %26 : vector<8x16xf32>
    %371 = arith.addf %370, %369 : vector<8x16xf32>
    %372 = vector.broadcast %35 : f32 to vector<8x16xf32>
    %373 = arith.subf %371, %372 : vector<8x16xf32>
    %cst_44 = arith.constant 0.000000e+00 : f32
    %374 = vector.broadcast %cst_44 : f32 to vector<8x16xf32>
    %375 = arith.maximumf %373, %374 : vector<8x16xf32>
    %cst_45 = arith.constant 0.000000e+00 : f32
    %376 = vector.broadcast %cst_45 : f32 to vector<8x16xf32>
    %377 = arith.subf %376, %371 : vector<8x16xf32>
    %378 = vector.broadcast %35 : f32 to vector<8x16xf32>
    %379 = arith.subf %377, %378 : vector<8x16xf32>
    %cst_46 = arith.constant 0.000000e+00 : f32
    %380 = vector.broadcast %cst_46 : f32 to vector<8x16xf32>
    %381 = arith.maximumf %379, %380 : vector<8x16xf32>
    %382 = arith.subf %375, %381 : vector<8x16xf32>
    %383 = arith.mulf %382, %32 : vector<8x16xf32>
    %cst_47 = arith.constant 0.000000e+00 : f32
    %384 = vector.broadcast %cst_47 : f32 to vector<8x16xf32>
    %385 = arith.select %28, %383, %384 : vector<8x16xi1>, vector<8x16xf32>
    %386 = arith.subf %385, %22 : vector<8x16xf32>
    %cst_48 = arith.constant dense<0.000000e+00> : vector<16x16xf32>
    %387 = tpu.matmul %18, %386, %cst_48 {dimension_numbers = #tpu.dot_dimension_numbers<[1], [0], [0], [1], [0, 0, 1, 1], [], []>, precision = #tpu.contract_precision<fp32>} : vector<16x8xf32>, vector<8x16xf32>, vector<16x16xf32> -> vector<16x16xf32>
    %388 = arith.mulf %19, %387 : vector<16x16xf32>
    %389 = arith.mulf %368, %388 : vector<16x16xf32>
    %390 = vector.shape_cast %389 : vector<16x16xf32> to vector<1x16x16xf32>
    %cst_49 = arith.constant dense<0.000000e+00> : vector<1xf32>
    %391 = vector.multi_reduction <add>, %390, %cst_49 [1, 2] : vector<1x16x16xf32> to vector<1xf32>
    %392 = vector.shape_cast %391 : vector<1xf32> to vector<1x1x1xf32>
    %393 = vector.extract %392[0, 0, 0] : f32 from vector<1x1x1xf32>
    %394 = vector.broadcast %393 : f32 to vector<1x1xf32>
    %395 = math.absf %385 : vector<8x16xf32>
    %396 = math.absf %22 : vector<8x16xf32>
    %397 = arith.subf %395, %396 : vector<8x16xf32>
    %398 = vector.shape_cast %397 : vector<8x16xf32> to vector<1x8x16xf32>
    %cst_50 = arith.constant dense<0.000000e+00> : vector<1xf32>
    %399 = vector.multi_reduction <add>, %398, %cst_50 [1, 2] : vector<1x8x16xf32> to vector<1xf32>
    %400 = vector.shape_cast %399 : vector<1xf32> to vector<1x1x1xf32>
    %401 = vector.extract %400[0, 0, 0] : f32 from vector<1x1x1xf32>
    %402 = vector.broadcast %401 : f32 to vector<1x1xf32>
    %403 = vector.broadcast %35 : f32 to vector<1x1xf32>
    %404 = arith.mulf %403, %402 : vector<1x1xf32>
    %405 = arith.subf %394, %404 : vector<1x1xf32>
    %406 = arith.mulf %388, %388 : vector<16x16xf32>
    %407 = vector.shape_cast %406 : vector<16x16xf32> to vector<1x16x16xf32>
    %cst_51 = arith.constant dense<0.000000e+00> : vector<1xf32>
    %408 = vector.multi_reduction <add>, %407, %cst_51 [1, 2] : vector<1x16x16xf32> to vector<1xf32>
    %409 = vector.shape_cast %408 : vector<1xf32> to vector<1x1x1xf32>
    %410 = vector.extract %409[0, 0, 0] : f32 from vector<1x1x1xf32>
    %411 = vector.broadcast %410 : f32 to vector<1x1xf32>
    %cst_52 = arith.constant 0.000000e+00 : f32
    %412 = vector.broadcast %cst_52 : f32 to vector<1x1xf32>
    %413 = arith.cmpf ogt, %411, %412 : vector<1x1xf32>
    %cst_53 = arith.constant 1.000000e-30 : f32
    %414 = vector.broadcast %cst_53 : f32 to vector<1x1xf32>
    %415 = arith.maximumf %411, %414 : vector<1x1xf32>
    %416 = arith.divf %405, %415 : vector<1x1xf32>
    %cst_54 = arith.constant 0.000000e+00 : f32
    %cst_55 = arith.constant 1.000000e+00 : f32
    %417 = vector.broadcast %cst_54 : f32 to vector<1x1xf32>
    %418 = arith.maximumf %417, %416 : vector<1x1xf32>
    %419 = vector.broadcast %cst_55 : f32 to vector<1x1xf32>
    %420 = arith.minimumf %419, %418 : vector<1x1xf32>
    %cst_56 = arith.constant 0.000000e+00 : f32
    %421 = vector.broadcast %cst_56 : f32 to vector<1x1xf32>
    %422 = arith.select %413, %420, %421 : vector<1x1xi1>, vector<1x1xf32>
    %423 = vector.broadcast %422 : vector<1x1xf32> to vector<8x16xf32>
    %424 = arith.mulf %423, %386 : vector<8x16xf32>
    %425 = arith.addf %22, %424 : vector<8x16xf32>
    %cst_57 = arith.constant 5.000000e-01 : f32
    %426 = arith.cmpf ogt, %39, %cst_57 : f32
    %427 = arith.select %426, %425, %22 : vector<8x16xf32>
    %428 = arith.subf %427, %22 : vector<8x16xf32>
    %429 = vector.broadcast %38 : f32 to vector<8x16xf32>
    %430 = arith.mulf %429, %428 : vector<8x16xf32>
    %431 = arith.addf %22, %430 : vector<8x16xf32>
    %c0_58 = arith.constant 0 : index
    %c0_59 = arith.constant 0 : index
    %432 = vector.load %arg7[%c0_58, %c0_59] : memref<16x4xf32, #tpu.memory_space<vmem>>, vector<16x4xf32>
    tpu.vector_store %arg7[%c0_58, %c0_59], %203 {strides = array<i32>} : memref<16x4xf32, #tpu.memory_space<vmem>>, vector<16x4xf32>,
    %c0_60 = arith.constant 0 : index
    %c0_61 = arith.constant 0 : index
    %433 = vector.load %arg8[%c0_60, %c0_61] : memref<16x4xf32, #tpu.memory_space<vmem>>, vector<16x4xf32>
    tpu.vector_store %arg8[%c0_60, %c0_61], %365 {strides = array<i32>} : memref<16x4xf32, #tpu.memory_space<vmem>>, vector<16x4xf32>,
    %c0_62 = arith.constant 0 : index
    %c0_63 = arith.constant 0 : index
    %434 = vector.load %arg9[%c0_62, %c0_63] : memref<8x16xf32, #tpu.memory_space<vmem>>, vector<8x16xf32>
    tpu.vector_store %arg9[%c0_62, %c0_63], %431 {strides = array<i32>} : memref<8x16xf32, #tpu.memory_space<vmem>>, vector<8x16xf32>,
    return
  }
}

</mosaic_0001>

<bundles_post_ra>
// kernel: tpu_custom_call.1
= control target key start
LH: loop header
LB: loop body
LE: loop exit
PB: predicated region body
PF: predicated region fallthrough
CT: control target
= control target key end

     0   :  { %15 = vsyncpa [#allocation3], 0  ;;  %s11212_s0 = inlined_call_operand.vmem [shape: f32[7], index: 0, kind: input, shape index: {}]   ;;  %s11213_s1 = inlined_call_operand.vmem [shape: f32[16,16], index: 1, kind: input, shape index: {}]   ;;  %s11214_s2 = inlined_call_operand.vmem [shape: f32[16,8], index: 2, kind: input, shape index: {}]   ;;  %s11215_s3 = inlined_call_operand.vmem [shape: f32[16,16], index: 3, kind: input, shape index: {}]   ;;  %s11216_s4 = inlined_call_operand.vmem [shape: f32[16,4], index: 4, kind: input, shape index: {}, may-alias: {4,7}]   ;;  %s11217_s5 = inlined_call_operand.vmem [shape: f32[16,4], index: 5, kind: input, shape index: {}, may-alias: {5,8}]   ;;  %s11218_s6 = inlined_call_operand.vmem [shape: f32[8,16], index: 6, kind: input, shape index: {}, may-alias: {6,9}]   ;;  %s11219_s7 = inlined_call_operand.vmem [shape: f32[16,4], index: 7, kind: output, shape index: {0}, may-alias: {4,7}]   ;;  %s11220_s8 = inlined_call_operand.vmem [shape: f32[16,4], index: 8, kind: output, shape index: {1}, may-alias: {5,8}]   ;;  %s11221_s9 = inlined_call_operand.vmem [shape: f32[8,16], index: 9, kind: output, shape index: {2}, may-alias: {6,9}]  }
   0x1   :  { %s22_s11 = sshll.u32 %s11212_s0, 4  ;;  %s23_s11 = int_to_ptr.vmem [resolvable:$true] %s22_s11 }
   0x2   :  { %s10181_s12 = scalar_lea.vmem %s23_s11, 16  ;;  %p10186_p1 = scmp.lt.s32.totalorder %s23_s11, %s23_s11 }
   0x3   :  { %p10182_p0 = scmp.ne.s32.totalorder %s23_s11, %s10181_s12  ;;  %p10187_p2 = scmp.lt.s32.totalorder %s10181_s12, %s10181_s12 }
   0x5   :  { %p10188_p3 = por %p10187_p2, %p10186_p1 }
   0x7   :  { %p10189_p4 = pnand %p10188_p3, %p10182_p0 }
   0x9   :  { %10192 = shalt.err (!%p10189_p4)
}
   0xa   :  { %s10195_s13 = smov [#allocation2]  }
   0xb   :  { %25 = dma.vmem_to_smem %s23_s11, 16, %s10195_s13, [#allocation3]  }
   0xc   :  { %10193 = dma.done.wait [#allocation3], 16  }
   0xd   :  { %10194 = vsyncadd [#allocation3], 4294967280 }
   0xe   :  { %41 = sfence }
   0xf   :  { %v58_v0 = vld [vmem:[%s11214_s2] sm:$0xff]  ;;  %vm606_vm0 = vcmask 64512   ;;  %v59_v1 = vld [vmem:[%s11214_s2 + $0x8] sm:$0xff]  ;;  %v11230_v6 = vmov 0   ;;  %v11224_v22 = vmov 0.0|0.0   ;;  %v11229_v28 = vmov 1  }
  0x10   :  { %v66_v2 = vld [vmem:[%s11218_s6] sm:$0xff]  ;;  %99 = vxpose.xlu0.b32.start [1/2] (short) (narrow) %v58_v0, 8  ;;  %v608_v3 = vsel %vm606_vm0, %v58_v0, 0  ;;  %v611_v4 = vsel %vm606_vm0, %v59_v1, 0  ;;  %10098 = vset.pattern.permute.xlu1 %v11230_v6  ;;  %v10289_v11 = vld [vmem:[%s11217_s5 + $0x8] sm:$0xff]  ;;  %vm10199_vm1 = vmmov 0  }
  0x11   :  { %v10271_v5 = vand.u32 4294901760, %v66_v2  ;;  %v10277_v7 = vld [vmem:[%s11217_s5] sm:$0xff]  ;;  %v10279_v8 = vand.u32 4294901760, %v608_v3  ;;  %v10281_v9 = vand.u32 4294901760, %v611_v4  ;;  %v10313_v19 = vld [vmem:[%s11215_s3 + $0x8] sm:$0xff]  ;;  %9622 = vmatprep.subr.bf16.mxu0 %v11224_v22  ;;  %v11222_v31 = vmov 0.0  }
  0x12   :  { %1616 = vperm.xlu1 %10098, %v10277_v7   ;;  %v10308_v18 = vld [vmem:[%s11215_s3] sm:$0xff]  ;;  %v140_v24 = vand.u32 4294901760, %v10313_v19  ;;  %9020 = vmatprep.mubr.msk.f32.mxu0 %vm10199_vm1, %v11222_v31  ;;  %v10201_v36 = vmov 2   ;;  %v11227_v43 = vmov 3   ;;  %vm132_vm2 = vcmask 130048   ;;  %s10203_s30 = smov 1  }
  0x13   :  { %9058 = vmatprep.subr.mxu1 %v10271_v5  ;;  %v701_v10 = vsub.f32 %v66_v2, %v10271_v5  ;;  %v10292_v12 = vsub.f32 %v608_v3, %v10279_v8  ;;  %v10295_v13 = vsub.f32 %v611_v4, %v10281_v9  ;;  %v137_v23 = vand.u32 4294901760, %v10308_v18  ;;  %s10204_s10 = smov 2   ;;  %s10205_s11 = smov 3  }
  0x14   :  { %9059 = vmatpush3.msra.mxu1 %v10271_v5  ;;  %100 = vxpose.xlu0.b32.end [2/2] (short) (narrow) %v59_v1, 8  ;;  %v10336_v32 = vsub.f32 %v10313_v19, %v140_v24  ;;  %v1113_v52 = vand.u32 4294901760, %v10277_v7  ;;  %v1116_v53 = vand.u32 4294901760, %v10289_v11  ;;  %s10206_s12 = smov 127   ;;  %s10207_s13 = smov 126   ;;  %vm7106_vm7 = vcmask 31744  }
  0x15   :  { %v702_v14 = vand.u32 4294901760, %v701_v10  ;;  %v10299_v15 = vand.u32 4294901760, %v10292_v12  ;;  %v10302_v16 = vand.u32 4294901760, %v10295_v13  ;;  %v10327_v29 = vpack.c.bf16 %v140_v24, %v137_v23  ;;  %s10208_s14 = smov 125   ;;  %s8676_s15 = sld [smem:[#allocation2 + $0x3]] }
  0x16   :  { %1621 = vperm.xlu1 %10098, %v10289_v11   ;;  %v10330_v30 = vsub.f32 %v10308_v18, %v137_v23  ;;  %v223_v34 = vand.u32 4294901760, %v10336_v32  ;;  %v10385_v54 = vpack.c.bf16 %v1116_v53, %v1113_v52  ;;  %v1201_v56 = vsub.f32 %v10277_v7, %v1113_v52  ;;  %s8674_s24 = sld [smem:[#allocation2 + $0x1]]  ;;  %s8677_s25 = sld [smem:[#allocation2 + $0x4]] }
  0x17   :  { %v703_v17 = vsub.f32 %v701_v10, %v702_v14  ;;  %v682_v20 = vsub.f32 %v10292_v12, %v10299_v15  ;;  %v692_v21 = vsub.f32 %v10295_v13, %v10302_v16  ;;  %9624 = vmatpush3.bf16.msra.mxu0 %v10327_v29  ;;  %v1208_v57 = vsub.f32 %v10289_v11, %v1116_v53  ;;  %s8679_s17 = sld [smem:[#allocation2 + $0x6]]  ;;  %s8678_s19 = sld [smem:[#allocation2 + $0x5]] }
  0x18   :  { %v216_v33 = vand.u32 4294901760, %v10330_v30  ;;  %9625 = vmatprep.subr.bf16.mxu0 %v11224_v22  ;;  %v224_v37 = vsub.f32 %v10336_v32, %v223_v34  ;;  %v9629_v41 = vpack.c.bf16 %v10336_v32, %v10330_v30  ;;  %v1202_v58 = vand.u32 4294901760, %v1201_v56 }
  0x19   :  { %v704_v25 = vand.u32 4294901760, %v703_v17  ;;  %v10322_v26 = vand.u32 4294901760, %v682_v20  ;;  %v10324_v27 = vand.u32 4294901760, %v692_v21  ;;  %v1209_v59 = vand.u32 4294901760, %v1208_v57 }
  0x1a   :  { %10100 = vset.pattern.permute.xlu1 %v11229_v28  ;;  %v217_v35 = vsub.f32 %v10330_v30, %v216_v33  ;;  %v225_v39 = vand.u32 4294901760, %v224_v37  ;;  %v9635_v42 = vpack.c.bf16 %v223_v34, %v216_v33  ;;  %v1203_v60 = vsub.f32 %v1201_v56, %v1202_v58 }
  0x1b   :  { %9063 = vmatprep.subr.mxu1 %v704_v25  ;;  %2141 = vperm.xlu1 %10100, %v10289_v11   ;;  %v1210_v61 = vsub.f32 %v1208_v57, %v1209_v59  ;;  %v1632_v20 = vsel %vm132_vm2, %v10313_v19, 0 }
  0x1c   :  { %9060 = vmatprep.mubr.f32.mxu1 %v10322_v26  ;;  %v218_v38 = vand.u32 4294901760, %v217_v35  ;;  %v1204_v63 = vand.u32 4294901760, %v1203_v60  ;;  %v10412_v24 = vand.u32 4294901760, %v1632_v20 }
  0x1d   :  { %9061 = vmatmul.mubr.f32.vlgmr.msra.gmra.mrb[0].mxu1 %v10324_v27  ;;  %v1211_v0 = vand.u32 4294901760, %v1210_v61  ;;  %p8643_p5 = scmp.gt.f32.partialorder %s8679_s17, 0.5 }
  0x1e   :  { %9064 = vmatpush3.msra.mxu1 %v704_v25  ;;  %9065 = vmatprep.mubr.f32.mxu1 %v10279_v8  ;;  %v9626_v40 = vpack.c.bf16 %v225_v39, %v218_v38  ;;  %v10421_v33 = vsub.f32 %v1632_v20, %v10412_v24 }
  0x1f   :  { %9068 = vmatprep.subr.mxu1 %v701_v10  ;;  %10101 = vset.pattern.permute.xlu1 %v10201_v36  ;;  %v10397_v3 = vpack.c.bf16 %v1211_v0, %v1204_v63  ;;  %s8644_s18 = scalar_select %p8643_p5, 1, 0 }
  0x20   :  { %2650 = vperm.xlu1 %10101, %v10277_v7   ;;  %v10428_v39 = vand.u32 4294901760, %v10421_v33 }
  0x24   :  { %2654 = vperm.xlu1 %10101, %v10289_v11  }
  0x25   :  { %9066 = vmatmul.mubr.f32.vlgmr.msra.gmra.mrb[0].mxu1 %v10281_v9 }
  0x26   :  { %9069 = vmatpush3.msra.mxu1 %v701_v10  ;;  %9070 = vmatprep.mubr.f32.mxu1 %v10292_v12  ;;  %v1629_v10 = vsel %vm132_vm2, %v10308_v18, 0 }
  0x27   :  { %9073 = vmatprep.subr.mxu1 %v10271_v5  ;;  %v10408_v17 = vand.u32 4294901760, %v1629_v10 }
  0x28   :  { %10102 = vset.pattern.permute.xlu1 %v11227_v43 }
  0x29   :  { %3163 = vperm.xlu1 %10102, %v10277_v7   ;;  %v10417_v25 = vsub.f32 %v1629_v10, %v10408_v17 }
  0x2b   :  { %v10424_v34 = vand.u32 4294901760, %v10417_v25 }
  0x2d   :  { %9071 = vmatmul.mubr.f32.vlgmr.msra.gmra.mrb[0].mxu1 %v10295_v13  ;;  %3167 = vperm.xlu1 %10102, %v10289_v11  }
  0x2e   :  { %9074 = vmatpush3.msra.mxu1 %v10271_v5  ;;  %9075 = vmatprep.mubr.f32.mxu1 %v10299_v15 }
  0x2f   :  { %9078 = vmatprep.subr.mxu1 %v702_v14 }
  0x31   :  { %10103 = vset.pattern.permute.xlu1 %v11230_v6 }
  0x35   :  { %9076 = vmatmul.mubr.f32.vlgmr.msra.gmra.mrb[0].mxu1 %v10302_v16 }
  0x36   :  { %9079 = vmatpush3.msra.mxu1 %v702_v14  ;;  %9080 = vmatprep.mubr.f32.mxu1 %v10279_v8  ;;  %v10406_v14 = vpack.c.bf16 %v1208_v57, %v1201_v56 }
  0x37   :  { %9083 = vmatprep.subr.mxu1 %v10271_v5 }
  0x3d   :  { %9081 = vmatmul.mubr.f32.vlgmr.msra.gmra.mrb[0].mxu1 %v10281_v9  ;;  %10099 = vset.pattern.permute.xlu0 %v11229_v28 }
  0x3e   :  { %9084 = vmatpush3.msra.mxu1 %v10271_v5  ;;  %9085 = vmatprep.mubr.f32.mxu1 %v10279_v8 }
  0x3f   :  { %2137 = vperm.xlu0 %10099, %v10277_v7   ;;  %9641 = vmatprep.subr.bf16.mxu1 %v10385_v54 }
  0x43   :  { %10104 = vset.pattern.permute.xlu0 %v11230_v6 }
  0x45   :  { %9086 = vmatmul.mubr.f32.vlgmr.msra.gmra.mrb[0].mxu1 %v10281_v9 }
  0x46   :  { %9643 = vmatpush3.bf16.msra.mxu1 %v10385_v54 }
  0x47   :  { %9645 = vmatprep.subr.bf16.mxu1 %v10397_v3 }
  0x90   :  { %v10372_v44 = vpop.trf.xlu0 }
  0x91   :  { %v131_v45 = vmul.f32 %v10372_v44, %v10372_v44  ;;  %v1617_v55 = vpop.permute.xlu1 %1616 }
  0x92   :  { %v1624_v1 = vmul.f32 %v1617_v55, %v10277_v7 }
  0x93   :  { %v134_v46 = vsel %vm132_vm2, %v131_v45, 0  ;;  %v1714_v45 = vsub.f32 %v10421_v33, %v10428_v39 }
  0x94   :  { %v10377_v47 = vand.u32 4294901760, %v134_v46  ;;  %v1635_v4 = vand.u32 4294901760, %v1624_v1 }
  0x95   :  { %v1622_v62 = vpop.permute.xlu1 %1621 }
  0x96   :  { %v204_v48 = vsub.f32 %v134_v46, %v10377_v47  ;;  %v1625_v2 = vmul.f32 %v1622_v62, %v10289_v11  ;;  %v1723_v21 = vsub.f32 %v1624_v1, %v1635_v4  ;;  %v10437_v46 = vpack.c.bf16 %v1209_v59, %v1202_v58 }
  0x98   :  { %v205_v49 = vand.u32 4294901760, %v204_v48  ;;  %v1638_v5 = vand.u32 4294901760, %v1625_v2  ;;  %v1724_v30 = vand.u32 4294901760, %v1723_v21 }
  0x9a   :  { %v206_v50 = vsub.f32 %v204_v48, %v205_v49  ;;  %v1730_v23 = vsub.f32 %v1625_v2, %v1638_v5  ;;  %v9664_v35 = vpack.c.bf16 %v1638_v5, %v1635_v4  ;;  %v1725_v37 = vsub.f32 %v1723_v21, %v1724_v30 }
  0x9c   :  { %v207_v51 = vand.u32 4294901760, %v206_v50  ;;  %v1731_v32 = vand.u32 4294901760, %v1730_v23  ;;  %v9672_v50 = vpack.c.bf16 %v1730_v23, %v1723_v21  ;;  %v57_v21 = vld [vmem:[%s11213_s1 + $0x8] sm:$0xff] }
  0x9e   :  { %9021 = vmatmul.mubr.f32.vlgmr.msra.gmra.mrb[0].mxu0 %v207_v51  ;;  %v1732_v38 = vsub.f32 %v1730_v23, %v1731_v32  ;;  %v10445_v51 = vpop.permute.xlu1 %2141  ;;  %v9680_v53 = vpack.c.bf16 %v1731_v32, %v1724_v30  ;;  %v56_v23 = vld [vmem:[%s11213_s1] sm:$0xff]  ;;  %s599_s1 = sld [smem:[#allocation2]] }
  0x9f   :  { %9627 = vmatpush3.bf16.msra.mxu0 %v9626_v40  ;;  %9027 = vmatprep.mubr.msk.f32.mxu0 %vm10199_vm1, %v11222_v31  ;;  %v1704_v40 = vsub.f32 %v10417_v25, %v10424_v34 }
  0xa0   :  { %9628 = vmatprep.subr.bf16.mxu0 %v11224_v22 }
  0xa2   :  { %v2651_v52 = vpop.permute.xlu1 %2650 }
  0xa3   :  { %v2657_v55 = vmul.f32 %v2651_v52, %v10277_v7 }
  0xa5   :  { %v2661_v57 = vand.u32 4294901760, %v2657_v55 }
  0xa6   :  { %9028 = vmatmul.mubr.f32.vlgmr.msra.gmra.mrb[0].mxu0 %v10377_v47 }
  0xa7   :  { %9630 = vmatpush3.bf16.msra.mxu0 %v9629_v41  ;;  %9034 = vmatprep.mubr.msk.f32.mxu0 %vm10199_vm1, %v11222_v31  ;;  %v1726_v41 = vand.u32 4294901760, %v1725_v37  ;;  %v2749_v59 = vsub.f32 %v2657_v55, %v2661_v57 }
  0xa8   :  { %9631 = vmatprep.subr.bf16.mxu0 %v11224_v22 }
  0xa9   :  { %v2750_v61 = vand.u32 4294901760, %v2749_v59 }
  0xab   :  { %v2751_v0 = vsub.f32 %v2749_v59, %v2750_v61 }
  0xad   :  { %v2752_v2 = vand.u32 4294901760, %v2751_v0 }
  0xae   :  { %9035 = vmatmul.mubr.f32.vlgmr.msra.gmra.mrb[0].mxu0 %v204_v48  ;;  %v10439_v48 = vand.u32 4294901760, %v1704_v40 }
  0xaf   :  { %9633 = vmatpush3.bf16.msra.mxu0 %v10327_v29  ;;  %9041 = vmatprep.mubr.msk.f32.mxu0 %vm10199_vm1, %v11222_v31 }
  0xb0   :  { %9634 = vmatprep.subr.bf16.mxu0 %v11224_v22 }
  0xb6   :  { %9042 = vmatmul.mubr.f32.vlgmr.msra.gmra.mrb[0].mxu0 %v205_v49 }
  0xb7   :  { %9636 = vmatpush3.bf16.msra.mxu0 %v9635_v42  ;;  %9048 = vmatprep.mubr.msk.f32.mxu0 %vm10199_vm1, %v11222_v31  ;;  %v1733_v42 = vand.u32 4294901760, %v1732_v38 }
  0xb8   :  { %9637 = vmatprep.subr.bf16.mxu0 %v11224_v22 }
  0xb9   :  { %v9668_v49 = vpack.c.bf16 %v1733_v42, %v1726_v41 }
  0xbe   :  { %9049 = vmatmul.mubr.f32.vlgmr.msra.gmra.mrb[0].mxu0 %v10377_v47 }
  0xbf   :  { %9639 = vmatpush3.bf16.msra.mxu0 %v10327_v29  ;;  %9055 = vmatprep.mubr.msk.f32.mxu0 %vm10199_vm1, %v11222_v31  ;;  %v10442_v29 = vand.u32 4294901760, %v1714_v45 }
  0xc0   :  { %9665 = vmatprep.subr.bf16.mxu0 %v9664_v35 }
  0xc6   :  { %9056 = vmatmul.mubr.f32.vlgmr.msra.gmra.mrb[0].mxu0 %v10377_v47  ;;  %v2655_v47 = vpop.permute.xlu1 %2654 }
  0xc7   :  { %9667 = vmatpush3.bf16.msra.mxu0 %v9664_v35  ;;  %9134 = vmatprep.mubr.f32.mxu0 %v10439_v48  ;;  %v2658_v56 = vmul.f32 %v2655_v47, %v10289_v11 }
  0xc8   :  { %9669 = vmatprep.subr.bf16.mxu0 %v9668_v49 }
  0xc9   :  { %v2664_v58 = vand.u32 4294901760, %v2658_v56 }
  0xca   :  { %9135 = vmatmul.mubr.f32.vlgmr.msra.gmra.mrb[2].mxu0 %v10442_v29 }
  0xcb   :  { %9671 = vmatpush3.bf16.msra.mxu0 %v9668_v49  ;;  %9141 = vmatprep.mubr.f32.mxu0 %v10408_v17  ;;  %v2756_v60 = vsub.f32 %v2658_v56, %v2664_v58  ;;  %v9712_v63 = vpack.c.bf16 %v2664_v58, %v2661_v57  ;;  %v2145_v58 = vmul.f32 %v10445_v51, %v10289_v11 }
  0xcc   :  { %9673 = vmatprep.subr.bf16.mxu0 %v9672_v50 }
  0xcd   :  { %v2757_v62 = vand.u32 4294901760, %v2756_v60  ;;  %v9720_v10 = vpack.c.bf16 %v2756_v60, %v2749_v59 }
  0xcf   :  { %v2758_v1 = vsub.f32 %v2756_v60, %v2757_v62  ;;  %v9728_v20 = vpack.c.bf16 %v2757_v62, %v2750_v61  ;;  %v2151_v60 = vand.u32 4294901760, %v2145_v58 }
  0xd1   :  { %v2759_v4 = vand.u32 4294901760, %v2758_v1  ;;  %v2243_v61 = vsub.f32 %v2145_v58, %v2151_v60 }
  0xd2   :  { %9142 = vmatmul.mubr.f32.vlgmr.msra.gmra.mrb[2].mxu0 %v10412_v24 }
  0xd3   :  { %9675 = vmatpush3.bf16.msra.mxu0 %v9672_v50  ;;  %9148 = vmatprep.mubr.f32.mxu0 %v10417_v25  ;;  %v9716_v5 = vpack.c.bf16 %v2759_v4, %v2752_v2 }
  0xd4   :  { %9677 = vmatprep.subr.bf16.mxu0 %v9664_v35 }
  0xda   :  { %9149 = vmatmul.mubr.f32.vlgmr.msra.gmra.mrb[2].mxu0 %v10421_v33 }
  0xdb   :  { %9679 = vmatpush3.bf16.msra.mxu0 %v9664_v35  ;;  %9155 = vmatprep.mubr.f32.mxu0 %v10424_v34 }
  0xdc   :  { %9681 = vmatprep.subr.bf16.mxu0 %v9680_v53 }
  0xe2   :  { %9156 = vmatmul.mubr.f32.vlgmr.msra.gmra.mrb[2].mxu0 %v10428_v39 }
  0xe3   :  { %9683 = vmatpush3.bf16.msra.mxu0 %v9680_v53  ;;  %9162 = vmatprep.mubr.f32.mxu0 %v10408_v17 }
  0xe4   :  { %9685 = vmatprep.subr.bf16.mxu0 %v9664_v35 }
  0xea   :  { %9163 = vmatmul.mubr.f32.vlgmr.msra.gmra.mrb[2].mxu0 %v10412_v24 }
  0xeb   :  { %9687 = vmatpush3.bf16.msra.mxu0 %v9664_v35  ;;  %9169 = vmatprep.mubr.f32.mxu0 %v10408_v17 }
  0xec   :  { %9713 = vmatprep.subr.bf16.mxu0 %v9712_v63 }
  0xf2   :  { %9170 = vmatmul.mubr.f32.vlgmr.msra.gmra.mrb[2].mxu0 %v10412_v24 }
  0xf3   :  { %9715 = vmatpush3.bf16.msra.mxu0 %v9712_v63  ;;  %9218 = vmatprep.mubr.f32.mxu0 %v10439_v48 }
  0xf4   :  { %9717 = vmatprep.subr.bf16.mxu0 %v9716_v5 }
  0xf6   :  { %9219 = vmatmul.mubr.f32.vlgmr.msra.gmra.mrb[4].mxu0 %v10442_v29 }
  0xf7   :  { %9719 = vmatpush3.bf16.msra.mxu0 %v9716_v5  ;;  %9225 = vmatprep.mubr.f32.mxu0 %v10408_v17 }
  0xf8   :  { %9721 = vmatprep.subr.bf16.mxu0 %v9720_v10 }
  0xfe   :  { %9226 = vmatmul.mubr.f32.vlgmr.msra.gmra.mrb[4].mxu0 %v10412_v24 }
  0xff   :  { %9723 = vmatpush3.bf16.msra.mxu0 %v9720_v10  ;;  %9232 = vmatprep.mubr.f32.mxu0 %v10417_v25  ;;  %v3164_v10 = vpop.permute.xlu1 %3163 }
 0x100   :  { %9725 = vmatprep.subr.bf16.mxu0 %v9712_v63 }
 0x106   :  { %9233 = vmatmul.mubr.f32.vlgmr.msra.gmra.mrb[4].mxu0 %v10421_v33 }
 0x107   :  { %9727 = vmatpush3.bf16.msra.mxu0 %v9712_v63  ;;  %9239 = vmatprep.mubr.f32.mxu0 %v10424_v34 }
 0x108   :  { %9729 = vmatprep.subr.bf16.mxu0 %v9728_v20 }
 0x10e   :  { %9240 = vmatmul.mubr.f32.vlgmr.msra.gmra.mrb[4].mxu0 %v10428_v39 }
 0x10f   :  { %9731 = vmatpush3.bf16.msra.mxu0 %v9728_v20  ;;  %9246 = vmatprep.mubr.f32.mxu0 %v10408_v17  ;;  %v3170_v20 = vmul.f32 %v3164_v10, %v10277_v7 }
 0x110   :  { %9733 = vmatprep.subr.bf16.mxu0 %v9712_v63 }
 0x116   :  { %9247 = vmatmul.mubr.f32.vlgmr.msra.gmra.mrb[4].mxu0 %v10412_v24 }
 0x117   :  { %9735 = vmatpush3.bf16.msra.mxu0 %v9712_v63  ;;  %9253 = vmatprep.mubr.f32.mxu0 %v10408_v17 }
 0x118   :  { %v9087_v30 = vpop.f32.mrb[0].mxu1 }
 0x119   :  { %v1103_v32 = vsub.f32 %v57_v21, %v9087_v30  ;;  %v1092_v35 = vpop.f32.mrb[1].mxu1  ;;  %v3174_v30 = vand.u32 4294901760, %v3170_v20 }
 0x11a   :  { %v1102_v37 = vsub.f32 %v56_v23, %v1092_v35 }
 0x11b   :  { %v10478_v38 = vmul.f32 %v1103_v32, %v10313_v19  ;;  %v3262_v35 = vsub.f32 %v3170_v20, %v3174_v30 }
 0x11c   :  { %v10481_v40 = vmul.f32 %v1102_v37, %v10308_v18  ;;  %v2138_v18 = vpop.permute.xlu0 %2137 }
 0x11d   :  { %v1110_v41 = vsel %vm132_vm2, %v10478_v38, 0  ;;  %v2144_v59 = vmul.f32 %v2138_v18, %v10277_v7 }
 0x11e   :  { %v1189_v42 = vand.u32 4294901760, %v1110_v41  ;;  %v1107_v45 = vsel %vm132_vm2, %v10481_v40, 0  ;;  %9254 = vmatmul.mubr.f32.vlgmr.msra.gmra.mrb[4].mxu0 %v10412_v24 }
 0x11f   :  { %v1179_v49 = vand.u32 4294901760, %v1107_v45 }
 0x120   :  { %v1190_v50 = vsub.f32 %v1110_v41, %v1189_v42  ;;  %v3263_v41 = vand.u32 4294901760, %v3262_v35 }
 0x121   :  { %v1180_v52 = vsub.f32 %v1107_v45, %v1179_v49 }
 0x122   :  { %v1191_v47 = vand.u32 4294901760, %v1190_v50 }
 0x123   :  { %v1181_v53 = vand.u32 4294901760, %v1180_v52 }
 0x124   :  { %v1192_v55 = vsub.f32 %v1190_v50, %v1191_v47 }
 0x125   :  { %v1182_v19 = vsub.f32 %v1180_v52, %v1181_v53 }
 0x126   :  { %v1193_v57 = vand.u32 4294901760, %v1192_v55 }
 0x127   :  { %v1183_v56 = vand.u32 4294901760, %v1182_v19 }
 0x129   :  { %9092 = vmatprep.mubr.f32.mxu1 %v1183_v56 }
 0x12a   :  { %9093 = vmatmul.mubr.f32.vlgmr.msra.gmra.mrb[2].mxu1 %v1193_v57 }
 0x12b   :  { %9099 = vmatprep.mubr.f32.mxu1 %v1179_v49  ;;  %9647 = vmatpush3.bf16.msra.mxu1 %v10397_v3  ;;  %v2148_v3 = vand.u32 4294901760, %v2144_v59 }
 0x12c   :  { %9649 = vmatprep.subr.bf16.mxu1 %v10406_v14 }
 0x12d   :  { %v2236_v62 = vsub.f32 %v2144_v59, %v2148_v3  ;;  %v9688_v51 = vpack.c.bf16 %v2151_v60, %v2148_v3 }
 0x12f   :  { %v2237_v63 = vand.u32 4294901760, %v2236_v62 }
 0x131   :  { %v2238_v0 = vsub.f32 %v2236_v62, %v2237_v63 }
 0x132   :  { %9100 = vmatmul.mubr.f32.vlgmr.msra.gmra.mrb[2].mxu1 %v1189_v42 }
 0x133   :  { %9106 = vmatprep.mubr.f32.mxu1 %v1180_v52  ;;  %9651 = vmatpush3.bf16.msra.mxu1 %v10406_v14  ;;  %v2244_v14 = vand.u32 4294901760, %v2243_v61  ;;  %v2239_v2 = vand.u32 4294901760, %v2238_v0 }
 0x134   :  { %9653 = vmatprep.subr.bf16.mxu1 %v10385_v54 }
 0x135   :  { %v2245_v1 = vsub.f32 %v2243_v61, %v2244_v14  ;;  %v9704_v23 = vpack.c.bf16 %v2244_v14, %v2237_v63 }
 0x137   :  { %v2246_v4 = vand.u32 4294901760, %v2245_v1 }
 0x139   :  { %v9692_v5 = vpack.c.bf16 %v2246_v4, %v2239_v2 }
 0x13a   :  { %9107 = vmatmul.mubr.f32.vlgmr.msra.gmra.mrb[2].mxu1 %v1190_v50 }
 0x13b   :  { %9113 = vmatprep.mubr.f32.mxu1 %v1181_v53  ;;  %9655 = vmatpush3.bf16.msra.mxu1 %v10385_v54 }
 0x13c   :  { %9657 = vmatprep.subr.bf16.mxu1 %v10437_v46 }
 0x142   :  { %9114 = vmatmul.mubr.f32.vlgmr.msra.gmra.mrb[2].mxu1 %v1191_v47 }
 0x143   :  { %9120 = vmatprep.mubr.f32.mxu1 %v1179_v49  ;;  %9659 = vmatpush3.bf16.msra.mxu1 %v10437_v46  ;;  %v9696_v46 = vpack.c.bf16 %v2243_v61, %v2236_v62 }
 0x144   :  { %9661 = vmatprep.subr.bf16.mxu1 %v10385_v54 }
 0x14a   :  { %9121 = vmatmul.mubr.f32.vlgmr.msra.gmra.mrb[2].mxu1 %v1189_v42 }
 0x14b   :  { %9127 = vmatprep.mubr.f32.mxu1 %v1179_v49  ;;  %9663 = vmatpush3.bf16.msra.mxu1 %v10385_v54  ;;  %v3168_v54 = vpop.permute.xlu1 %3167 }
 0x14c   :  { %9689 = vmatprep.subr.bf16.mxu1 %v9688_v51  ;;  %v3171_v21 = vmul.f32 %v3168_v54, %v10289_v11 }
 0x14e   :  { %v3177_v32 = vand.u32 4294901760, %v3171_v21 }
 0x150   :  { %v3269_v37 = vsub.f32 %v3171_v21, %v3177_v32  ;;  %v9736_v11 = vpack.c.bf16 %v3177_v32, %v3174_v30 }
 0x152   :  { %9128 = vmatmul.mubr.f32.vlgmr.msra.gmra.mrb[2].mxu1 %v1189_v42  ;;  %v3270_v7 = vand.u32 4294901760, %v3269_v37  ;;  %v3264_v42 = vsub.f32 %v3262_v35, %v3263_v41  ;;  %v9744_v47 = vpack.c.bf16 %v3269_v37, %v3262_v35 }
 0x153   :  { %9691 = vmatpush3.bf16.msra.mxu1 %v9688_v51  ;;  %9176 = vmatprep.mubr.f32.mxu1 %v10439_v48 }
 0x154   :  { %9693 = vmatprep.subr.bf16.mxu1 %v9692_v5  ;;  %v3271_v45 = vsub.f32 %v3269_v37, %v3270_v7  ;;  %v3265_v49 = vand.u32 4294901760, %v3264_v42  ;;  %v9752_v53 = vpack.c.bf16 %v3270_v7, %v3263_v41 }
 0x156   :  { %9177 = vmatmul.mubr.f32.vlgmr.msra.gmra.mrb[4].mxu1 %v10442_v29  ;;  %v3272_v50 = vand.u32 4294901760, %v3271_v45 }
 0x157   :  { %9695 = vmatpush3.bf16.msra.mxu1 %v9692_v5  ;;  %9183 = vmatprep.mubr.f32.mxu1 %v10408_v17 }
 0x158   :  { %9697 = vmatprep.subr.bf16.mxu1 %v9696_v46  ;;  %v9740_v52 = vpack.c.bf16 %v3272_v50, %v3265_v49 }
 0x15e   :  { %9184 = vmatmul.mubr.f32.vlgmr.msra.gmra.mrb[4].mxu1 %v10412_v24 }
 0x15f   :  { %9699 = vmatpush3.bf16.msra.mxu1 %v9696_v46  ;;  %9190 = vmatprep.mubr.f32.mxu1 %v10417_v25 }
 0x160   :  { %9701 = vmatprep.subr.bf16.mxu1 %v9688_v51 }
 0x166   :  { %9191 = vmatmul.mubr.f32.vlgmr.msra.gmra.mrb[4].mxu1 %v10421_v33 }
 0x167   :  { %9703 = vmatpush3.bf16.msra.mxu1 %v9688_v51  ;;  %9197 = vmatprep.mubr.f32.mxu1 %v10424_v34 }
 0x168   :  { %9705 = vmatprep.subr.bf16.mxu1 %v9704_v23 }
 0x16e   :  { %9198 = vmatmul.mubr.f32.vlgmr.msra.gmra.mrb[4].mxu1 %v10428_v39 }
 0x16f   :  { %9707 = vmatpush3.bf16.msra.mxu1 %v9704_v23  ;;  %9204 = vmatprep.mubr.f32.mxu1 %v10408_v17 }
 0x170   :  { %9709 = vmatprep.subr.bf16.mxu1 %v9688_v51 }
 0x176   :  { %9205 = vmatmul.mubr.f32.vlgmr.msra.gmra.mrb[4].mxu1 %v10412_v24 }
 0x177   :  { %9711 = vmatpush3.bf16.msra.mxu1 %v9688_v51  ;;  %9211 = vmatprep.mubr.f32.mxu1 %v10408_v17 }
 0x178   :  { %9737 = vmatprep.subr.bf16.mxu1 %v9736_v11 }
 0x17e   :  { %9212 = vmatmul.mubr.f32.vlgmr.msra.gmra.mrb[4].mxu1 %v10412_v24 }
 0x17f   :  { %9739 = vmatpush3.bf16.msra.mxu1 %v9736_v11  ;;  %9260 = vmatprep.mubr.f32.mxu1 %v10439_v48 }
 0x180   :  { %9741 = vmatprep.subr.bf16.mxu1 %v9740_v52 }
 0x182   :  { %9261 = vmatmul.mubr.f32.vlgmr.msra.gmra.mrb[6].mxu1 %v10442_v29 }
 0x183   :  { %9743 = vmatpush3.bf16.msra.mxu1 %v9740_v52  ;;  %9267 = vmatprep.mubr.f32.mxu1 %v10408_v17 }
 0x184   :  { %9745 = vmatprep.subr.bf16.mxu1 %v9744_v47 }
 0x18a   :  { %9268 = vmatmul.mubr.f32.vlgmr.msra.gmra.mrb[6].mxu1 %v10412_v24 }
 0x18b   :  { %9747 = vmatpush3.bf16.msra.mxu1 %v9744_v47  ;;  %9274 = vmatprep.mubr.f32.mxu1 %v10417_v25  ;;  %v42_v25 = vlaneseq }
 0x18c   :  { %9749 = vmatprep.subr.bf16.mxu1 %v9736_v11 }
 0x192   :  { %9275 = vmatmul.mubr.f32.vlgmr.msra.gmra.mrb[6].mxu1 %v10421_v33  ;;  %v43_v33 = vand.u32 127, %v42_v25 }
 0x193   :  { %9751 = vmatpush3.bf16.msra.mxu1 %v9736_v11  ;;  %9281 = vmatprep.mubr.f32.mxu1 %v10424_v34 }
 0x194   :  { %9753 = vmatprep.subr.bf16.mxu1 %v9752_v53  ;;  %vm44_vm3 = vcmp.eq.s32.totalorder %v43_v33, 0  ;;  %vm47_vm4 = vcmp.eq.s32.totalorder %v43_v33, 1  ;;  %vm50_vm5 = vcmp.eq.s32.totalorder %v43_v33, 2  ;;  %vm53_vm6 = vcmp.eq.s32.totalorder %v43_v33, 3 }
 0x195   :  { %v10529_v34 = vsel %vm44_vm3, 1.0, %v11222_v31  ;;  %v10537_v4 = vsel %vm47_vm4, 1.0, %v11222_v31  ;;  %v10541_v20 = vsel %vm50_vm5, 1.0, %v11222_v31  ;;  %v10551_v35 = vsel %vm53_vm6, 1.0, %v11222_v31 }
 0x199   :  { %v10522_v48 = vpop.f32.mrb[0].mxu0 }
 0x19a   :  { %9282 = vmatmul.mubr.f32.vlgmr.msra.gmra.mrb[6].mxu1 %v10428_v39  ;;  %v9057_v29 = vpop.f32.mrb[1].mxu0  ;;  %v1626_v39 = vstv %s599_s1  ;;  %vm595_vm8 = vcmp.gt.f32.partialorder %v10522_v48, 0.0 }
 0x19b   :  { %9755 = vmatpush3.bf16.msra.mxu1 %v9752_v53  ;;  %9288 = vmatprep.mubr.f32.mxu1 %v10408_v17  ;;  %v1627_v55 = vmul.f32 %v10529_v34, %v1626_v39  ;;  %v2146_v5 = vmul.f32 %v10537_v4, %v1626_v39  ;;  %v2659_v21 = vmul.f32 %v10541_v20, %v1626_v39 }
 0x19c   :  { %9757 = vmatprep.subr.bf16.mxu1 %v9736_v11  ;;  %v3172_v37 = vmul.f32 %v10551_v35, %v1626_v39 }
 0x1a2   :  { %9289 = vmatmul.mubr.f32.vlgmr.msra.gmra.mrb[6].mxu1 %v10412_v24 }
 0x1a3   :  { %9759 = vmatpush3.bf16.msra.mxu1 %v9736_v11  ;;  %9295 = vmatprep.mubr.f32.mxu1 %v10408_v17 }
 0x1aa   :  { %9296 = vmatmul.mubr.f32.vlgmr.msra.gmra.mrb[6].mxu1 %v10412_v24 }
 0x1c5   :  { %v9171_v19 = vpop.f32.mrb[2].mxu0 }
 0x1c6   :  { %v9922_v56 = vadd.f32 %v9171_v19, %v1627_v55  ;;  %v2126_v57 = vpop.f32.mrb[3].mxu0 }
 0x1c7   :  { %v9923_v18 = vadd.f32 %v2126_v57, %v1627_v55 }
 0x1c8   :  { %v3676_v58 = vmax.f32 %v9922_v56, 1e-20 }
 0x1c9   :  { %v3675_v59 = vmax.f32 %v9923_v18, 1e-20 }
 0x1ca   :  { %10138 = vrcp.f32 %v3676_v58 }
 0x1cb   :  { %10140 = vrcp.f32 %v3675_v59 }
 0x1d4   :  { %v10139_v17 = vpop.eup %10138 }
 0x1d5   :  { %v10141_v24 = vpop.eup %10140  ;;  %v3680_v60 = vmul.f32 %v10139_v17, %v3676_v58 }
 0x1d6   :  { %v3679_v3 = vmul.f32 %v10141_v24, %v3675_v59 }
 0x1d7   :  { %v3682_v61 = vsub.f32 2.0, %v3680_v60 }
 0x1d8   :  { %v3681_v62 = vsub.f32 2.0, %v3679_v3 }
 0x1d9   :  { %v3684_v14 = vmul.f32 %v10139_v17, %v3682_v61 }
 0x1da   :  { %v3683_v63 = vmul.f32 %v10141_v24, %v3681_v62 }
 0x1db   :  { %3692 = vperm.xlu1 %10103, %v3684_v14  }
 0x1df   :  { %3687 = vperm.xlu1 %10103, %v3683_v63  }
 0x1f1   :  { %v9255_v51 = vpop.f32.mrb[4].mxu0 }
 0x1f2   :  { %v3152_v0 = vpop.f32.mrb[5].mxu0  ;;  %v10547_v32 = vadd.f32 %v9255_v51, %v2659_v21 }
 0x1f3   :  { %v10544_v30 = vadd.f32 %v3152_v0, %v2659_v21 }
 0x225   :  { %v10532_v1 = vpop.f32.mrb[2].mxu1 }
 0x226   :  { %v10534_v2 = vpop.f32.mrb[3].mxu1  ;;  %v10563_v49 = vmul.f32 %v10532_v1, %v3684_v14 }
 0x227   :  { %v10559_v45 = vmul.f32 %v3683_v63, %v10534_v2 }
 0x251   :  { %v9213_v46 = vpop.f32.mrb[4].mxu1 }
 0x252   :  { %v2639_v10 = vpop.f32.mrb[5].mxu1  ;;  %v9924_v23 = vadd.f32 %v9213_v46, %v2146_v5 }
 0x253   :  { %v9925_v54 = vadd.f32 %v2639_v10, %v2146_v5 }
 0x254   :  { %v3714_v52 = vmul.f32 %v9924_v23, %v10563_v49 }
 0x255   :  { %3701 = vperm.xlu1 %10103, %v9925_v54   ;;  %v3713_v50 = vmul.f32 %v9925_v54, %v10559_v45 }
 0x259   :  { %3706 = vperm.xlu1 %10103, %v9924_v23  }
 0x25a   :  { %v3693_v47 = vpop.permute.xlu1 %3692 }
 0x25b   :  { %v10575_v39 = vmul.f32 %v9922_v56, %v3693_v47 }
 0x25d   :  { %3727 = vperm.xlu1 %10103, %v10544_v30  }
 0x25e   :  { %v3688_v53 = vpop.permute.xlu1 %3687 }
 0x25f   :  { %v10572_v29 = vmul.f32 %v9923_v18, %v3688_v53 }
 0x261   :  { %3732 = vperm.xlu1 %10103, %v10547_v32  }
 0x27d   :  { %v9297_v41 = vpop.f32.mrb[6].mxu1 }
 0x27e   :  { %v10554_v7 = vadd.f32 %v9297_v41, %v3172_v37  ;;  %v3665_v11 = vpop.f32.mrb[7].mxu1 }
 0x27f   :  { %v10556_v42 = vadd.f32 %v3665_v11, %v3172_v37 }
 0x280   :  { %3758 = vperm.xlu1 %10103, %v10554_v7  }
 0x281   :  { %3753 = vperm.xlu0 %10104, %v10556_v42  }
 0x284   :  { %3717 = vrot.lane.b32.xlu1 %v3713_v50, %s10203_s30 }
 0x285   :  { %3719 = vrot.lane.b32.xlu0 %v3714_v52, %s10203_s30  ;;  %10106 = vset.pattern.permute.xlu1 %v11229_v28 }
 0x286   :  { %10105 = vset.pattern.permute.xlu0 %v11229_v28 }
 0x2d4   :  { %v3702_v25 = vpop.permute.xlu1 %3701 }
 0x2d5   :  { %v3709_v33 = vmul.f32 %v3702_v25, %v10572_v29 }
 0x2d7   :  { %v3711_v55 = vsub.f32 %v9925_v54, %v3709_v33  ;;  %v3740_v33 = vmul.f32 %v10547_v32, %v10563_v49 }
 0x2d8   :  { %v3707_v19 = vpop.permute.xlu1 %3706 }
 0x2d9   :  { %v3777_v57 = vmax.f32 %v3711_v55, 1e-20  ;;  %v3710_v58 = vmul.f32 %v3707_v19, %v10575_v39 }
 0x2db   :  { %10142 = vrcp.f32 %v3777_v57  ;;  %v3712_v59 = vsub.f32 %v9924_v23, %v3710_v58 }
 0x2dc   :  { %v3728_v17 = vpop.permute.xlu1 %3727 }
 0x2dd   :  { %v3778_v24 = vmax.f32 %v3712_v59, 1e-20  ;;  %v3735_v60 = vmul.f32 %v3728_v17, %v10572_v29 }
 0x2df   :  { %10144 = vrcp.f32 %v3778_v24  ;;  %v3737_v18 = vsub.f32 %v10544_v30, %v3735_v60 }
 0x2e0   :  { %v3733_v62 = vpop.permute.xlu1 %3732 }
 0x2e1   :  { %3829 = vperm.xlu1 %10106, %v3737_v18   ;;  %v3736_v63 = vmul.f32 %v3733_v62, %v10575_v39 }
 0x2e3   :  { %v3738_v46 = vsub.f32 %v10547_v32, %v3736_v63 }
 0x2e5   :  { %v10143_v3 = vpop.eup %10142 }
 0x2e6   :  { %v3781_v61 = vmul.f32 %v10143_v3, %v3777_v57  ;;  %v3739_v57 = vmul.f32 %v10544_v30, %v10559_v45 }
 0x2e8   :  { %v3783_v56 = vsub.f32 2.0, %v3781_v61 }
 0x2e9   :  { %v10145_v14 = vpop.eup %10144 }
 0x2ea   :  { %v3785_v51 = vmul.f32 %v10143_v3, %v3783_v56  ;;  %v3782_v0 = vmul.f32 %v10145_v14, %v3778_v24 }
 0x2ec   :  { %3789 = vperm.xlu1 %10106, %v3785_v51   ;;  %v3784_v5 = vsub.f32 2.0, %v3782_v0 }
 0x2ee   :  { %v3786_v10 = vmul.f32 %v10145_v14, %v3784_v5 }
 0x2f0   :  { %3794 = vperm.xlu0 %10105, %v3786_v10   ;;  %3834 = vperm.xlu1 %10106, %v3738_v46  }
 0x2ff   :  { %v3759_v54 = vpop.permute.xlu1 %3758 }
 0x300   :  { %v3762_v21 = vmul.f32 %v3759_v54, %v10575_v39  ;;  %v3754_v23 = vpop.permute.xlu0 %3753 }
 0x301   :  { %v3761_v37 = vmul.f32 %v3754_v23, %v10572_v29 }
 0x302   :  { %v10585_v41 = vsub.f32 %v10554_v7, %v3762_v21 }
 0x303   :  { %v10588_v11 = vsub.f32 %v10556_v42, %v3761_v37  ;;  %v3718_v50 = vpop.permute.xlu1 %3717 }
 0x304   :  { %v3720_v52 = vpop.permute.xlu0 %3719  ;;  %3860 = vperm.xlu1 %10106, %v10585_v41   ;;  %v3723_v53 = vsub.f32 %v10534_v2, %v3718_v50 }
 0x305   :  { %3855 = vperm.xlu0 %10105, %v10588_v11   ;;  %v3724_v47 = vsub.f32 %v10532_v1, %v3720_v52 }
 0x306   :  { %v10600_v19 = vmul.f32 %v3785_v51, %v3723_v53 }
 0x307   :  { %v10596_v25 = vmul.f32 %v3786_v10, %v3724_v47 }
 0x308   :  { %3808 = vperm.xlu1 %10106, %v10575_v39   ;;  %v3841_v17 = vmul.f32 %v10600_v19, %v3737_v18 }
 0x309   :  { %3803 = vperm.xlu0 %10105, %v10572_v29   ;;  %v3842_v58 = vmul.f32 %v10596_v25, %v3738_v46 }
 0x30c   :  { %3745 = vrot.lane.b32.xlu1 %v3740_v33, %s10204_s10 }
 0x30d   :  { %3743 = vrot.lane.b32.xlu0 %v3739_v57, %s10204_s10  ;;  %10107 = vset.pattern.permute.xlu1 %v10201_v36 }
 0x30e   :  { %10108 = vset.pattern.permute.xlu0 %v10201_v36 }
 0x310   :  { %3847 = vrot.lane.b32.xlu1 %v3842_v58, %s10203_s30 }
 0x311   :  { %3845 = vrot.lane.b32.xlu0 %v3841_v17, %s10203_s30 }
 0x360   :  { %v3830_v32 = vpop.permute.xlu1 %3829 }
 0x36b   :  { %v3790_v24 = vpop.permute.xlu1 %3789 }
 0x36c   :  { %v10612_v30 = vmul.f32 %v3790_v24, %v3711_v55 }
 0x36e   :  { %v3837_v60 = vmul.f32 %v3830_v32, %v10612_v30 }
 0x36f   :  { %v3795_v3 = vpop.permute.xlu0 %3794  ;;  %v3835_v56 = vpop.permute.xlu1 %3834 }
 0x370   :  { %v10615_v61 = vmul.f32 %v3795_v3, %v3712_v59  ;;  %v10617_v62 = vsub.f32 %v3737_v18, %v3837_v60 }
 0x372   :  { %v3838_v14 = vmul.f32 %v3835_v56, %v10615_v61  ;;  %v3879_v63 = vmax.f32 %v10617_v62, 1e-20 }
 0x374   :  { %v10621_v51 = vsub.f32 %v3738_v46, %v3838_v14  ;;  %10146 = vrcp.f32 %v3879_v63 }
 0x376   :  { %v3880_v0 = vmax.f32 %v10621_v51, 1e-20 }
 0x378   :  { %10148 = vrcp.f32 %v3880_v0 }
 0x37e   :  { %v10147_v55 = vpop.eup %10146 }
 0x37f   :  { %v3883_v5 = vmul.f32 %v10147_v55, %v3879_v63 }
 0x381   :  { %v3885_v10 = vsub.f32 2.0, %v3883_v5 }
 0x382   :  { %v10149_v54 = vpop.eup %10148 }
 0x383   :  { %v3861_v21 = vpop.permute.xlu1 %3860  ;;  %v3887_v59 = vmul.f32 %v10147_v55, %v3885_v10  ;;  %v3884_v23 = vmul.f32 %v10149_v54, %v3880_v0  ;;  %v3766_v0 = vmul.f32 %v10554_v7, %v10563_v49 }
 0x384   :  { %v3864_v18 = vmul.f32 %v3861_v21, %v10615_v61  ;;  %v3856_v37 = vpop.permute.xlu0 %3855  ;;  %v3765_v21 = vmul.f32 %v10556_v42, %v10559_v45 }
 0x385   :  { %3891 = vperm.xlu0 %10108, %v3887_v59   ;;  %v3886_v50 = vsub.f32 2.0, %v3884_v23  ;;  %v3863_v46 = vmul.f32 %v3856_v37, %v10612_v30  ;;  %v3868_v23 = vmul.f32 %v10596_v25, %v10585_v41 }
 0x386   :  { %v10626_v52 = vsub.f32 %v10585_v41, %v3864_v18  ;;  %v3867_v18 = vmul.f32 %v10600_v19, %v10588_v11  ;;  %v3816_v41 = vmul.f32 %v10596_v25, %v10575_v39 }
 0x387   :  { %v3809_v47 = vpop.permute.xlu1 %3808  ;;  %v3888_v53 = vmul.f32 %v10149_v54, %v3886_v50  ;;  %v3865_v17 = vsub.f32 %v10588_v11, %v3863_v46  ;;  %v3815_v11 = vmul.f32 %v10600_v19, %v10572_v29 }
 0x388   :  { %v3812_v33 = vmul.f32 %v3809_v47, %v10615_v61  ;;  %v3804_v57 = vpop.permute.xlu0 %3803 }
 0x389   :  { %3896 = vperm.xlu1 %10107, %v3888_v53   ;;  %3962 = vperm.xlu0 %10108, %v10626_v52   ;;  %v3811_v32 = vmul.f32 %v3804_v57, %v10612_v30 }
 0x38a   :  { %v10632_v58 = vsub.f32 %v10575_v39, %v3812_v33 }
 0x38b   :  { %v3746_v24 = vpop.permute.xlu1 %3745  ;;  %v10638_v3 = vsub.f32 %v10572_v29, %v3811_v32 }
 0x38c   :  { %v3744_v60 = vpop.permute.xlu0 %3743  ;;  %v3750_v14 = vsub.f32 %v10532_v1, %v3746_v24 }
 0x38d   :  { %3957 = vperm.xlu1 %10107, %v3865_v17   ;;  %3910 = vperm.xlu0 %10108, %v10632_v58   ;;  %v3749_v5 = vsub.f32 %v10534_v2, %v3744_v60 }
 0x38f   :  { %v3848_v56 = vpop.permute.xlu1 %3847 }
 0x390   :  { %v3852_v63 = vsub.f32 %v3750_v14, %v3848_v56  ;;  %v3846_v55 = vpop.permute.xlu0 %3845 }
 0x391   :  { %3905 = vperm.xlu1 %10107, %v10638_v3   ;;  %3936 = vperm.xlu0 %10108, %v10615_v61   ;;  %v3851_v54 = vsub.f32 %v3749_v5, %v3846_v55 }
 0x392   :  { %v10649_v10 = vmul.f32 %v3888_v53, %v3852_v63 }
 0x393   :  { %v10658_v7 = vmul.f32 %v3887_v59, %v3851_v54 }
 0x394   :  { %v3970_v37 = vmul.f32 %v10649_v10, %v10626_v52  ;;  %v3918_v59 = vmul.f32 %v10649_v10, %v10632_v58  ;;  %v3944_v39 = vmul.f32 %v10649_v10, %v10615_v61 }
 0x395   :  { %3931 = vperm.xlu1 %10107, %v10612_v30   ;;  %3771 = vrot.lane.b32.xlu0 %v3766_v0, %s10205_s11  ;;  %v3969_v42 = vmul.f32 %v10658_v7, %v3865_v17  ;;  %v3917_v50 = vmul.f32 %v10658_v7, %v10638_v3  ;;  %v3943_v29 = vmul.f32 %v10658_v7, %v10612_v30 }
 0x396   :  { %10109 = vset.pattern.permute.xlu0 %v11230_v6 }
 0x399   :  { %3769 = vrot.lane.b32.xlu1 %v3765_v21, %s10205_s11  ;;  %3873 = vrot.lane.b32.xlu0 %v3868_v23, %s10204_s10 }
 0x39a   :  { %10110 = vset.pattern.permute.xlu1 %v11229_v28 }
 0x39d   :  { %3871 = vrot.lane.b32.xlu1 %v3867_v18, %s10204_s10  ;;  %3975 = vrot.lane.b32.xlu0 %v3970_v37, %s10203_s30 }
 0x3a1   :  { %3973 = vrot.lane.b32.xlu1 %v3969_v42, %s10203_s30  ;;  %3821 = vrot.lane.b32.xlu0 %v3816_v41, %s10206_s12 }
 0x3a5   :  { %3819 = vrot.lane.b32.xlu1 %v3815_v11, %s10206_s12  ;;  %3923 = vrot.lane.b32.xlu0 %v3918_v59, %s10207_s13 }
 0x3a9   :  { %3921 = vrot.lane.b32.xlu1 %v3917_v50, %s10207_s13  ;;  %3949 = vrot.lane.b32.xlu0 %v3944_v39, %s10206_s12 }
 0x3ad   :  { %3947 = vrot.lane.b32.xlu1 %v3943_v29, %s10206_s12 }
 0x404   :  { %v3892_v46 = vpop.permute.xlu0 %3891 }
 0x405   :  { %v3899_v57 = vmul.f32 %v3892_v46, %v10617_v62 }
 0x408   :  { %v3963_v47 = vpop.permute.xlu0 %3962  ;;  %v3897_v53 = vpop.permute.xlu1 %3896 }
 0x409   :  { %v3900_v33 = vmul.f32 %v3897_v53, %v10621_v51 }
 0x40b   :  { %v3966_v32 = vmul.f32 %v3963_v47, %v3900_v33 }
 0x40c   :  { %v3911_v24 = vpop.permute.xlu0 %3910  ;;  %v3958_v60 = vpop.permute.xlu1 %3957 }
 0x40d   :  { %v3965_v56 = vmul.f32 %v3958_v60, %v3899_v57  ;;  %v3968_v14 = vsub.f32 %v10626_v52, %v3966_v32 }
 0x40f   :  { %v3967_v63 = vsub.f32 %v3865_v17, %v3965_v56  ;;  %v3982_v0 = vmax.f32 %v3968_v14, 1e-20  ;;  %v3914_v17 = vmul.f32 %v3911_v24, %v3900_v33 }
 0x410   :  { %v3937_v55 = vpop.permute.xlu0 %3936  ;;  %v3906_v5 = vpop.permute.xlu1 %3905 }
 0x411   :  { %v3981_v54 = vmax.f32 %v3967_v63, 1e-20  ;;  %10150 = vrcp.f32 %v3982_v0  ;;  %v3913_v53 = vmul.f32 %v3906_v5, %v3899_v57  ;;  %v3916_v63 = vsub.f32 %v10632_v58, %v3914_v17 }
 0x413   :  { %10152 = vrcp.f32 %v3981_v54  ;;  %v3915_v31 = vsub.f32 %v10638_v3, %v3913_v53 }
 0x414   :  { %v3772_v21 = vpop.permute.xlu0 %3771  ;;  %v3932_v23 = vpop.permute.xlu1 %3931 }
 0x415   :  { %v3776_v62 = vsub.f32 %v10532_v1, %v3772_v21  ;;  %v3940_v1 = vmul.f32 %v3937_v55, %v3900_v33 }
 0x418   :  { %v3874_v18 = vpop.permute.xlu0 %3873  ;;  %v3770_v37 = vpop.permute.xlu1 %3769 }
 0x419   :  { %v3775_v59 = vsub.f32 %v10534_v2, %v3770_v37  ;;  %v3878_v39 = vsub.f32 %v3776_v62, %v3874_v18  ;;  %v3939_v2 = vmul.f32 %v3932_v23, %v3899_v57 }
 0x41b   :  { %v10151_v51 = vpop.eup %10150  ;;  %v3941_v18 = vsub.f32 %v10612_v30, %v3939_v2 }
 0x41c   :  { %v3986_v42 = vmul.f32 %v10151_v51, %v3982_v0  ;;  %v3872_v41 = vpop.permute.xlu1 %3871  ;;  %v3976_v52 = vpop.permute.xlu0 %3975 }
 0x41d   :  { %v10153_v11 = vpop.eup %10152  ;;  %v3877_v46 = vsub.f32 %v3775_v59, %v3872_v41  ;;  %v3980_v32 = vsub.f32 %v3878_v39, %v3976_v52 }
 0x41e   :  { %v3985_v50 = vmul.f32 %v10153_v11, %v3981_v54  ;;  %v3988_v29 = vsub.f32 2.0, %v3986_v42  ;;  %v3942_v54 = vsub.f32 %v10615_v61, %v3940_v1 }
 0x420   :  { %v3987_v47 = vsub.f32 2.0, %v3985_v50  ;;  %v3990_v60 = vmul.f32 %v10151_v51, %v3988_v29  ;;  %v3974_v56 = vpop.permute.xlu1 %3973  ;;  %v3822_v61 = vpop.permute.xlu0 %3821 }
 0x421   :  { %v3979_v14 = vsub.f32 %v3877_v46, %v3974_v56  ;;  %v3826_v30 = vsub.f32 %v10563_v49, %v3822_v61 }
 0x422   :  { %v3992_v0 = vmul.f32 %v3990_v60, %v3980_v32  ;;  %v3989_v21 = vmul.f32 %v10153_v11, %v3987_v47 }
 0x424   :  { %v3991_v37 = vmul.f32 %v3989_v21, %v3979_v14  ;;  %v3994_v24 = vmul.f32 %v3992_v0, %v3916_v63  ;;  %v4006_v51 = vmul.f32 %v3992_v0, %v3942_v54  ;;  %v4018_v3 = vmul.f32 %v3992_v0, %v3900_v33  ;;  %v3820_v23 = vpop.permute.xlu1 %3819  ;;  %v3924_v62 = vpop.permute.xlu0 %3923  ;;  %v63_v54 = vld [vmem:[%s11216_s4 + $0x8] sm:$0xff] }
 0x425   :  { %v3928_v11 = vsub.f32 %v3826_v30, %v3924_v62  ;;  %v3825_v49 = vsub.f32 %v10559_v45, %v3820_v23 }
 0x426   :  { %3999 = vrot.lane.b32.xlu0 %v3994_v24, %s10208_s14  ;;  %v3993_v5 = vmul.f32 %v3991_v37, %v3915_v31  ;;  %v4005_v58 = vmul.f32 %v3991_v37, %v3941_v18  ;;  %v4017_v55 = vmul.f32 %v3991_v37, %v3899_v57  ;;  %v4085_v18 = vstv %s8676_s15 }
 0x428   :  { %3997 = vrot.lane.b32.xlu1 %v3993_v5, %s10208_s14  ;;  %v3922_v31 = vpop.permute.xlu1 %3921  ;;  %v3950_v42 = vpop.permute.xlu0 %3949 }
 0x429   :  { %v3954_v50 = vsub.f32 %v10596_v25, %v3950_v42  ;;  %v3927_v32 = vsub.f32 %v3825_v49, %v3922_v31 }
 0x42a   :  { %4011 = vrot.lane.b32.xlu0 %v4006_v51, %s10207_s13 }
 0x42c   :  { %4009 = vrot.lane.b32.xlu1 %v4005_v58, %s10207_s13  ;;  %v3948_v41 = vpop.permute.xlu1 %3947 }
 0x42d   :  { %v3953_v60 = vsub.f32 %v10600_v19, %v3948_v41 }
 0x42e   :  { %4023 = vrot.lane.b32.xlu0 %v4018_v3, %s10206_s12 }
 0x430   :  { %4021 = vrot.lane.b32.xlu1 %v4017_v55, %s10206_s12 }
 0x498   :  { %v4000_v59 = vpop.permute.xlu0 %3999 }
 0x499   :  { %v4004_v52 = vsub.f32 %v3928_v11, %v4000_v59 }
 0x49a   :  { %v3998_v17 = vpop.permute.xlu1 %3997 }
 0x49b   :  { %4036 = vperm.xlu0 %10109, %v4004_v52   ;;  %v4003_v25 = vsub.f32 %v3927_v32, %v3998_v17 }
 0x49c   :  { %v4012_v33 = vpop.permute.xlu0 %4011 }
 0x49d   :  { %v4016_v39 = vsub.f32 %v3954_v50, %v4012_v33 }
 0x49e   :  { %v4010_v57 = vpop.permute.xlu1 %4009 }
 0x49f   :  { %4048 = vperm.xlu1 %10110, %v4016_v39   ;;  %10115 = vset.pattern.permute.xlu0 %v10201_v36 }
 0x4a0   :  { %v4024_v29 = vpop.permute.xlu0 %4023 }
 0x4a1   :  { %v4028_v46 = vsub.f32 %v10649_v10, %v4024_v29  ;;  %v4015_v10 = vsub.f32 %v3953_v60, %v4010_v57 }
 0x4a2   :  { %v4022_v47 = vpop.permute.xlu1 %4021 }
 0x4a3   :  { %v4027_v53 = vsub.f32 %v10658_v7, %v4022_v47  ;;  %10111 = vset.pattern.permute.xlu1 %v10201_v36 }
 0x4a4   :  { %4062 = vperm.xlu1 %10111, %v4028_v46  }
 0x4a5   :  { %4057 = vperm.xlu0 %10115, %v4027_v53  }
 0x4a8   :  { %10112 = vset.pattern.permute.xlu1 %v11230_v6 }
 0x4a9   :  { %4031 = vperm.xlu1 %10112, %v4003_v25   ;;  %10116 = vset.pattern.permute.xlu0 %v11227_v43 }
 0x4aa   :  { %4076 = vperm.xlu0 %10116, %v3992_v0  }
 0x4ad   :  { %10113 = vset.pattern.permute.xlu1 %v11229_v28 }
 0x4ae   :  { %4043 = vperm.xlu1 %10113, %v4015_v10  }
 0x4b2   :  { %10114 = vset.pattern.permute.xlu1 %v11227_v43 }
 0x4b3   :  { %4071 = vperm.xlu1 %10114, %v3991_v37  }
 0x4b7   :  { %10117 = vset.pattern.permute.xlu1 %v11230_v6 }
 0x4c8   :  { %4090 = vxpose.xlu0.b32.start [1/2] (short) (narrow) %v10481_v40, 16 }
 0x4cc   :  { %4091 = vxpose.xlu0.b32.end [2/2] (short) (narrow) %v10478_v38, 16 }
 0x4f5   :  { %10121 = vset.pattern.permute.xlu0 %v10201_v36 }
 0x51a   :  { %v4037_v7 = vpop.permute.xlu0 %4036 }
 0x51b   :  { %v4040_v63 = vmul.f32 %v10529_v34, %v4037_v7 }
 0x51e   :  { %v4049_v45 = vpop.permute.xlu1 %4048 }
 0x51f   :  { %v4052_v19 = vmul.f32 %v10537_v4, %v4049_v45 }
 0x521   :  { %v4054_v0 = vadd.f32 %v4052_v19, %v4040_v63 }
 0x523   :  { %v4063_v56 = vpop.permute.xlu1 %4062 }
 0x524   :  { %v4058_v14 = vpop.permute.xlu0 %4057  ;;  %v4066_v1 = vmul.f32 %v10541_v20, %v4063_v56 }
 0x525   :  { %v4065_v61 = vmul.f32 %v10541_v20, %v4058_v14 }
 0x526   :  { %v4068_v37 = vadd.f32 %v4066_v1, %v4054_v0 }
 0x528   :  { %v4032_v21 = vpop.permute.xlu1 %4031 }
 0x529   :  { %v4077_v2 = vpop.permute.xlu0 %4076  ;;  %v4039_v58 = vmul.f32 %v10529_v34, %v4032_v21 }
 0x52a   :  { %v4080_v24 = vmul.f32 %v10551_v35, %v4077_v2 }
 0x52c   :  { %v4082_v5 = vadd.f32 %v4080_v24, %v4068_v37 }
 0x52d   :  { %v4044_v51 = vpop.permute.xlu1 %4043 }
 0x52e   :  { %v4084_v3 = vsub.f32 %v4082_v5, %v63_v54  ;;  %v4051_v55 = vmul.f32 %v10537_v4, %v4044_v51 }
 0x530   :  { %v4087_v23 = vmul.f32 %v4085_v18, %v4084_v3  ;;  %v4053_v62 = vadd.f32 %v4051_v55, %v4039_v58  ;;  %v10174_v58 = vld [vmem:[%s11215_s3] sm:$0xff]  ;;  %v10175_v3 = vld [vmem:[%s11215_s3 + $0x8] sm:$0xff] }
 0x532   :  { %v10727_v31 = vadd.f32 %v4087_v23, %v63_v54  ;;  %v4067_v42 = vadd.f32 %v4065_v61, %v4053_v62  ;;  %v4072_v30 = vpop.permute.xlu1 %4071 }
 0x533   :  { %v4079_v41 = vmul.f32 %v10551_v35, %v4072_v30 }
 0x534   :  { %8653 = vst.msk [vmem:[%s11219_s7 + $0x8] sm:$0xff] %vm7106_vm7, %v10727_v31  ;;  %4637 = vperm.xlu1 %10117, %v10727_v31   ;;  %v4132_v52 = vand.u32 4294901760, %v10727_v31 }
 0x535   :  { %v4081_v59 = vadd.f32 %v4079_v41, %v4067_v42 }
 0x536   :  { %v4224_v33 = vsub.f32 %v10727_v31, %v4132_v52 }
 0x538   :  { %10118 = vset.pattern.permute.xlu1 %v11229_v28  ;;  %v4225_v29 = vand.u32 4294901760, %v4224_v33 }
 0x539   :  { %5157 = vperm.xlu1 %10118, %v10727_v31  }
 0x53a   :  { %v4226_v53 = vsub.f32 %v4224_v33, %v4225_v29 }
 0x53b   :  { %v62_v11 = vld [vmem:[%s11216_s4] sm:$0xff] }
 0x53c   :  { %v4083_v17 = vsub.f32 %v4081_v59, %v62_v11  ;;  %v4227_v60 = vand.u32 4294901760, %v4226_v53 }
 0x53d   :  { %10119 = vset.pattern.permute.xlu1 %v11230_v6 }
 0x53e   :  { %v4086_v50 = vmul.f32 %v4085_v18, %v4083_v17 }
 0x540   :  { %v10743_v39 = vadd.f32 %v4086_v50, %v62_v11 }
 0x542   :  { %8652 = vst.msk [vmem:[%s11219_s7] sm:$0xff] %vm7106_vm7, %v10743_v39  ;;  %5666 = vperm.xlu0 %10121, %v10743_v39   ;;  %v4129_v57 = vand.u32 4294901760, %v10743_v39  ;;  %4632 = vperm.xlu1 %10119, %v10743_v39  }
 0x544   :  { %v9760_v46 = vpack.c.bf16 %v4132_v52, %v4129_v57  ;;  %v4217_v47 = vsub.f32 %v10743_v39, %v4129_v57 }
 0x546   :  { %10123 = vset.pattern.permute.xlu0 %v11227_v43  ;;  %9761 = vmatprep.subr.bf16.mxu0 %v9760_v46  ;;  %v4218_v49 = vand.u32 4294901760, %v4217_v47  ;;  %v9768_v18 = vpack.c.bf16 %v4224_v33, %v4217_v47 }
 0x547   :  { %6179 = vperm.xlu0 %10123, %v10743_v39   ;;  %10120 = vset.pattern.permute.xlu1 %v11229_v28 }
 0x548   :  { %9763 = vmatpush3.bf16.msra.mxu0 %v9760_v46  ;;  %5153 = vperm.xlu1 %10120, %v10743_v39   ;;  %v4219_v32 = vsub.f32 %v4217_v47, %v4218_v49  ;;  %v4106_v45 = vpop.trf.xlu0  ;;  %v9776_v51 = vpack.c.bf16 %v4225_v29, %v4218_v49 }
 0x549   :  { %v4123_v7 = vsel %vm132_vm2, %v4106_v45, 0 }
 0x54a   :  { %v4220_v25 = vand.u32 4294901760, %v4219_v32  ;;  %v4195_v56 = vand.u32 4294901760, %v4123_v7 }
 0x54b   :  { %6183 = vperm.xlu0 %10123, %v10727_v31  }
 0x54c   :  { %v9764_v10 = vpack.c.bf16 %v4227_v60, %v4220_v25  ;;  %v4196_v19 = vsub.f32 %v4123_v7, %v4195_v56  ;;  %v4107_v14 = vpop.trf.xlu0 }
 0x54d   :  { %v4126_v63 = vsel %vm132_vm2, %v4107_v14, 0 }
 0x54e   :  { %9765 = vmatprep.subr.bf16.mxu0 %v9764_v10  ;;  %v4197_v1 = vand.u32 4294901760, %v4196_v19  ;;  %v4205_v0 = vand.u32 4294901760, %v4126_v63 }
 0x54f   :  { %10124 = vset.pattern.permute.xlu0 %v11230_v6 }
 0x550   :  { %v4206_v21 = vsub.f32 %v4126_v63, %v4205_v0  ;;  %v4198_v2 = vsub.f32 %v4196_v19, %v4197_v1 }
 0x552   :  { %v4207_v37 = vand.u32 4294901760, %v4206_v21  ;;  %v4199_v24 = vand.u32 4294901760, %v4198_v2 }
 0x554   :  { %v4208_v54 = vsub.f32 %v4206_v21, %v4207_v37  ;;  %9302 = vmatprep.mubr.f32.mxu0 %v4199_v24 }
 0x556   :  { %v4209_v5 = vand.u32 4294901760, %v4208_v54 }
 0x558   :  { %9303 = vmatmul.mubr.f32.vlgmr.msra.gmra.mrb[6].mxu0 %v4209_v5 }
 0x559   :  { %9767 = vmatpush3.bf16.msra.mxu0 %v9764_v10  ;;  %9309 = vmatprep.mubr.f32.mxu0 %v4195_v56 }
 0x55a   :  { %9769 = vmatprep.subr.bf16.mxu0 %v9768_v18 }
 0x560   :  { %9310 = vmatmul.mubr.f32.vlgmr.msra.gmra.mrb[6].mxu0 %v4205_v0 }
 0x561   :  { %9771 = vmatpush3.bf16.msra.mxu0 %v9768_v18  ;;  %9316 = vmatprep.mubr.f32.mxu0 %v4196_v19 }
 0x562   :  { %9773 = vmatprep.subr.bf16.mxu0 %v9760_v46 }
 0x568   :  { %9317 = vmatmul.mubr.f32.vlgmr.msra.gmra.mrb[6].mxu0 %v4206_v21 }
 0x569   :  { %9775 = vmatpush3.bf16.msra.mxu0 %v9760_v46  ;;  %9323 = vmatprep.mubr.f32.mxu0 %v4197_v1 }
 0x56a   :  { %9777 = vmatprep.subr.bf16.mxu0 %v9776_v51 }
 0x570   :  { %9324 = vmatmul.mubr.f32.vlgmr.msra.gmra.mrb[6].mxu0 %v4207_v37 }
 0x571   :  { %67 = vxpose.xlu1.b32.start [1/2] (short) (narrow) %v10174_v58, 16  ;;  %9779 = vmatpush3.bf16.msra.mxu0 %v9776_v51 }
 0x572   :  { %9330 = vmatprep.mubr.f32.mxu0 %v4195_v56  ;;  %9781 = vmatprep.subr.bf16.mxu0 %v9760_v46 }
 0x575   :  { %68 = vxpose.xlu1.b32.end [2/2] (short) (narrow) %v10175_v3, 16 }
 0x578   :  { %9331 = vmatmul.mubr.f32.vlgmr.msra.gmra.mrb[6].mxu0 %v4205_v0 }
 0x579   :  { %9783 = vmatpush3.bf16.msra.mxu0 %v9760_v46  ;;  %9337 = vmatprep.mubr.f32.mxu0 %v4195_v56 }
 0x580   :  { %9338 = vmatmul.mubr.f32.vlgmr.msra.gmra.mrb[6].mxu0 %v4205_v0 }
 0x593   :  { %10122 = vset.pattern.permute.xlu1 %v10201_v36 }
 0x594   :  { %5670 = vperm.xlu1 %10122, %v10727_v31  }
 0x598   :  { %10125 = vset.pattern.permute.xlu1 %v11230_v6 }
 0x5b3   :  { %v4638_v55 = vpop.permute.xlu1 %4637 }
 0x5b4   :  { %v4641_v61 = vmul.f32 %v4638_v55, %v10727_v31 }
 0x5b6   :  { %v4654_v23 = vand.u32 4294901760, %v4641_v61 }
 0x5b8   :  { %v5158_v62 = vpop.permute.xlu1 %5157  ;;  %v4746_v30 = vsub.f32 %v4641_v61, %v4654_v23 }
 0x5b9   :  { %v5161_v42 = vmul.f32 %v5158_v62, %v10727_v31 }
 0x5ba   :  { %v4747_v52 = vand.u32 4294901760, %v4746_v30 }
 0x5bb   :  { %v5167_v41 = vand.u32 4294901760, %v5161_v42 }
 0x5bc   :  { %v4748_v49 = vsub.f32 %v4746_v30, %v4747_v52 }
 0x5bd   :  { %v5259_v50 = vsub.f32 %v5161_v42, %v5167_v41 }
 0x5be   :  { %v4749_v56 = vand.u32 4294901760, %v4748_v49 }
 0x5bf   :  { %v5260_v53 = vand.u32 4294901760, %v5259_v50 }
 0x5c1   :  { %v4633_v11 = vpop.permute.xlu1 %4632  ;;  %v5261_v14 = vsub.f32 %v5259_v50, %v5260_v53 }
 0x5c2   :  { %v4640_v59 = vmul.f32 %v4633_v11, %v10743_v39 }
 0x5c3   :  { %v5262_v2 = vand.u32 4294901760, %v5261_v14 }
 0x5c4   :  { %v4651_v17 = vand.u32 4294901760, %v4640_v59 }
 0x5c6   :  { %v10775_v33 = vpack.c.bf16 %v4654_v23, %v4651_v17  ;;  %v4739_v57 = vsub.f32 %v4640_v59, %v4651_v17  ;;  %v5667_v17 = vpop.permute.xlu0 %5666 }
 0x5c7   :  { %v5154_v29 = vpop.permute.xlu1 %5153 }
 0x5c8   :  { %v5160_v46 = vmul.f32 %v5154_v29, %v10743_v39  ;;  %v4740_v47 = vand.u32 4294901760, %v4739_v57  ;;  %9785 = vmatprep.subr.bf16.mxu1 %v10775_v33  ;;  %v9792_v59 = vpack.c.bf16 %v4746_v30, %v4739_v57 }
 0x5c9   :  { %9787 = vmatpush3.bf16.msra.mxu1 %v10775_v33 }
 0x5ca   :  { %v5164_v32 = vand.u32 4294901760, %v5160_v46  ;;  %v4741_v25 = vsub.f32 %v4739_v57, %v4740_v47  ;;  %v10780_v60 = vpack.c.bf16 %v4747_v52, %v4740_v47  ;;  %v6180_v29 = vpop.permute.xlu0 %6179  ;;  %v5673_v57 = vmul.f32 %v5667_v17, %v10743_v39 }
 0x5cb   :  { %v6186_v47 = vmul.f32 %v6180_v29, %v10743_v39 }
 0x5cc   :  { %v10782_v10 = vpack.c.bf16 %v5167_v41, %v5164_v32  ;;  %v5252_v45 = vsub.f32 %v5160_v46, %v5164_v32  ;;  %v4742_v7 = vand.u32 4294901760, %v4741_v25  ;;  %v5677_v25 = vand.u32 4294901760, %v5673_v57 }
 0x5ce   :  { %v5253_v19 = vand.u32 4294901760, %v5252_v45  ;;  %9809 = vmatprep.subr.bf16.mxu0 %v10782_v10  ;;  %v9788_v63 = vpack.c.bf16 %v4749_v56, %v4742_v7  ;;  %v9816_v52 = vpack.c.bf16 %v5259_v50, %v5252_v45  ;;  %v6184_v30 = vpop.permute.xlu0 %6183 }
 0x5cf   :  { %9811 = vmatpush3.bf16.msra.mxu0 %v10782_v10  ;;  %v6187_v50 = vmul.f32 %v6184_v30, %v10727_v31  ;;  %v11231_v30 = vmov 0.0  }
 0x5d0   :  { %v5254_v1 = vsub.f32 %v5252_v45, %v5253_v19  ;;  %v10786_v0 = vpack.c.bf16 %v5260_v53, %v5253_v19  ;;  %9789 = vmatprep.subr.bf16.mxu1 %v9788_v63  ;;  %v6190_v45 = vand.u32 4294901760, %v6186_v47  ;;  %v5765_v19 = vsub.f32 %v5673_v57, %v5677_v25 }
 0x5d1   :  { %v6193_v53 = vand.u32 4294901760, %v6187_v50 }
 0x5d2   :  { %v5255_v21 = vand.u32 4294901760, %v5254_v1  ;;  %v6278_v14 = vsub.f32 %v6186_v47, %v6190_v45 }
 0x5d3   :  { %v10842_v56 = vsub.f32 %v6187_v50, %v6193_v53 }
 0x5d4   :  { %v9812_v37 = vpack.c.bf16 %v5262_v2, %v5255_v21  ;;  %v5766_v21 = vand.u32 4294901760, %v5765_v19  ;;  %v6279_v2 = vand.u32 4294901760, %v6278_v14 }
 0x5d5   :  { %v6286_v1 = vand.u32 4294901760, %v10842_v56  ;;  %v9864_v17 = vpack.c.bf16 %v10842_v56, %v6278_v14 }
 0x5d6   :  { %9813 = vmatprep.subr.bf16.mxu0 %v9812_v37 }
 0x5f1   :  { %v83_v24 = vpop.trf.xlu1 }
 0x5f2   :  { %v4645_v54 = vsel %vm132_vm2, %v83_v24, 0  ;;  %v6287_v24 = vsub.f32 %v10842_v56, %v6286_v1 }
 0x5f3   :  { %v10789_v5 = vand.u32 4294901760, %v4645_v54 }
 0x5f5   :  { %v10792_v18 = vsub.f32 %v4645_v54, %v10789_v5  ;;  %v84_v51 = vpop.trf.xlu1  ;;  %v5767_v54 = vsub.f32 %v5765_v19, %v5766_v21 }
 0x5f6   :  { %v4648_v58 = vsel %vm132_vm2, %v84_v51, 0  ;;  %v6280_v51 = vsub.f32 %v6278_v14, %v6279_v2 }
 0x5f7   :  { %v10796_v3 = vand.u32 4294901760, %v10792_v18  ;;  %v10798_v55 = vand.u32 4294901760, %v4648_v58 }
 0x5f9   :  { %v10801_v61 = vsub.f32 %v4648_v58, %v10798_v55  ;;  %v4720_v23 = vsub.f32 %v10792_v18, %v10796_v3 }
 0x5fb   :  { %v10806_v62 = vand.u32 4294901760, %v10801_v61  ;;  %v10808_v42 = vand.u32 4294901760, %v4720_v23  ;;  %v6288_v23 = vand.u32 4294901760, %v6287_v24 }
 0x5fd   :  { %9344 = vmatprep.mubr.f32.mxu1 %v10808_v42  ;;  %9386 = vmatprep.mubr.f32.mxu0 %v10808_v42  ;;  %v4730_v41 = vsub.f32 %v10801_v61, %v10806_v62 }
 0x5ff   :  { %v10814_v11 = vand.u32 4294901760, %v4730_v41  ;;  %v5768_v41 = vand.u32 4294901760, %v5767_v54 }
 0x601   :  { %9345 = vmatmul.mubr.f32.vlgmr.msra.gmra.mrb[8].mxu1 %v10814_v11  ;;  %9387 = vmatmul.mubr.f32.vlgmr.msra.gmra.mrb[8].mxu0 %v10814_v11 }
 0x602   :  { %9791 = vmatpush3.bf16.msra.mxu1 %v9788_v63  ;;  %9815 = vmatpush3.bf16.msra.mxu0 %v9812_v37 }
 0x603   :  { %9351 = vmatprep.mubr.f32.mxu1 %v10789_v5  ;;  %9793 = vmatprep.subr.bf16.mxu1 %v9792_v59 }
 0x604   :  { %9393 = vmatprep.mubr.f32.mxu0 %v10789_v5  ;;  %9817 = vmatprep.subr.bf16.mxu0 %v9816_v52 }
 0x609   :  { %9352 = vmatmul.mubr.f32.vlgmr.msra.gmra.mrb[8].mxu1 %v10798_v55  ;;  %9394 = vmatmul.mubr.f32.vlgmr.msra.gmra.mrb[8].mxu0 %v10798_v55 }
 0x60a   :  { %9795 = vmatpush3.bf16.msra.mxu1 %v9792_v59  ;;  %9819 = vmatpush3.bf16.msra.mxu0 %v9816_v52  ;;  %v6281_v59 = vand.u32 4294901760, %v6280_v51 }
 0x60b   :  { %9358 = vmatprep.mubr.f32.mxu1 %v10792_v18  ;;  %9797 = vmatprep.subr.bf16.mxu1 %v10775_v33 }
 0x60c   :  { %9400 = vmatprep.mubr.f32.mxu0 %v10792_v18  ;;  %9821 = vmatprep.subr.bf16.mxu0 %v10782_v10 }
 0x611   :  { %9359 = vmatmul.mubr.f32.vlgmr.msra.gmra.mrb[8].mxu1 %v10801_v61  ;;  %9401 = vmatmul.mubr.f32.vlgmr.msra.gmra.mrb[8].mxu0 %v10801_v61 }
 0x612   :  { %9799 = vmatpush3.bf16.msra.mxu1 %v10775_v33  ;;  %9823 = vmatpush3.bf16.msra.mxu0 %v10782_v10 }
 0x613   :  { %9365 = vmatprep.mubr.f32.mxu1 %v10796_v3  ;;  %9801 = vmatprep.subr.bf16.mxu1 %v10780_v60  ;;  %v5671_v46 = vpop.permute.xlu1 %5670 }
 0x614   :  { %9407 = vmatprep.mubr.f32.mxu0 %v10796_v3  ;;  %9825 = vmatprep.subr.bf16.mxu0 %v10786_v0  ;;  %v5674_v49 = vmul.f32 %v5671_v46, %v10727_v31 }
 0x616   :  { %v5680_v32 = vand.u32 4294901760, %v5674_v49 }
 0x618   :  { %v10838_v7 = vsub.f32 %v5674_v49, %v5680_v32  ;;  %v10857_v37 = vpack.c.bf16 %v5680_v32, %v5677_v25 }
 0x619   :  { %9366 = vmatmul.mubr.f32.vlgmr.msra.gmra.mrb[8].mxu1 %v10806_v62  ;;  %9408 = vmatmul.mubr.f32.vlgmr.msra.gmra.mrb[8].mxu0 %v10806_v62 }
 0x61a   :  { %9803 = vmatpush3.bf16.msra.mxu1 %v10780_v60  ;;  %9827 = vmatpush3.bf16.msra.mxu0 %v10786_v0  ;;  %v5773_v63 = vand.u32 4294901760, %v10838_v7  ;;  %v10855_v0 = vpack.c.bf16 %v6193_v53, %v6190_v45  ;;  %v9840_v52 = vpack.c.bf16 %v10838_v7, %v5765_v19 }
 0x61b   :  { %9372 = vmatprep.mubr.f32.mxu1 %v10789_v5  ;;  %9805 = vmatprep.subr.bf16.mxu1 %v10775_v33 }
 0x61c   :  { %9414 = vmatprep.mubr.f32.mxu0 %v10789_v5  ;;  %9829 = vmatprep.subr.bf16.mxu0 %v10782_v10  ;;  %v5774_v60 = vsub.f32 %v10838_v7, %v5773_v63 }
 0x61e   :  { %v5775_v58 = vand.u32 4294901760, %v5774_v60 }
 0x621   :  { %9373 = vmatmul.mubr.f32.vlgmr.msra.gmra.mrb[8].mxu1 %v10798_v55  ;;  %9415 = vmatmul.mubr.f32.vlgmr.msra.gmra.mrb[8].mxu0 %v10798_v55 }
 0x622   :  { %9807 = vmatpush3.bf16.msra.mxu1 %v10775_v33  ;;  %9831 = vmatpush3.bf16.msra.mxu0 %v10782_v10  ;;  %v9836_v33 = vpack.c.bf16 %v5775_v58, %v5768_v41  ;;  %v9860_v10 = vpack.c.bf16 %v6288_v23, %v6281_v59 }
 0x623   :  { %9379 = vmatprep.mubr.f32.mxu1 %v10789_v5  ;;  %9421 = vmatprep.mubr.f32.mxu0 %v10789_v5 }
 0x624   :  { %9833 = vmatprep.subr.bf16.mxu1 %v10857_v37  ;;  %9857 = vmatprep.subr.bf16.mxu0 %v10855_v0 }
 0x629   :  { %9380 = vmatmul.mubr.f32.vlgmr.msra.gmra.mrb[8].mxu1 %v10798_v55  ;;  %9422 = vmatmul.mubr.f32.vlgmr.msra.gmra.mrb[8].mxu0 %v10798_v55 }
 0x62a   :  { %9835 = vmatpush3.bf16.msra.mxu1 %v10857_v37  ;;  %9859 = vmatpush3.bf16.msra.mxu0 %v10855_v0 }
 0x62b   :  { %9428 = vmatprep.mubr.f32.mxu1 %v10808_v42  ;;  %9837 = vmatprep.subr.bf16.mxu1 %v9836_v33 }
 0x62c   :  { %9470 = vmatprep.mubr.f32.mxu0 %v10808_v42  ;;  %9861 = vmatprep.subr.bf16.mxu0 %v9860_v10  ;;  %v9848_v42 = vpack.c.bf16 %v5773_v63, %v5766_v21 }
 0x62d   :  { %9429 = vmatmul.mubr.f32.vlgmr.msra.gmra.mrb[10].mxu1 %v10814_v11  ;;  %9471 = vmatmul.mubr.f32.vlgmr.msra.gmra.mrb[10].mxu0 %v10814_v11  ;;  %v9872_v11 = vpack.c.bf16 %v6286_v1, %v6279_v2 }
 0x62e   :  { %9839 = vmatpush3.bf16.msra.mxu1 %v9836_v33  ;;  %9863 = vmatpush3.bf16.msra.mxu0 %v9860_v10 }
 0x62f   :  { %9435 = vmatprep.mubr.f32.mxu1 %v10789_v5  ;;  %9841 = vmatprep.subr.bf16.mxu1 %v9840_v52 }
 0x630   :  { %9477 = vmatprep.mubr.f32.mxu0 %v10789_v5  ;;  %9865 = vmatprep.subr.bf16.mxu0 %v9864_v17 }
 0x635   :  { %9436 = vmatmul.mubr.f32.vlgmr.msra.gmra.mrb[10].mxu1 %v10798_v55  ;;  %9478 = vmatmul.mubr.f32.vlgmr.msra.gmra.mrb[10].mxu0 %v10798_v55 }
 0x636   :  { %9843 = vmatpush3.bf16.msra.mxu1 %v9840_v52  ;;  %9867 = vmatpush3.bf16.msra.mxu0 %v9864_v17 }
 0x637   :  { %9442 = vmatprep.mubr.f32.mxu1 %v10792_v18  ;;  %9845 = vmatprep.subr.bf16.mxu1 %v10857_v37 }
 0x638   :  { %9484 = vmatprep.mubr.f32.mxu0 %v10792_v18  ;;  %9869 = vmatprep.subr.bf16.mxu0 %v10855_v0  ;;  %v7107_v18 = vsel %vm7106_vm7, %v10743_v39, 0 }
 0x639   :  { %v10892_v29 = vand.u32 4294901760, %v7107_v18 }
 0x63d   :  { %9443 = vmatmul.mubr.f32.vlgmr.msra.gmra.mrb[10].mxu1 %v10801_v61  ;;  %9485 = vmatmul.mubr.f32.vlgmr.msra.gmra.mrb[10].mxu0 %v10801_v61 }
 0x63e   :  { %9847 = vmatpush3.bf16.msra.mxu1 %v10857_v37  ;;  %9871 = vmatpush3.bf16.msra.mxu0 %v10855_v0 }
 0x63f   :  { %9449 = vmatprep.mubr.f32.mxu1 %v10796_v3  ;;  %9849 = vmatprep.subr.bf16.mxu1 %v9848_v42 }
 0x640   :  { %9491 = vmatprep.mubr.f32.mxu0 %v10796_v3  ;;  %9873 = vmatprep.subr.bf16.mxu0 %v9872_v11  ;;  %v10901_v3 = vsub.f32 %v7107_v18, %v10892_v29 }
 0x642   :  { %v11226_v39 = vand.u32 4294901760, %v10901_v3 }
 0x644   :  { %v7187_v61 = vsub.f32 %v10901_v3, %v11226_v39 }
 0x645   :  { %9450 = vmatmul.mubr.f32.vlgmr.msra.gmra.mrb[10].mxu1 %v10806_v62  ;;  %9492 = vmatmul.mubr.f32.vlgmr.msra.gmra.mrb[10].mxu0 %v10806_v62 }
 0x646   :  { %9851 = vmatpush3.bf16.msra.mxu1 %v9848_v42  ;;  %9875 = vmatpush3.bf16.msra.mxu0 %v9872_v11  ;;  %v7188_v62 = vand.u32 4294901760, %v7187_v61 }
 0x647   :  { %9456 = vmatprep.mubr.f32.mxu1 %v10789_v5  ;;  %9853 = vmatprep.subr.bf16.mxu1 %v10857_v37 }
 0x648   :  { %9498 = vmatprep.mubr.f32.mxu0 %v10789_v5  ;;  %9877 = vmatprep.subr.bf16.mxu0 %v10855_v0 }
 0x64d   :  { %9457 = vmatmul.mubr.f32.vlgmr.msra.gmra.mrb[10].mxu1 %v10798_v55  ;;  %9499 = vmatmul.mubr.f32.vlgmr.msra.gmra.mrb[10].mxu0 %v10798_v55 }
 0x64e   :  { %9855 = vmatpush3.bf16.msra.mxu1 %v10857_v37  ;;  %9879 = vmatpush3.bf16.msra.mxu0 %v10855_v0 }
 0x64f   :  { %9463 = vmatprep.mubr.f32.mxu1 %v10789_v5  ;;  %9505 = vmatprep.mubr.f32.mxu0 %v10789_v5  ;;  %v4642_v5 = vstv %s8674_s24 }
 0x650   :  { %9904 = vmatprep.subr.bf16.mxu0 %v11224_v22  ;;  %v4643_v46 = vmul.f32 %v10529_v34, %v4642_v5  ;;  %v5162_v47 = vmul.f32 %v10537_v4, %v4642_v5  ;;  %v5675_v54 = vmul.f32 %v10541_v20, %v4642_v5  ;;  %v6188_v41 = vmul.f32 %v10551_v35, %v4642_v5 }
 0x653   :  { %v10918_v50 = vpop.f32.mrb[6].mxu0 }
 0x654   :  { %v10920_v57 = vpop.f32.mrb[7].mxu0 }
 0x655   :  { %9464 = vmatmul.mubr.f32.vlgmr.msra.gmra.mrb[10].mxu1 %v10798_v55  ;;  %9506 = vmatmul.mubr.f32.vlgmr.msra.gmra.mrb[10].mxu0 %v10798_v55 }
 0x656   :  { %9512 = vmatprep.mubr.f32.mxu1 %v7188_v62  ;;  %9554 = vmatprep.mubr.msk.f32.mxu0 %vm10199_vm1, %v11231_v30 }
 0x6fc   :  { %v9381_v49 = vpop.f32.mrb[8].mxu1  ;;  %v9423_v53 = vpop.f32.mrb[8].mxu0 }
 0x6fd   :  { %v9930_v32 = vadd.f32 %v9381_v49, %v4643_v46  ;;  %v5142_v25 = vpop.f32.mrb[9].mxu1  ;;  %v5655_v45 = vpop.f32.mrb[9].mxu0  ;;  %v9932_v24 = vadd.f32 %v9423_v53, %v5162_v47 }
 0x6fe   :  { %v9931_v55 = vadd.f32 %v5142_v25, %v4643_v46  ;;  %v9933_v7 = vadd.f32 %v5655_v45, %v5162_v47 }
 0x6ff   :  { %v6692_v56 = vmax.f32 %v9930_v32, 1e-20 }
 0x700   :  { %v6691_v19 = vmax.f32 %v9931_v55, 1e-20  ;;  %6717 = vperm.xlu1 %10125, %v9933_v7  }
 0x701   :  { %10154 = vrcp.f32 %v6692_v56 }
 0x702   :  { %10156 = vrcp.f32 %v6691_v19 }
 0x70b   :  { %v10155_v14 = vpop.eup %10154 }
 0x70c   :  { %v10157_v63 = vpop.eup %10156  ;;  %v6696_v1 = vmul.f32 %v10155_v14, %v6692_v56 }
 0x70d   :  { %v6695_v21 = vmul.f32 %v10157_v63, %v6691_v19 }
 0x70e   :  { %v6698_v2 = vsub.f32 2.0, %v6696_v1 }
 0x70f   :  { %v6697_v60 = vsub.f32 2.0, %v6695_v21 }
 0x710   :  { %v6700_v0 = vmul.f32 %v10155_v14, %v6698_v2 }
 0x711   :  { %v6699_v37 = vmul.f32 %v10157_v63, %v6697_v60 }
 0x712   :  { %6708 = vperm.xlu0 %10124, %v6700_v0   ;;  %v10933_v52 = vmul.f32 %v10918_v50, %v6700_v0 }
 0x713   :  { %6703 = vperm.xlu1 %10125, %v6699_v37   ;;  %v10938_v42 = vmul.f32 %v6699_v37, %v10920_v57 }
 0x714   :  { %v6730_v18 = vmul.f32 %v9932_v24, %v10933_v52 }
 0x715   :  { %v6729_v61 = vmul.f32 %v9933_v7, %v10938_v42 }
 0x717   :  { %6722 = vperm.xlu1 %10125, %v9932_v24  }
 0x728   :  { %v9465_v51 = vpop.f32.mrb[10].mxu1  ;;  %v9507_v58 = vpop.f32.mrb[10].mxu0 }
 0x729   :  { %v10925_v23 = vadd.f32 %v9465_v51, %v5675_v54  ;;  %v6168_v59 = vpop.f32.mrb[11].mxu1  ;;  %v6681_v33 = vpop.f32.mrb[11].mxu0  ;;  %v10935_v17 = vadd.f32 %v9507_v58, %v6188_v41 }
 0x72a   :  { %v10928_v10 = vadd.f32 %v6168_v59, %v5675_v54  ;;  %v10940_v11 = vadd.f32 %v6681_v33, %v6188_v41 }
 0x72b   :  { %6748 = vperm.xlu1 %10125, %v10925_v23  }
 0x72c   :  { %6743 = vperm.xlu0 %10124, %v10928_v10  }
 0x72f   :  { %6774 = vperm.xlu1 %10125, %v10935_v17  }
 0x730   :  { %6769 = vperm.xlu0 %10124, %v10940_v11  }
 0x733   :  { %6735 = vrot.lane.b32.xlu1 %v6730_v18, %s10203_s30 }
 0x734   :  { %6733 = vrot.lane.b32.xlu0 %v6729_v61, %s10203_s30  ;;  %10126 = vset.pattern.permute.xlu1 %v11229_v28 }
 0x735   :  { %10127 = vset.pattern.permute.xlu0 %v11229_v28 }
 0x77f   :  { %v6718_v62 = vpop.permute.xlu1 %6717 }
 0x791   :  { %v6709_v5 = vpop.permute.xlu0 %6708 }
 0x792   :  { %v6704_v46 = vpop.permute.xlu1 %6703  ;;  %v10952_v49 = vmul.f32 %v9930_v32, %v6709_v5 }
 0x793   :  { %v10950_v47 = vmul.f32 %v9931_v55, %v6704_v46 }
 0x795   :  { %v6725_v53 = vmul.f32 %v6718_v62, %v10950_v47 }
 0x796   :  { %v6723_v25 = vpop.permute.xlu1 %6722 }
 0x797   :  { %v6726_v45 = vmul.f32 %v6723_v25, %v10952_v49  ;;  %v6727_v56 = vsub.f32 %v9933_v7, %v6725_v53 }
 0x799   :  { %v6728_v19 = vsub.f32 %v9932_v24, %v6726_v45  ;;  %v6793_v14 = vmax.f32 %v6727_v56, 1e-20 }
 0x79b   :  { %v6794_v63 = vmax.f32 %v6728_v19, 1e-20  ;;  %10158 = vrcp.f32 %v6793_v14 }
 0x79d   :  { %10160 = vrcp.f32 %v6794_v63 }
 0x7a5   :  { %v10159_v1 = vpop.eup %10158 }
 0x7a6   :  { %v6797_v21 = vmul.f32 %v10159_v1, %v6793_v14 }
 0x7a7   :  { %v10161_v2 = vpop.eup %10160 }
 0x7a8   :  { %v6798_v60 = vmul.f32 %v10161_v2, %v6794_v63  ;;  %v6799_v0 = vsub.f32 2.0, %v6797_v21  ;;  %v6756_v63 = vmul.f32 %v10925_v23, %v10933_v52 }
 0x7aa   :  { %v6800_v55 = vsub.f32 2.0, %v6798_v60  ;;  %v6749_v37 = vpop.permute.xlu1 %6748  ;;  %v6801_v32 = vmul.f32 %v10159_v1, %v6799_v0  ;;  %v6755_v1 = vmul.f32 %v10928_v10, %v10938_v42 }
 0x7ab   :  { %v6752_v54 = vmul.f32 %v6749_v37, %v10952_v49  ;;  %v6744_v51 = vpop.permute.xlu0 %6743 }
 0x7ac   :  { %v6751_v58 = vmul.f32 %v6744_v51, %v10950_v47  ;;  %6805 = vperm.xlu0 %10127, %v6801_v32   ;;  %v6802_v7 = vmul.f32 %v10161_v2, %v6800_v55 }
 0x7ad   :  { %v6754_v24 = vsub.f32 %v10925_v23, %v6752_v54 }
 0x7ae   :  { %6810 = vperm.xlu1 %10126, %v6802_v7   ;;  %v6775_v41 = vpop.permute.xlu1 %6774  ;;  %v6753_v18 = vsub.f32 %v10928_v10, %v6751_v58 }
 0x7af   :  { %v6778_v59 = vmul.f32 %v6775_v41, %v10952_v49  ;;  %v6770_v33 = vpop.permute.xlu0 %6769 }
 0x7b0   :  { %v6777_v61 = vmul.f32 %v6770_v33, %v10950_v47  ;;  %6850 = vperm.xlu0 %10127, %v6754_v24  }
 0x7b1   :  { %v10963_v62 = vsub.f32 %v10935_v17, %v6778_v59 }
 0x7b2   :  { %6845 = vperm.xlu1 %10126, %v6753_v18   ;;  %v6736_v5 = vpop.permute.xlu1 %6735  ;;  %v10966_v46 = vsub.f32 %v10940_v11, %v6777_v61 }
 0x7b3   :  { %v6734_v53 = vpop.permute.xlu0 %6733  ;;  %v6740_v25 = vsub.f32 %v10918_v50, %v6736_v5 }
 0x7b4   :  { %6876 = vperm.xlu0 %10127, %v10963_v62   ;;  %v6739_v45 = vsub.f32 %v10920_v57, %v6734_v53 }
 0x7b5   :  { %v10973_v14 = vmul.f32 %v6802_v7, %v6740_v25 }
 0x7b6   :  { %6871 = vperm.xlu1 %10126, %v10966_v46   ;;  %v10980_v21 = vmul.f32 %v6801_v32, %v6739_v45 }
 0x7b7   :  { %v6858_v2 = vmul.f32 %v10973_v14, %v6754_v24 }
 0x7b8   :  { %6824 = vperm.xlu0 %10127, %v10952_v49   ;;  %v6857_v60 = vmul.f32 %v10980_v21, %v6753_v18 }
 0x7ba   :  { %6819 = vperm.xlu1 %10126, %v10950_v47  }
 0x7bc   :  { %6761 = vrot.lane.b32.xlu0 %v6756_v63, %s10204_s10 }
 0x7bd   :  { %10128 = vset.pattern.permute.xlu0 %v10201_v36 }
 0x7be   :  { %6759 = vrot.lane.b32.xlu1 %v6755_v1, %s10204_s10 }
 0x7bf   :  { %10129 = vset.pattern.permute.xlu1 %v10201_v36 }
 0x7c0   :  { %6863 = vrot.lane.b32.xlu0 %v6858_v2, %s10203_s30 }
 0x7c2   :  { %6861 = vrot.lane.b32.xlu1 %v6857_v60, %s10203_s30 }
 0x82b   :  { %v6806_v23 = vpop.permute.xlu0 %6805 }
 0x82c   :  { %v10992_v37 = vmul.f32 %v6806_v23, %v6727_v56 }
 0x82d   :  { %v6811_v10 = vpop.permute.xlu1 %6810 }
 0x82e   :  { %v10990_v0 = vmul.f32 %v6811_v10, %v6728_v19 }
 0x82f   :  { %v6851_v55 = vpop.permute.xlu0 %6850 }
 0x830   :  { %v6854_v32 = vmul.f32 %v6851_v55, %v10990_v0 }
 0x831   :  { %v6846_v54 = vpop.permute.xlu1 %6845 }
 0x832   :  { %v10995_v51 = vsub.f32 %v6754_v24, %v6854_v32  ;;  %v6853_v58 = vmul.f32 %v6846_v54, %v10992_v37 }
 0x833   :  { %v6877_v53 = vpop.permute.xlu0 %6876 }
 0x834   :  { %v6896_v7 = vmax.f32 %v10995_v51, 1e-20  ;;  %v10999_v41 = vsub.f32 %v6753_v18, %v6853_v58  ;;  %v6880_v60 = vmul.f32 %v6877_v53, %v10990_v0  ;;  %v6883_v53 = vmul.f32 %v10980_v21, %v10966_v46 }
 0x835   :  { %v6872_v59 = vpop.permute.xlu1 %6871 }
 0x836   :  { %10162 = vrcp.f32 %v6896_v7  ;;  %v6895_v33 = vmax.f32 %v10999_v41, 1e-20  ;;  %v6879_v19 = vmul.f32 %v6872_v59, %v10992_v37  ;;  %v6882_v54 = vsub.f32 %v10963_v62, %v6880_v60 }
 0x837   :  { %v6825_v10 = vpop.permute.xlu0 %6824 }
 0x838   :  { %10164 = vrcp.f32 %v6895_v33  ;;  %v11004_v56 = vsub.f32 %v10966_v46, %v6879_v19  ;;  %v6828_v58 = vmul.f32 %v6825_v10, %v10990_v0  ;;  %v6884_v46 = vmul.f32 %v10973_v14, %v10963_v62 }
 0x839   :  { %v6820_v25 = vpop.permute.xlu1 %6819 }
 0x83a   :  { %6973 = vperm.xlu1 %10129, %v11004_v56   ;;  %v6827_v63 = vmul.f32 %v6820_v25, %v10992_v37 }
 0x83b   :  { %v6762_v59 = vpop.permute.xlu0 %6761 }
 0x83c   :  { %v11010_v55 = vsub.f32 %v10950_v47, %v6827_v63 }
 0x83d   :  { %v6760_v32 = vpop.permute.xlu1 %6759 }
 0x83e   :  { %v6765_v19 = vsub.f32 %v10920_v57, %v6760_v32 }
 0x83f   :  { %v6864_v25 = vpop.permute.xlu0 %6863 }
 0x840   :  { %v10163_v24 = vpop.eup %10162 }
 0x841   :  { %v6900_v61 = vmul.f32 %v10163_v24, %v6896_v7  ;;  %v11016_v7 = vsub.f32 %v10952_v49, %v6828_v58 }
 0x842   :  { %v10165_v5 = vpop.eup %10164 }
 0x843   :  { %v6899_v45 = vmul.f32 %v10165_v5, %v6895_v33  ;;  %v6902_v18 = vsub.f32 2.0, %v6900_v61  ;;  %v6862_v33 = vpop.permute.xlu1 %6861 }
 0x844   :  { %v6867_v61 = vsub.f32 %v6765_v19, %v6862_v33 }
 0x845   :  { %v6904_v1 = vmul.f32 %v10163_v24, %v6902_v18  ;;  %v6901_v2 = vsub.f32 2.0, %v6899_v45  ;;  %v6781_v24 = vmul.f32 %v10940_v11, %v10938_v42  ;;  %v6782_v45 = vmul.f32 %v10935_v17, %v10933_v52 }
 0x846   :  { %v6766_v18 = vsub.f32 %v10918_v50, %v6762_v59  ;;  %v6831_v17 = vmul.f32 %v10980_v21, %v10950_v47 }
 0x847   :  { %v6903_v23 = vmul.f32 %v10165_v5, %v6901_v2  ;;  %6912 = vperm.xlu0 %10128, %v6904_v1  }
 0x848   :  { %v6868_v11 = vsub.f32 %v6766_v18, %v6864_v25 }
 0x849   :  { %6907 = vperm.xlu1 %10129, %v6903_v23   ;;  %v11025_v5 = vmul.f32 %v6903_v23, %v6867_v61  ;;  %v6832_v23 = vmul.f32 %v10973_v14, %v10952_v49 }
 0x84a   :  { %v11038_v2 = vmul.f32 %v6904_v1, %v6868_v11 }
 0x84b   :  { %6921 = vperm.xlu0 %10128, %v11010_v55   ;;  %v6985_v63 = vmul.f32 %v11025_v5, %v11004_v56  ;;  %v6933_v1 = vmul.f32 %v11025_v5, %v11010_v55  ;;  %v6959_v62 = vmul.f32 %v11025_v5, %v10992_v37 }
 0x84c   :  { %v6986_v60 = vmul.f32 %v11038_v2, %v6882_v54  ;;  %v6934_v47 = vmul.f32 %v11038_v2, %v11016_v7  ;;  %v6960_v10 = vmul.f32 %v11038_v2, %v10990_v0 }
 0x84d   :  { %6978 = vperm.xlu1 %10129, %v6882_v54  }
 0x84f   :  { %6947 = vperm.xlu0 %10128, %v10992_v37  }
 0x851   :  { %6926 = vperm.xlu1 %10129, %v11016_v7  }
 0x853   :  { %6785 = vrot.lane.b32.xlu0 %v6781_v24, %s10205_s11 }
 0x854   :  { %10131 = vset.pattern.permute.xlu0 %v11229_v28 }
 0x855   :  { %6952 = vperm.xlu1 %10129, %v10990_v0  }
 0x857   :  { %6887 = vrot.lane.b32.xlu0 %v6883_v53, %s10204_s10 }
 0x859   :  { %6787 = vrot.lane.b32.xlu1 %v6782_v45, %s10205_s11 }
 0x85a   :  { %10130 = vset.pattern.permute.xlu1 %v11230_v6 }
 0x85b   :  { %6989 = vrot.lane.b32.xlu0 %v6985_v63, %s10203_s30 }
 0x85d   :  { %6889 = vrot.lane.b32.xlu1 %v6884_v46, %s10204_s10 }
 0x85f   :  { %6835 = vrot.lane.b32.xlu0 %v6831_v17, %s10206_s12 }
 0x861   :  { %6991 = vrot.lane.b32.xlu1 %v6986_v60, %s10203_s30 }
 0x863   :  { %6937 = vrot.lane.b32.xlu0 %v6933_v1, %s10207_s13 }
 0x865   :  { %6837 = vrot.lane.b32.xlu1 %v6832_v23, %s10206_s12 }
 0x867   :  { %6963 = vrot.lane.b32.xlu0 %v6959_v62, %s10206_s12 }
 0x869   :  { %6939 = vrot.lane.b32.xlu1 %v6934_v47, %s10207_s13 }
 0x86d   :  { %6965 = vrot.lane.b32.xlu1 %v6960_v10, %s10206_s12 }
 0x8b9   :  { %v6974_v32 = vpop.permute.xlu1 %6973 }
 0x8c6   :  { %v6913_v58 = vpop.permute.xlu0 %6912 }
 0x8c7   :  { %v6916_v19 = vmul.f32 %v6913_v58, %v10995_v51 }
 0x8c8   :  { %v6908_v49 = vpop.permute.xlu1 %6907 }
 0x8c9   :  { %v6915_v59 = vmul.f32 %v6908_v49, %v10999_v41 }
 0x8ca   :  { %v6922_v33 = vpop.permute.xlu0 %6921 }
 0x8cb   :  { %v6981_v24 = vmul.f32 %v6974_v32, %v6915_v59  ;;  %v6929_v58 = vmul.f32 %v6922_v33, %v6915_v59 }
 0x8cc   :  { %v6979_v61 = vpop.permute.xlu1 %6978 }
 0x8cd   :  { %v6982_v53 = vmul.f32 %v6979_v61, %v6916_v19  ;;  %v6983_v25 = vsub.f32 %v11004_v56, %v6981_v24  ;;  %v6931_v28 = vsub.f32 %v11010_v55, %v6929_v58 }
 0x8ce   :  { %v6948_v45 = vpop.permute.xlu0 %6947 }
 0x8cf   :  { %v6984_v18 = vsub.f32 %v6882_v54, %v6982_v53  ;;  %v6997_v11 = vmax.f32 %v6983_v25, 1e-20 }
 0x8d0   :  { %v6927_v63 = vpop.permute.xlu1 %6926 }
 0x8d1   :  { %v6998_v46 = vmax.f32 %v6984_v18, 1e-20  ;;  %10166 = vrcp.f32 %v6997_v11  ;;  %v6930_v25 = vmul.f32 %v6927_v63, %v6916_v19 }
 0x8d2   :  { %v6786_v17 = vpop.permute.xlu0 %6785 }
 0x8d3   :  { %10168 = vrcp.f32 %v6998_v46  ;;  %v6791_v62 = vsub.f32 %v10920_v57, %v6786_v17  ;;  %v6955_v57 = vmul.f32 %v6948_v45, %v6915_v59  ;;  %v6932_v6 = vsub.f32 %v11016_v7, %v6930_v25 }
 0x8d4   :  { %v6953_v60 = vpop.permute.xlu1 %6952 }
 0x8d6   :  { %v6888_v1 = vpop.permute.xlu0 %6887 }
 0x8d7   :  { %v6893_v49 = vsub.f32 %v6791_v62, %v6888_v1 }
 0x8d8   :  { %v6788_v23 = vpop.permute.xlu1 %6787 }
 0x8d9   :  { %v6792_v32 = vsub.f32 %v10918_v50, %v6788_v23  ;;  %v6956_v50 = vmul.f32 %v6953_v60, %v6916_v19 }
 0x8da   :  { %v6990_v56 = vpop.permute.xlu0 %6989 }
 0x8db   :  { %v10167_v41 = vpop.eup %10166  ;;  %v6995_v18 = vsub.f32 %v6893_v49, %v6990_v56  ;;  %v6958_v63 = vsub.f32 %v10990_v0, %v6956_v50 }
 0x8dc   :  { %v7001_v51 = vmul.f32 %v10167_v41, %v6997_v11  ;;  %v6890_v47 = vpop.permute.xlu1 %6889 }
 0x8dd   :  { %v10169_v10 = vpop.eup %10168  ;;  %v6894_v61 = vsub.f32 %v6792_v32, %v6890_v47 }
 0x8de   :  { %v7002_v54 = vmul.f32 %v10169_v10, %v6998_v46  ;;  %v7003_v24 = vsub.f32 2.0, %v7001_v51  ;;  %v6957_v46 = vsub.f32 %v10992_v37, %v6955_v57  ;;  %v6836_v37 = vpop.permute.xlu0 %6835 }
 0x8e0   :  { %v7004_v53 = vsub.f32 2.0, %v7002_v54  ;;  %v7005_v22 = vmul.f32 %v10167_v41, %v7003_v24  ;;  %v6992_v39 = vpop.permute.xlu1 %6991  ;;  %v11232_v24 = vmov 0  }
 0x8e1   :  { %v6996_v43 = vsub.f32 %v6894_v61, %v6992_v39 }
 0x8e2   :  { %v7007_v11 = vmul.f32 %v7005_v22, %v6995_v18  ;;  %v7006_v17 = vmul.f32 %v10169_v10, %v7004_v53  ;;  %v11233_v53 = vmov 1  }
 0x8e4   :  { %v7008_v23 = vmul.f32 %v7006_v17, %v6996_v43  ;;  %v7009_v33 = vmul.f32 %v7007_v11, %v6931_v28  ;;  %v7021_v39 = vmul.f32 %v7007_v11, %v6957_v46  ;;  %v7033_v22 = vmul.f32 %v7007_v11, %v6915_v59  ;;  %v6838_v28 = vpop.permute.xlu1 %6837 }
 0x8e5   :  { %v6842_v0 = vsub.f32 %v10933_v52, %v6838_v28 }
 0x8e6   :  { %7013 = vrot.lane.b32.xlu0 %v7009_v33, %s10208_s14  ;;  %v7010_v1 = vmul.f32 %v7008_v23, %v6932_v6  ;;  %v7022_v55 = vmul.f32 %v7008_v23, %v6958_v63  ;;  %v7034_v43 = vmul.f32 %v7008_v23, %v6916_v19  ;;  %v6938_v6 = vpop.permute.xlu0 %6937  ;;  %v6841_v19 = vsub.f32 %v10938_v42, %v6836_v37 }
 0x8e7   :  { %v11234_v42 = vmov 3  }
 0x8e8   :  { %7015 = vrot.lane.b32.xlu1 %v7010_v1, %s10208_s14  ;;  %v6940_v7 = vpop.permute.xlu1 %6939  ;;  %v6943_v56 = vsub.f32 %v6841_v19, %v6938_v6  ;;  %v7101_v6 = vstv %s8677_s25 }
 0x8e9   :  { %v6944_v60 = vsub.f32 %v6842_v0, %v6940_v7 }
 0x8ea   :  { %7025 = vrot.lane.b32.xlu0 %v7021_v39, %s10207_s13  ;;  %v6964_v41 = vpop.permute.xlu0 %6963 }
 0x8ec   :  { %7027 = vrot.lane.b32.xlu1 %v7022_v55, %s10207_s13  ;;  %v6966_v45 = vpop.permute.xlu1 %6965 }
 0x8ed   :  { %v6970_v47 = vsub.f32 %v10973_v14, %v6966_v45  ;;  %v6969_v14 = vsub.f32 %v10980_v21, %v6964_v41  ;;  %v10177_v41 = vld [vmem:[%s11217_s5 + $0x8] sm:$0xff] }
 0x8ee   :  { %7037 = vrot.lane.b32.xlu0 %v7033_v22, %s10206_s12 }
 0x8f0   :  { %7039 = vrot.lane.b32.xlu1 %v7034_v43, %s10206_s12 }
 0x958   :  { %v7014_v59 = vpop.permute.xlu0 %7013 }
 0x959   :  { %v7019_v52 = vsub.f32 %v6943_v56, %v7014_v59 }
 0x95a   :  { %v7016_v62 = vpop.permute.xlu1 %7015 }
 0x95b   :  { %v7020_v51 = vsub.f32 %v6944_v60, %v7016_v62 }
 0x95c   :  { %v7026_v49 = vpop.permute.xlu0 %7025 }
 0x95d   :  { %7052 = vperm.xlu1 %10130, %v7020_v51   ;;  %v7031_v61 = vsub.f32 %v6969_v14, %v7026_v49 }
 0x95e   :  { %v7028_v10 = vpop.permute.xlu1 %7027 }
 0x95f   :  { %v7032_v32 = vsub.f32 %v6970_v47, %v7028_v10 }
 0x960   :  { %v7038_v25 = vpop.permute.xlu0 %7037 }
 0x961   :  { %7064 = vperm.xlu0 %10131, %v7032_v32   ;;  %10132 = vset.pattern.permute.xlu1 %v10201_v36  ;;  %v7043_v18 = vsub.f32 %v11025_v5, %v7038_v25 }
 0x962   :  { %v7040_v58 = vpop.permute.xlu1 %7039 }
 0x963   :  { %v7044_v54 = vsub.f32 %v11038_v2, %v7040_v58 }
 0x965   :  { %10133 = vset.pattern.permute.xlu0 %v11232_v24  ;;  %7078 = vperm.xlu1 %10132, %v7044_v54  }
 0x966   :  { %7047 = vperm.xlu0 %10133, %v7019_v52  }
 0x969   :  { %10135 = vset.pattern.permute.xlu1 %v11233_v53 }
 0x96a   :  { %10134 = vset.pattern.permute.xlu0 %v11234_v42  ;;  %7059 = vperm.xlu1 %10135, %v7031_v61  }
 0x96b   :  { %7087 = vperm.xlu0 %10134, %v7007_v11  }
 0x96e   :  { %10136 = vset.pattern.permute.xlu1 %v10201_v36 }
 0x96f   :  { %7073 = vperm.xlu1 %10136, %v7043_v18  }
 0x973   :  { %10137 = vset.pattern.permute.xlu1 %v11234_v42 }
 0x974   :  { %7092 = vperm.xlu1 %10137, %v7008_v23  }
 0x9dc   :  { %v7053_v2 = vpop.permute.xlu1 %7052 }
 0x9dd   :  { %v7056_v39 = vmul.f32 %v10529_v34, %v7053_v2 }
 0x9e0   :  { %v7065_v57 = vpop.permute.xlu0 %7064 }
 0x9e1   :  { %v7068_v11 = vmul.f32 %v10537_v4, %v7065_v57 }
 0x9e3   :  { %v7070_v43 = vadd.f32 %v7068_v11, %v7056_v39 }
 0x9e4   :  { %v7079_v21 = vpop.permute.xlu1 %7078 }
 0x9e5   :  { %v7048_v17 = vpop.permute.xlu0 %7047  ;;  %v7082_v23 = vmul.f32 %v10541_v20, %v7079_v21 }
 0x9e6   :  { %v7055_v46 = vmul.f32 %v10529_v34, %v7048_v17  ;;  %v7109_v34 = vsel %vm7106_vm7, %v10727_v31, 0 }
 0x9e7   :  { %v7084_v7 = vadd.f32 %v7082_v23, %v7070_v43  ;;  %v7194_v47 = vand.u32 4294901760, %v7109_v34 }
 0x9e9   :  { %v7060_v50 = vpop.permute.xlu1 %7059  ;;  %v7195_v19 = vsub.f32 %v7109_v34, %v7194_v47 }
 0x9ea   :  { %v7067_v33 = vmul.f32 %v10537_v4, %v7060_v50  ;;  %v7088_v1 = vpop.permute.xlu0 %7087  ;;  %v10176_v4 = vld [vmem:[%s11217_s5] sm:$0xff]  ;;  %v11235_v50 = vand.u32 4294901760, %v10901_v3 }
 0x9eb   :  { %v7095_v55 = vmul.f32 %v10551_v35, %v7088_v1  ;;  %v7196_v49 = vand.u32 4294901760, %v7195_v19 }
 0x9ec   :  { %v7069_v63 = vadd.f32 %v7067_v33, %v7055_v46  ;;  %v7624_v33 = vsel %vm132_vm2, %v10372_v44, 0 }
 0x9ed   :  { %v7197_v53 = vsub.f32 %v7195_v19, %v7196_v49  ;;  %v7693_v46 = vand.u32 4294901760, %v7624_v33 }
 0x9ee   :  { %v7074_v5 = vpop.permute.xlu1 %7073 }
 0x9ef   :  { %v7081_v36 = vmul.f32 %v10541_v20, %v7074_v5  ;;  %v7198_v2 = vand.u32 4294901760, %v7197_v53  ;;  %v7694_v11 = vsub.f32 %v7624_v33, %v7693_v46 }
 0x9f1   :  { %v7083_v22 = vadd.f32 %v7081_v36, %v7069_v63  ;;  %v11134_v36 = vld [vmem:[%s11215_s3] sm:$0xff]  ;;  %v7695_v39 = vand.u32 4294901760, %v7694_v11 }
 0x9f3   :  { %v7097_v28 = vadd.f32 %v7095_v55, %v7083_v22  ;;  %v7093_v37 = vpop.permute.xlu1 %7092 }
 0x9f4   :  { %v7096_v45 = vmul.f32 %v10551_v35, %v7093_v37 }
 0x9f5   :  { %v7099_v0 = vsub.f32 %v7097_v28, %v10176_v4  ;;  %v7696_v28 = vsub.f32 %v7694_v11, %v7695_v39 }
 0x9f6   :  { %v7098_v60 = vadd.f32 %v7096_v45, %v7084_v7 }
 0x9f7   :  { %v7102_v20 = vmul.f32 %v7101_v6, %v7099_v0  ;;  %v11236_v0 = vmov 0.0|0.0  }
 0x9f8   :  { %v7100_v62 = vsub.f32 %v7098_v60, %v10177_v41 }
 0x9f9   :  { %v7104_v51 = vadd.f32 %v10176_v4, %v7102_v20  ;;  %v7697_v4 = vand.u32 4294901760, %v7696_v28 }
 0x9fa   :  { %v7103_v59 = vmul.f32 %v7101_v6, %v7100_v62 }
 0x9fb   :  { %v7112_v35 = vsel %vm7106_vm7, %v7104_v51, 0  ;;  %8654 = vst.msk [vmem:[%s11220_s8] sm:$0xff] %vm7106_vm7, %v7104_v51 }
 0x9fc   :  { %v7118_v10 = vand.u32 4294901760, %v7112_v35  ;;  %v7105_v32 = vadd.f32 %v10177_v41, %v7103_v59 }
 0x9fe   :  { %v7115_v31 = vsel %vm7106_vm7, %v7105_v32, 0  ;;  %8655 = vst.msk [vmem:[%s11220_s8 + $0x8] sm:$0xff] %vm7106_vm7, %v7105_v32  ;;  %v7206_v56 = vsub.f32 %v7112_v35, %v7118_v10 }
 0x9ff   :  { %v7121_v58 = vand.u32 4294901760, %v7115_v31 }
 0xa00   :  { %v7207_v54 = vand.u32 4294901760, %v7206_v56 }
 0xa01   :  { %v9880_v52 = vpack.c.bf16 %v7121_v58, %v7118_v10  ;;  %v7213_v24 = vsub.f32 %v7115_v31, %v7121_v58 }
 0xa02   :  { %v7208_v14 = vsub.f32 %v7206_v56, %v7207_v54 }
 0xa03   :  { %9881 = vmatprep.subr.bf16.mxu1 %v9880_v52  ;;  %v7214_v61 = vand.u32 4294901760, %v7213_v24  ;;  %v9888_v21 = vpack.c.bf16 %v7213_v24, %v7206_v56 }
 0xa04   :  { %9883 = vmatpush3.bf16.xpose.msra.mxu1 %v9880_v52  ;;  %v7209_v42 = vand.u32 4294901760, %v7208_v14 }
 0xa05   :  { %v7215_v25 = vsub.f32 %v7213_v24, %v7214_v61  ;;  %v9896_v17 = vpack.c.bf16 %v7214_v61, %v7207_v54 }
 0xa07   :  { %v7216_v18 = vand.u32 4294901760, %v7215_v25 }
 0xa09   :  { %v9884_v57 = vpack.c.bf16 %v7216_v18, %v7209_v42 }
 0xa0b   :  { %9513 = vmatmul.mubr.f32.vlgmr.msra.gmra.mrb[12].mxu1 %v7198_v2  ;;  %9885 = vmatprep.subr.bf16.mxu1 %v9884_v57 }
 0xa0c   :  { %9887 = vmatpush3.bf16.xpose.msra.mxu1 %v9884_v57  ;;  %9519 = vmatprep.mubr.f32.mxu1 %v10892_v29 }
 0xa0d   :  { %9889 = vmatprep.subr.bf16.mxu1 %v9888_v21 }
 0xa13   :  { %9520 = vmatmul.mubr.f32.vlgmr.msra.gmra.mrb[12].mxu1 %v7194_v47 }
 0xa14   :  { %9891 = vmatpush3.bf16.xpose.msra.mxu1 %v9888_v21  ;;  %9526 = vmatprep.mubr.f32.mxu1 %v10901_v3  ;;  %v11128_v3 = vld [vmem:[%s11215_s3 + $0x8] sm:$0xff]  ;;  %s8675_s3 = sld [smem:[#allocation2 + $0x2]] }
 0xa15   :  { %9893 = vmatprep.subr.bf16.mxu1 %v9880_v52 }
 0xa1a   :  { %v11171_v42 = vstv %s8675_s3 }
 0xa1b   :  { %9527 = vmatmul.mubr.f32.vlgmr.msra.gmra.mrb[12].mxu1 %v7195_v19 }
 0xa1c   :  { %9895 = vmatpush3.bf16.xpose.msra.mxu1 %v9880_v52  ;;  %9533 = vmatprep.mubr.f32.mxu1 %v11235_v50 }
 0xa1d   :  { %9897 = vmatprep.subr.bf16.mxu1 %v9896_v17 }
 0xa23   :  { %9534 = vmatmul.mubr.f32.vlgmr.msra.gmra.mrb[12].mxu1 %v7196_v49 }
 0xa24   :  { %9899 = vmatpush3.bf16.xpose.msra.mxu1 %v9896_v17  ;;  %9540 = vmatprep.mubr.f32.mxu1 %v10892_v29 }
 0xa25   :  { %9901 = vmatprep.subr.bf16.mxu1 %v9880_v52 }
 0xa2b   :  { %9541 = vmatmul.mubr.f32.vlgmr.msra.gmra.mrb[12].mxu1 %v7194_v47 }
 0xa2c   :  { %9903 = vmatpush3.bf16.xpose.msra.mxu1 %v9880_v52  ;;  %9547 = vmatprep.mubr.f32.mxu1 %v10892_v29 }
 0xa33   :  { %9548 = vmatmul.mubr.f32.vlgmr.msra.gmra.mrb[12].mxu1 %v7194_v47 }
 0xb06   :  { %v9549_v1 = vpop.f32.mrb[12].mxu1 }
 0xb07   :  { %v7620_v5 = vmul.f32 %v11128_v3, %v9549_v1  ;;  %v7609_v63 = vpop.f32.mrb[13].mxu1 }
 0xb08   :  { %v7619_v29 = vmul.f32 %v11134_v36, %v7609_v63 }
 0xb09   :  { %v11138_v44 = vsub.f32 %v10478_v38, %v7620_v5 }
 0xb0a   :  { %v11141_v23 = vsub.f32 %v10481_v40, %v7619_v29 }
 0xb0b   :  { %v7630_v55 = vand.u32 4294901760, %v11138_v44 }
 0xb0c   :  { %v7627_v22 = vand.u32 4294901760, %v11141_v23 }
 0xb0d   :  { %v7712_v43 = vsub.f32 %v11138_v44, %v7630_v55 }
 0xb0e   :  { %v7705_v37 = vsub.f32 %v11141_v23, %v7627_v22  ;;  %v9905_v7 = vpack.c.bf16 %v7630_v55, %v7627_v22 }
 0xb0f   :  { %v7713_v6 = vand.u32 4294901760, %v7712_v43 }
 0xb10   :  { %v7706_v45 = vand.u32 4294901760, %v7705_v37  ;;  %9906 = vmatpush3.bf16.msra.mxu0 %v9905_v7  ;;  %v9911_v41 = vpack.c.bf16 %v7712_v43, %v7705_v37 }
 0xb11   :  { %9907 = vmatprep.subr.bf16.mxu0 %v11236_v0  ;;  %v7714_v38 = vsub.f32 %v7712_v43, %v7713_v6 }
 0xb12   :  { %v7707_v60 = vsub.f32 %v7705_v37, %v7706_v45  ;;  %v9917_v62 = vpack.c.bf16 %v7713_v6, %v7706_v45 }
 0xb13   :  { %9555 = vmatmul.mubr.f32.vlgmr.msra.gmra.mrb[12].mxu0 %v7697_v4  ;;  %v7715_v40 = vand.u32 4294901760, %v7714_v38 }
 0xb14   :  { %v7708_v34 = vand.u32 4294901760, %v7707_v60  ;;  %9561 = vmatprep.mubr.msk.f32.mxu0 %vm10199_vm1, %v11231_v30 }
 0xb16   :  { %v9908_v20 = vpack.c.bf16 %v7715_v40, %v7708_v34 }
 0xb18   :  { %9909 = vmatpush3.bf16.msra.mxu0 %v9908_v20 }
 0xb19   :  { %9910 = vmatprep.subr.bf16.mxu0 %v11236_v0 }
 0xb1b   :  { %9562 = vmatmul.mubr.f32.vlgmr.msra.gmra.mrb[14].mxu0 %v7693_v46 }
 0xb1c   :  { %9912 = vmatpush3.bf16.msra.mxu0 %v9911_v41  ;;  %9568 = vmatprep.mubr.msk.f32.mxu0 %vm10199_vm1, %v11231_v30 }
 0xb1d   :  { %9913 = vmatprep.subr.bf16.mxu0 %v11236_v0 }
 0xb1f   :  { %9569 = vmatmul.mubr.f32.vlgmr.msra.gmra.mrb[16].mxu0 %v7694_v11 }
 0xb20   :  { %9915 = vmatpush3.bf16.msra.mxu0 %v9905_v7  ;;  %9575 = vmatprep.mubr.msk.f32.mxu0 %vm10199_vm1, %v11231_v30 }
 0xb21   :  { %9916 = vmatprep.subr.bf16.mxu0 %v11236_v0 }
 0xb23   :  { %9576 = vmatmul.mubr.f32.vlgmr.msra.gmra.mrb[18].mxu0 %v7695_v39 }
 0xb24   :  { %9918 = vmatpush3.bf16.msra.mxu0 %v9917_v62  ;;  %9582 = vmatprep.mubr.msk.f32.mxu0 %vm10199_vm1, %v11231_v30 }
 0xb25   :  { %9919 = vmatprep.subr.bf16.mxu0 %v11236_v0 }
 0xb27   :  { %9583 = vmatmul.mubr.f32.vlgmr.msra.gmra.mrb[20].mxu0 %v7693_v46 }
 0xb28   :  { %9921 = vmatpush3.bf16.msra.mxu0 %v9905_v7  ;;  %9589 = vmatprep.mubr.msk.f32.mxu0 %vm10199_vm1, %v11231_v30  ;;  %v596_v30 = vmax.f32 %v10522_v48, 1e-30 }
 0xb2a   :  { %10170 = vrcp.f32 %v596_v30 }
 0xb2b   :  { %9590 = vmatmul.mubr.f32.vlgmr.msra.gmra.mrb[22].mxu0 %v7693_v46 }
 0xb2c   :  { %9594 = vmatprep.mubr.f32.mxu0 %v10322_v26  ;;  %v11167_v26 = vld [vmem:[%s11218_s6] sm:$0xff] }
 0xb2d   :  { %v8085_v61 = vmul.f32 %v11167_v26, %v10522_v48  ;;  %v8604_v1 = vand.u32 2147483647, %v11167_v26 }
 0xb34   :  { %v10171_v46 = vpop.eup %10170 }
 0xbe6   :  { %v7699_v51 = vpop.f32.mrb[12].mxu0 }
 0xbe7   :  { %v9556_v47 = vpop.f32.mrb[13].mxu0 }
 0xbee   :  { %v7780_v59 = vpop.f32.mrb[14].mxu0 }
 0xbef   :  { %v7781_v35 = vadd.f32 %v7780_v59, %v7699_v51  ;;  %v9563_v10 = vpop.f32.mrb[15].mxu0 }
 0xbf2   :  { %v7856_v32 = vpop.f32.mrb[16].mxu0 }
 0xbf3   :  { %v7857_v19 = vadd.f32 %v7856_v32, %v7781_v35  ;;  %v9570_v31 = vpop.f32.mrb[17].mxu0 }
 0xbf6   :  { %v7931_v56 = vpop.f32.mrb[18].mxu0 }
 0xbf7   :  { %v7932_v58 = vadd.f32 %v7931_v56, %v7857_v19  ;;  %v9577_v54 = vpop.f32.mrb[19].mxu0 }
 0xbfa   :  { %v8008_v52 = vpop.f32.mrb[20].mxu0 }
 0xbfb   :  { %v8009_v49 = vadd.f32 %v8008_v52, %v7932_v58  ;;  %v9584_v24 = vpop.f32.mrb[21].mxu0 }
 0xbfe   :  { %v8081_v14 = vpop.f32.mrb[22].mxu0 }
 0xbff   :  { %v8082_v53 = vadd.f32 %v8081_v14, %v8009_v49  ;;  %v9591_v25 = vpop.f32.mrb[23].mxu0 }
 0xc01   :  { %v8086_v18 = vadd.f32 %v8085_v61, %v8082_v53 }
 0xc03   :  { %v8088_v2 = vsub.f32 %v8086_v18, %v11171_v42  ;;  %v8090_v57 = vsub.f32 0.0, %v8086_v18 }
 0xc05   :  { %v8091_v21 = vsub.f32 %v8090_v57, %v11171_v42  ;;  %v8089_v17 = vmax.f32 %v8088_v2, 0.0 }
 0xc07   :  { %v8092_v50 = vmax.f32 %v8091_v21, 0.0  ;;  %v8645_v21 = vstv %s8644_s18 }
 0xc08   :  { %vm8646_vm10 = vcmp.eq.s32.totalorder %v8645_v21, 1 }
 0xc09   :  { %v8093_v33 = vsub.f32 %v8089_v17, %v8092_v50 }
 0xc0b   :  { %v8094_v11 = vmul.f32 %v10171_v46, %v8093_v33 }
 0xc0d   :  { %v8095_v5 = vsel %vm595_vm8, %v8094_v11, 0.0 }
 0xc0e   :  { %v11178_v63 = vsub.f32 %v8095_v5, %v11167_v26  ;;  %v8603_v29 = vand.u32 2147483647, %v8095_v5 }
 0xc10   :  { %v8098_v39 = vand.u32 4294901760, %v11178_v63  ;;  %v8605_v55 = vsub.f32 %v8603_v29, %v8604_v1 }
 0xc12   :  { %9592 = vmatprep.subr.mxu0 %v8098_v39  ;;  %v8606_v22 = vsel %vm132_vm2, %v8605_v55, 0.0  ;;  %v8185_v43 = vsub.f32 %v11178_v63, %v8098_v39 }
 0xc13   :  { %8607 = vadd.xlane.f32.xlu0 %v8606_v22  ;;  %9593 = vmatpush3.msra.mxu0 %v8098_v39 }
 0xc14   :  { %9595 = vmatmul.mubr.f32.vlgmr.msra.gmra.mrb[24].mxu0 %v10324_v27  ;;  %v8186_v48 = vand.u32 4294901760, %v8185_v43 }
 0xc15   :  { %9599 = vmatprep.mubr.f32.mxu0 %v10279_v8 }
 0xc16   :  { %v8187_v28 = vsub.f32 %v8185_v43, %v8186_v48 }
 0xc18   :  { %v8188_v37 = vand.u32 4294901760, %v8187_v28 }
 0xc1a   :  { %9597 = vmatprep.subr.mxu0 %v8188_v37 }
 0xc1b   :  { %9598 = vmatpush3.msra.mxu0 %v8188_v37 }
 0xc1c   :  { %9600 = vmatmul.mubr.f32.vlgmr.msra.gmra.mrb[24].mxu0 %v10281_v9  ;;  %9602 = vmatprep.subr.mxu0 %v8185_v43 }
 0xc1d   :  { %9603 = vmatpush3.msra.mxu0 %v8185_v43  ;;  %9604 = vmatprep.mubr.f32.mxu0 %v10292_v12 }
 0xc1e   :  { %9607 = vmatprep.subr.mxu0 %v8098_v39 }
 0xc24   :  { %9605 = vmatmul.mubr.f32.vlgmr.msra.gmra.mrb[24].mxu0 %v10295_v13 }
 0xc25   :  { %9608 = vmatpush3.msra.mxu0 %v8098_v39  ;;  %9609 = vmatprep.mubr.f32.mxu0 %v10299_v15 }
 0xc26   :  { %9612 = vmatprep.subr.mxu0 %v8186_v48 }
 0xc2c   :  { %9610 = vmatmul.mubr.f32.vlgmr.msra.gmra.mrb[24].mxu0 %v10302_v16 }
 0xc2d   :  { %9613 = vmatpush3.msra.mxu0 %v8186_v48  ;;  %9614 = vmatprep.mubr.f32.mxu0 %v10279_v8 }
 0xc2e   :  { %9617 = vmatprep.subr.mxu0 %v8098_v39 }
 0xc34   :  { %9615 = vmatmul.mubr.f32.vlgmr.msra.gmra.mrb[24].mxu0 %v10281_v9 }
 0xc35   :  { %9618 = vmatpush3.msra.mxu0 %v8098_v39  ;;  %9619 = vmatprep.mubr.f32.mxu0 %v10279_v8 }
 0xc3c   :  { %9620 = vmatmul.mubr.f32.vlgmr.msra.gmra.mrb[24].mxu0 %v10281_v9 }
 0xd0f   :  { %v9621_v12 = vpop.f32.mrb[24].mxu0 }
 0xd10   :  { %v8587_v13 = vmul.f32 %v11128_v3, %v9621_v12  ;;  %v8576_v27 = vpop.f32.mrb[25].mxu0  ;;  %v8608_v3 = vpop.xlane.xlu0 %8607 }
 0xd11   :  { %v8586_v15 = vmul.f32 %v11134_v36, %v8576_v27  ;;  %v8609_v36 = vrot.slane %v8608_v3, 4 }
 0xd12   :  { %v8589_v7 = vmul.f32 %v8587_v13, %v11138_v44  ;;  %v8620_v16 = vmul.f32 %v8587_v13, %v8587_v13 }
 0xd13   :  { %v8588_v6 = vmul.f32 %v8586_v15, %v11141_v23  ;;  %v8619_v45 = vmul.f32 %v8586_v15, %v8586_v15  ;;  %v8610_v40 = vadd.f32 %v8609_v36, %v8608_v3 }
 0xd14   :  { %v8591_v4 = vsel %vm132_vm2, %v8589_v7, 0.0  ;;  %v8622_v0 = vsel %vm132_vm2, %v8620_v16, 0.0 }
 0xd15   :  { %v8590_v8 = vsel %vm132_vm2, %v8588_v6, 0.0  ;;  %v8621_v9 = vsel %vm132_vm2, %v8619_v45, 0.0  ;;  %v8611_v44 = vrot.slane %v8610_v40, 2 }
 0xd16   :  { %v8623_v38 = vadd.f32 %v8622_v0, %v8621_v9  ;;  %v8592_v60 = vadd.f32 %v8591_v4, %v8590_v8 }
 0xd17   :  { %v8612_v47 = vadd.f32 %v8611_v44, %v8610_v40 }
 0xd18   :  { %8624 = vadd.xlane.f32.xlu0 %v8623_v38  ;;  %8593 = vadd.xlane.f32.xlu1 %v8592_v60 }
 0xd19   :  { %v8613_v19 = vrot.slane %v8612_v47, 1 }
 0xd1b   :  { %v8614_v52 = vadd.f32 %v8613_v19, %v8612_v47 }
 0xda5   :  { %v8625_v34 = vpop.xlane.xlu0 %8624  ;;  %v8594_v20 = vpop.xlane.xlu1 %8593 }
 0xda6   :  { %v8626_v23 = vrot.slane %v8625_v34, 4  ;;  %v8595_v41 = vrot.slane %v8594_v20, 4 }
 0xda8   :  { %v8627_v62 = vadd.f32 %v8626_v23, %v8625_v34  ;;  %v8596_v51 = vadd.f32 %v8595_v41, %v8594_v20 }
 0xdaa   :  { %v8628_v59 = vrot.slane %v8627_v62, 2  ;;  %v8597_v35 = vrot.slane %v8596_v51, 2 }
 0xdac   :  { %v8629_v10 = vadd.f32 %v8628_v59, %v8627_v62  ;;  %v8598_v32 = vadd.f32 %v8597_v35, %v8596_v51 }
 0xdae   :  { %v8599_v31 = vrot.slane %v8598_v32, 1  ;;  %v8630_v56 = vrot.slane %v8629_v10, 1 }
 0xdb0   :  { %v8600_v58 = vadd.f32 %v8599_v31, %v8598_v32  ;;  %v8631_v54 = vadd.f32 %v8630_v56, %v8629_v10 }
 0xdb2   :  { %10078 = vpush %v8600_v58 }
 0xdb3   :  { %10080 = vpush %v8614_v52 }
 0xdb4   :  { %10082 = vpush %v8631_v54 }
 0xde3   :  { %s10079_s6 = spop %10078 }
 0xde4   :  { %s10081_s16 = spop %10080  ;;  %v8602_v61 = vstv %s10079_s6 }
 0xde5   :  { %s10083_s0 = spop %10082  ;;  %v8616_v30 = vstv %s10081_s16 }
 0xde6   :  { %v8633_v49 = vstv %s10083_s0  ;;  %v8617_v14 = vmul.f32 %v8616_v30, %v11171_v42  ;;  %v8649_v42 = vstv %s8678_s19 }
 0xde7   :  { %v8635_v24 = vmax.f32 %v8633_v49, 1e-30  ;;  %vm8634_vm9 = vcmp.gt.f32.partialorder %v8633_v49, 0.0 }
 0xde8   :  { %v8618_v53 = vsub.f32 %v8602_v61, %v8617_v14 }
 0xde9   :  { %10172 = vrcp.f32 %v8635_v24 }
 0xdf3   :  { %v10173_v25 = vpop.eup %10172 }
 0xdf4   :  { %v8637_v18 = vmul.f32 %v10173_v25, %v8618_v53 }
 0xdf6   :  { %v8638_v2 = vmax.f32 %v8637_v18, 0.0 }
 0xdf8   :  { %v8639_v57 = vmin.f32 %v8638_v2, 1.0 }
 0xdfa   :  { %v8640_v17 = vsel %vm8634_vm9, %v8639_v57, 0.0 }
 0xdfb   :  { %v8641_v50 = vmul.f32 %v8640_v17, %v11178_v63 }
 0xdfd   :  { %v8642_v33 = vadd.f32 %v11167_v26, %v8641_v50 }
 0xdff   :  { %v8647_v46 = vsel %vm8646_vm10, %v8642_v33, %v11167_v26 }
 0xe00   :  { %v8648_v11 = vsub.f32 %v8647_v46, %v11167_v26 }
 0xe02   :  { %v8650_v1 = vmul.f32 %v8649_v42, %v8648_v11 }
 0xe04   :  { %v8651_v5 = vadd.f32 %v11167_v26, %v8650_v1 }
 0xe06   :  { %8656 = vst.msk [vmem:[%s11221_s9] sm:$0xff] %vm132_vm2, %v8651_v5 }
 0xe07   :  { %8669 = vsyncpa [#allocation3], 1 }

</bundles_post_ra>
